<compile_context>
chip_gen: v7x
topology: tpu7x:2x2x1
jax: 0.10.0
libtpu: 0.0.40
codegen_flags: <defaults>
</compile_context>

<pallas_src>
import functools
from types import SimpleNamespace

import numpy as np
import jax
import jax.numpy as jnp
from jax.experimental import pallas as pl
from jax.experimental.pallas import tpu as pltpu


# ---------------------------------------------------------------------------
# Fused Pallas kernel: everything after the encoder's 32x mean-pool.
#
# Layouts (all 2-D, channels-minor on lanes):
#   pre-decoder : rows (node, ih), lanes (iw, channel)  -> (Nn*Hs, Ws*D) = (8, 128)
#   decoder     : rows (node, ih), lanes (iw, channel)  -> lane width stays 128 at every level
#   pred output : rows (node, oh), lanes (ow, rgb)      -> (Nn*64, 64*3) = (256, 192)
# ---------------------------------------------------------------------------
def _fused_model_kernel(*refs, n_nodes, hs, ws, dim, deg):
    (pooled_ref, pose_ref,
     proj_bd_ref, proj_bl_ref,
     ew1_ref, eb1_ref, ew2_ref, eb2_ref,
     gath_ref, erow_ref,
     conv1_bd_ref, conv1_bl_ref,
     m0, r0, bl0, m1, r1, bl1, m2, r2, bl2, m3, r3, bl3, m4, r4, bl4,
     final_bd_ref, final_bl_ref,
     pred_ref, msgs_ref) = refs

    dot = lambda a, b: jnp.dot(a, b, preferred_element_type=jnp.float32)
    lane_w = ws * dim                       # 128 at every decoder level (W doubles as C halves)
    rows = n_nodes * hs                     # pre-decoder row count: (node, ih)

    # ---- encoder head: 1x1 projection to feature_dim (block-diag over iw) ----
    h = dot(pooled_ref[...], proj_bd_ref[...]) + proj_bl_ref[...]          # (rows, lane_w)

    # ---- edge encoder: Linear(9,D) -> ReLU -> Linear(D,2D) -> Sigmoid ----
    # ew2/eb2 columns are pre-permuted (gamma = even, beta = odd columns of the torch layout,
    # i.e. view(E, D, 2)[..., 0/1]) and pre-tiled over iw, so no FiLM broadcast is materialised.
    e1 = jnp.maximum(dot(pose_ref[...], ew1_ref[...]) + eb1_ref[...], 0.0)  # (E, D)
    z = dot(e1, ew2_ref[...]) + eb2_ref[...]                                # (E, 2*lane_w)
    s = 1.0 / (1.0 + jnp.exp(-z))                                           # exact sigmoid
    gam_all = s[:, :lane_w]                                                 # (E, lane_w)
    bet_all = s[:, lane_w:]

    # ---- GCN FiLM message passing: m_e = gamma_e * image[src_e] + beta_e; mean over in-edges
    acc = jnp.zeros((rows, lane_w), jnp.float32)
    for j in range(deg):                                                    # small fixed in-degree
        g_j = gath_ref[j * rows:(j + 1) * rows, :]                          # (rows, rows) src gather
        e_j = erow_ref[j * rows:(j + 1) * rows, :]                          # (rows, E) edge select
        acc = acc + dot(e_j, gam_all) * dot(g_j, h) + dot(e_j, bet_all)
    msgs_ref[...] = acc * (1.0 / deg)
    # NOTE: the reference node_udf stores the mean under key 'images' while GCN.forward returns
    # ndata['image'], so the aggregate never reaches the caller; g_h below is therefore h itself.

    # ---- torch.cat((h, g_h), dim=1) + conv1: folded to h @ (W[:D] + W[D:]) (block-diag) ----
    x = dot(h, conv1_bd_ref[...]) + conv1_bl_ref[...]                       # (rows, lane_w)

    # ---- decoder: 5 TransBlocks then Conv2d(nfa[5], output_dim, kernel_size=1) ----
    # TODO(synk): TransBlock source not provided; stand-in = ConvTranspose2d(5, s=2, p=2, op=1)+ReLU.
    for (m_ref, r_ref, bl_ref) in ((m0, r0, bl0), (m1, r1, bl1), (m2, r2, bl2),
                                   (m3, r3, bl3), (m4, r4, bl4)):
        bh = x.shape[0]
        t = dot(x, m_ref[...])                                              # (bh, 5*lane_w) taps
        y = bl_ref[...]
        for kh in range(5):                                                 # col2im on the MXU
            y = y + dot(r_ref[:, kh * bh:(kh + 1) * bh],
                        t[:, kh * lane_w:(kh + 1) * lane_w])
        x = jnp.maximum(y, 0.0)                                             # (2*bh, lane_w)

    pred_ref[...] = dot(x, final_bd_ref[...]) + final_bl_ref[...]           # (Nn*64, 64*out_dim)


def fused_forward(pooled_l, pose, prep, opt, n_nodes):
    dim = opt.feature_dim
    hs = opt.image_size // 32
    ws = hs
    deg = opt.camera_num - 1
    size = opt.image_size

    args = [pooled_l, pose,
            prep["proj_bd"], prep["proj_bl"],
            prep["ew1"], prep["eb1"], prep["ew2"], prep["eb2"],
            prep["gath"], prep["erow"],
            prep["conv1_bd"], prep["conv1_bl"]]
    for (m, r, b) in prep["tb"]:
        args.extend([m, r, b])
    args.extend([prep["final_bd"], prep["final_bl"]])

    kernel = functools.partial(_fused_model_kernel, n_nodes=n_nodes, hs=hs, ws=ws,
                               dim=dim, deg=deg)
    out_shape = (jax.ShapeDtypeStruct((n_nodes * size, size * opt.output_dim), jnp.float32),
                 jax.ShapeDtypeStruct((n_nodes * hs, ws * dim), jnp.float32))
    # Single grid step; every (small) operand is a full-array VMEM block.  The fused step trades
    # v7x megacore grid-parallelism for removing ~20 dispatches + all inter-layer HBM traffic,
    # which dominates at this problem size.
    in_specs = [pl.BlockSpec(tuple(a.shape), lambda i: (0, 0)) for a in args]
    out_specs = (pl.BlockSpec((n_nodes * size, size * opt.output_dim), lambda i: (0, 0)),
                 pl.BlockSpec((n_nodes * hs, ws * dim), lambda i: (0, 0)))

    return pl.pallas_call(
        kernel,
        out_shape=out_shape,
        grid_spec=pltpu.PrefetchScalarGridSpec(
            num_scalar_prefetch=0,
            grid=(1,),
            in_specs=in_specs,
            out_specs=out_specs,
        ),
        compiler_params=pltpu.CompilerParams(
            dimension_semantics=("arbitrary",),
            vmem_limit_bytes=32 * 1024 * 1024,
        ),
    )(*args)


# ---------------------------------------------------------------------------
# Host-side (outside jit) parameter re-layout — runs once per parameter set.
# ---------------------------------------------------------------------------
def _block_diag(block, reps):
    a, b = block.shape
    out = np.zeros((reps * a, reps * b), np.float32)
    for r in range(reps):
        out[r * a:(r + 1) * a, r * b:(r + 1) * b] = block
    return out


def prepare_params(params, src_ids, opt):
    dim = opt.feature_dim
    hs = opt.image_size // 32
    ws = hs
    n_nodes = int(src_ids.shape[0])
    deg = int(src_ids.shape[1])
    n_edges = n_nodes * deg
    f32 = np.float32
    p = {}

    # encoder 1x1 projection (stand-in backbone head), block-diag over iw
    p["proj_bd"] = _block_diag(np.asarray(params["enc_proj_w"], f32), ws)
    p["proj_bl"] = np.tile(np.asarray(params["enc_proj_b"], f32).reshape(1, -1), (1, ws))

    # edge encoder; w2/b2 columns permuted to [gamma | beta] (matching view(E,D,2)[...,0/1])
    # and pre-tiled over iw so the kernel needs no FiLM broadcast.
    g = params["gcn1"]
    p["ew1"] = np.asarray(g["w1"], f32)
    p["eb1"] = np.asarray(g["b1"], f32).reshape(1, -1)
    w2 = np.asarray(g["w2"], f32)
    b2 = np.asarray(g["b2"], f32)
    colmap = np.zeros((2 * dim, 2 * ws * dim), f32)
    for iw in range(ws):
        for ci in range(dim):
            colmap[2 * ci, iw * dim + ci] = 1.0                   # gamma: even columns
            colmap[2 * ci + 1, ws * dim + iw * dim + ci] = 1.0    # beta : odd columns
    p["ew2"] = w2 @ colmap
    p["eb2"] = (b2 @ colmap).reshape(1, -1)

    # GCN gather (src-node rows) and edge-select matrices, stacked over in-edge slot j
    rows = n_nodes * hs
    gath = np.zeros((deg * rows, rows), f32)
    erow = np.zeros((deg * rows, n_edges), f32)
    for j in range(deg):
        for d in range(n_nodes):
            s = int(src_ids[d, j])
            for ih in range(hs):
                gath[j * rows + d * hs + ih, s * hs + ih] = 1.0
                erow[j * rows + d * hs + ih, d * deg + j] = 1.0
    p["gath"] = gath
    p["erow"] = erow

    # conv1 on torch.cat((h, g_h=h), 1): fold to h @ (W[:D] + W[D:]); block-diag over iw
    c1w = np.asarray(params["conv1_w"], f32)
    c1b = np.asarray(params["conv1_b"], f32)
    p["conv1_bd"] = _block_diag(c1w[:dim] + c1w[dim:], ws)
    p["conv1_bl"] = np.tile(c1b.reshape(1, -1), (1, ws))

    # TransBlocks: ConvTranspose2d(k=5, s=2, padding=2, output_padding=1) in the
    # (rows=(node,ih), lanes=(iw,ci)) layout as Mcat = [M_0|..|M_4] (tap/lane map per kh)
    # and Rcat = [R_0|..|R_4] (0/1 output-row scatter incl. interleave + boundary clipping).
    nfa = [dim, dim // 2, dim // 4, dim // 8, dim // 16, dim // 32]
    h_cur, w_cur = hs, ws
    tbs = []
    for i in range(5):
        w_t = np.asarray(params["dec"]["tb_w"][i], f32)           # (Cin, Cout, 5, 5) torch layout
        b_t = np.asarray(params["dec"]["tb_b"][i], f32)
        cin, cout = nfa[i], nfa[i + 1]
        h_out, w_out = 2 * h_cur, 2 * w_cur
        mcat = np.zeros((w_cur * cin, 5 * w_out * cout), f32)
        for kh in range(5):
            off = kh * w_out * cout
            for iw in range(w_cur):
                for ow in range(w_out):
                    kw = ow + 2 - 2 * iw                          # ow = 2*iw + kw - 2
                    if 0 <= kw <= 4:
                        mcat[iw * cin:(iw + 1) * cin,
                             off + ow * cout:off + (ow + 1) * cout] = w_t[:, :, kh, kw]
        rcat = np.zeros((n_nodes * h_out, 5 * n_nodes * h_cur), f32)
        for kh in range(5):
            off = kh * n_nodes * h_cur
            for nb in range(n_nodes):
                for oh in range(h_out):
                    num = oh + 2 - kh                             # oh = 2*ih + kh - 2
                    if num % 2 == 0 and 0 <= num // 2 < h_cur:
                        rcat[nb * h_out + oh, off + nb * h_cur + num // 2] = 1.0
        blane = np.tile(b_t.reshape(1, -1), (1, w_out))
        tbs.append((mcat, rcat, blane))
        h_cur, w_cur = h_out, w_out
    p["tb"] = tbs

    # final Conv2d(nfa[5], output_dim, kernel_size=1), block-diag over ow
    p["final_bd"] = _block_diag(np.asarray(params["dec"]["out_w"], f32), w_cur)
    p["final_bl"] = np.tile(np.asarray(params["dec"]["out_b"], f32).reshape(1, -1), (1, w_cur))

    return jax.tree_util.tree_map(lambda a: jnp.asarray(a, jnp.float32), p)


# ---------------------------------------------------------------------------
# multi_view_dgl_model.forward
# ---------------------------------------------------------------------------
def model_forward(prep, node_images, edge_pose, opt):
    cam = opt.camera_num
    size = opt.image_size
    dim = opt.feature_dim
    image = node_images.reshape(-1, cam, 3, size, size)           # mirrors the reference view()
    x = image.reshape(-1, 3, size, size)
    n_nodes = x.shape[0]
    hs = size // 32
    # encoder stand-in: the five 2x2 mean pools collapse to one 32x32 mean pool (identical math);
    # the 1x1 projection to feature_dim runs inside the fused kernel.
    # TODO(synk): pretrained torchvision mobilenetv2/resnet backbone cannot be reproduced
    # in-script; the stand-in keeps the /32 spatial reduction and last-level channel count.
    pooled = x.reshape(n_nodes, 3, hs, 32, hs, 32).mean(axis=(3, 5))          # (Nn, 3, hs, hs)
    pooled_l = pooled.transpose(0, 2, 3, 1).reshape(n_nodes * hs, hs * 3)     # rows (n, ih), lanes (iw, ci)

    pred_l, msgs_l = fused_forward(pooled_l, edge_pose.astype(jnp.float32), prep, opt, n_nodes)

    # cheap XLA layout glue on the small outputs (single fusion each)
    pred = pred_l.reshape(n_nodes, size, size, opt.output_dim).transpose(0, 3, 1, 2)
    pred = pred.reshape(-1, cam, opt.output_dim, size, size)
    gcn_msgs = msgs_l.reshape(n_nodes, hs, hs, dim).transpose(0, 3, 1, 2)
    return pred, gcn_msgs


# ---------------------------------------------------------------------------
# Deterministic parameter initialisation (same structure/keys as before)
# ---------------------------------------------------------------------------
def init_params(key, opt):
    D = opt.feature_dim
    nfa = [D, D // 2, D // 4, D // 8, D // 16, D // 32]
    keys = jax.random.split(key, 16)

    def lin(k, fi, fo):
        kw, kb = jax.random.split(k)
        w = jax.random.normal(kw, (fi, fo), jnp.float32) / (fi ** 0.5)
        b = jax.random.normal(kb, (fo,), jnp.float32) * 0.01
        return w, b

    params = {}
    params["enc_proj_w"], params["enc_proj_b"] = lin(keys[0], 3, D)
    w1, b1 = lin(keys[1], 9, D)
    w2, b2 = lin(keys[2], D, 2 * D)
    params["gcn1"] = {"w1": w1, "b1": b1, "w2": w2, "b2": b2}
    params["conv1_w"], params["conv1_b"] = lin(keys[3], 2 * D, D)
    tb_w, tb_b = [], []
    for i in range(5):
        cin, cout = nfa[i], nfa[i + 1]
        kw, kb = jax.random.split(keys[4 + i])
        tb_w.append(jax.random.normal(kw, (cin, cout, 5, 5), jnp.float32) / ((cin * 25) ** 0.5))
        tb_b.append(jax.random.normal(kb, (cout,), jnp.float32) * 0.01)
    wo, bo = lin(keys[10], nfa[5], opt.output_dim)
    params["dec"] = {"tb_w": tb_w, "tb_b": tb_b, "out_w": wo, "out_b": bo}
    return params


# ---------------------------------------------------------------------------
if __name__ == "__main__":
    opt = SimpleNamespace(
        backbone="mobilenetv2", pretrained=False,
        feature_dim=64, camera_num=4, image_size=64, output_dim=3,
        compress_gcn=True, multi_gcn=False, skip_level=False, task="image",
    )
    batch = 1
    cam = opt.camera_num
    n_nodes = batch * cam
    deg = cam - 1
    n_edges = n_nodes * deg

    key = jax.random.PRNGKey(0)
    k_img, k_pose, k_par = jax.random.split(key, 3)
    # g.ndata['image']: one RGB image per camera node
    node_images = jax.random.normal(k_img, (n_nodes, 3, opt.image_size, opt.image_size),
                                    jnp.float32)
    # g.edata['pose']: 9-dim relative pose per directed edge (edge e = dst*deg + j, dst-major)
    edge_pose = jax.random.normal(k_pose, (n_edges, 9), jnp.float32)
    # fully-connected (no self-loop) camera graph per sample; src_ids[d, j] = source of in-edge j
    src_ids = np.array(
        [[s for s in range((d // cam) * cam, (d // cam) * cam + cam) if s != d]
         for d in range(n_nodes)], dtype=np.int32)

    params = init_params(k_par, opt)
    prep = prepare_params(params, src_ids, opt)       # host-side weight re-layout, once

    fwd = jax.jit(functools.partial(model_forward, opt=opt))
    pred_image, gcn_msgs = fwd(prep, node_images, edge_pose)
    jax.block_until_ready(pred_image)
    jax.block_until_ready(gcn_msgs)
    assert pred_image.shape == (batch, cam, opt.output_dim, opt.image_size, opt.image_size)
    assert gcn_msgs.shape == (n_nodes, opt.feature_dim, opt.image_size // 32, opt.image_size // 32)
    assert bool(jnp.all(jnp.isfinite(pred_image)))
    print("KERNEL_OK")
</pallas_src>

<mosaic_0001>
module attributes {stable_mosaic.version = 11 : i64} {
  func.func @_fused_model_kernel(%arg0: i32, %arg1: memref<8x6xf32, #tpu.memory_space<vmem>>, %arg2: memref<12x9xf32, #tpu.memory_space<vmem>>, %arg3: memref<6x128xf32, #tpu.memory_space<vmem>>, %arg4: memref<1x128xf32, #tpu.memory_space<vmem>>, %arg5: memref<9x64xf32, #tpu.memory_space<vmem>>, %arg6: memref<1x64xf32, #tpu.memory_space<vmem>>, %arg7: memref<64x256xf32, #tpu.memory_space<vmem>>, %arg8: memref<1x256xf32, #tpu.memory_space<vmem>>, %arg9: memref<24x8xf32, #tpu.memory_space<vmem>>, %arg10: memref<24x12xf32, #tpu.memory_space<vmem>>, %arg11: memref<128x128xf32, #tpu.memory_space<vmem>>, %arg12: memref<1x128xf32, #tpu.memory_space<vmem>>, %arg13: memref<128x640xf32, #tpu.memory_space<vmem>>, %arg14: memref<16x40xf32, #tpu.memory_space<vmem>>, %arg15: memref<1x128xf32, #tpu.memory_space<vmem>>, %arg16: memref<128x640xf32, #tpu.memory_space<vmem>>, %arg17: memref<32x80xf32, #tpu.memory_space<vmem>>, %arg18: memref<1x128xf32, #tpu.memory_space<vmem>>, %arg19: memref<128x640xf32, #tpu.memory_space<vmem>>, %arg20: memref<64x160xf32, #tpu.memory_space<vmem>>, %arg21: memref<1x128xf32, #tpu.memory_space<vmem>>, %arg22: memref<128x640xf32, #tpu.memory_space<vmem>>, %arg23: memref<128x320xf32, #tpu.memory_space<vmem>>, %arg24: memref<1x128xf32, #tpu.memory_space<vmem>>, %arg25: memref<128x640xf32, #tpu.memory_space<vmem>>, %arg26: memref<256x640xf32, #tpu.memory_space<vmem>>, %arg27: memref<1x128xf32, #tpu.memory_space<vmem>>, %arg28: memref<128x192xf32, #tpu.memory_space<vmem>>, %arg29: memref<1x192xf32, #tpu.memory_space<vmem>>, %arg30: memref<256x192xf32, #tpu.memory_space<vmem>>, %arg31: memref<8x128xf32, #tpu.memory_space<vmem>>) attributes {dimension_semantics = [#tpu.dimension_semantics<arbitrary>], iteration_bounds = array<i64: 1>, scalar_prefetch = 0 : i64, scratch_operands = 0 : i64, tpu.core_type = #tpu.core_type<tc>, window_params = [{pipeline_mode = #tpu.pipeline_mode<synchronous>, transform_indices = @transform_0, window_bounds = array<i64: 8, 6>}, {pipeline_mode = #tpu.pipeline_mode<synchronous>, transform_indices = @transform_1, window_bounds = array<i64: 12, 9>}, {pipeline_mode = #tpu.pipeline_mode<synchronous>, transform_indices = @transform_2, window_bounds = array<i64: 6, 128>}, {pipeline_mode = #tpu.pipeline_mode<synchronous>, transform_indices = @transform_3, window_bounds = array<i64: 1, 128>}, {pipeline_mode = #tpu.pipeline_mode<synchronous>, transform_indices = @transform_4, window_bounds = array<i64: 9, 64>}, {pipeline_mode = #tpu.pipeline_mode<synchronous>, transform_indices = @transform_5, window_bounds = array<i64: 1, 64>}, {pipeline_mode = #tpu.pipeline_mode<synchronous>, transform_indices = @transform_6, window_bounds = array<i64: 64, 256>}, {pipeline_mode = #tpu.pipeline_mode<synchronous>, transform_indices = @transform_7, window_bounds = array<i64: 1, 256>}, {pipeline_mode = #tpu.pipeline_mode<synchronous>, transform_indices = @transform_8, window_bounds = array<i64: 24, 8>}, {pipeline_mode = #tpu.pipeline_mode<synchronous>, transform_indices = @transform_9, window_bounds = array<i64: 24, 12>}, {pipeline_mode = #tpu.pipeline_mode<synchronous>, transform_indices = @transform_10, window_bounds = array<i64: 128, 128>}, {pipeline_mode = #tpu.pipeline_mode<synchronous>, transform_indices = @transform_11, window_bounds = array<i64: 1, 128>}, {pipeline_mode = #tpu.pipeline_mode<synchronous>, transform_indices = @transform_12, window_bounds = array<i64: 128, 640>}, {pipeline_mode = #tpu.pipeline_mode<synchronous>, transform_indices = @transform_13, window_bounds = array<i64: 16, 40>}, {pipeline_mode = #tpu.pipeline_mode<synchronous>, transform_indices = @transform_14, window_bounds = array<i64: 1, 128>}, {pipeline_mode = #tpu.pipeline_mode<synchronous>, transform_indices = @transform_15, window_bounds = array<i64: 128, 640>}, {pipeline_mode = #tpu.pipeline_mode<synchronous>, transform_indices = @transform_16, window_bounds = array<i64: 32, 80>}, {pipeline_mode = #tpu.pipeline_mode<synchronous>, transform_indices = @transform_17, window_bounds = array<i64: 1, 128>}, {pipeline_mode = #tpu.pipeline_mode<synchronous>, transform_indices = @transform_18, window_bounds = array<i64: 128, 640>}, {pipeline_mode = #tpu.pipeline_mode<synchronous>, transform_indices = @transform_19, window_bounds = array<i64: 64, 160>}, {pipeline_mode = #tpu.pipeline_mode<synchronous>, transform_indices = @transform_20, window_bounds = array<i64: 1, 128>}, {pipeline_mode = #tpu.pipeline_mode<synchronous>, transform_indices = @transform_21, window_bounds = array<i64: 128, 640>}, {pipeline_mode = #tpu.pipeline_mode<synchronous>, transform_indices = @transform_22, window_bounds = array<i64: 128, 320>}, {pipeline_mode = #tpu.pipeline_mode<synchronous>, transform_indices = @transform_23, window_bounds = array<i64: 1, 128>}, {pipeline_mode = #tpu.pipeline_mode<synchronous>, transform_indices = @transform_24, window_bounds = array<i64: 128, 640>}, {pipeline_mode = #tpu.pipeline_mode<synchronous>, transform_indices = @transform_25, window_bounds = array<i64: 256, 640>}, {pipeline_mode = #tpu.pipeline_mode<synchronous>, transform_indices = @transform_26, window_bounds = array<i64: 1, 128>}, {pipeline_mode = #tpu.pipeline_mode<synchronous>, transform_indices = @transform_27, window_bounds = array<i64: 128, 192>}, {pipeline_mode = #tpu.pipeline_mode<synchronous>, transform_indices = @transform_28, window_bounds = array<i64: 1, 192>}, {pipeline_mode = #tpu.pipeline_mode<synchronous>, transform_indices = @transform_29, window_bounds = array<i64: 256, 192>}, {pipeline_mode = #tpu.pipeline_mode<synchronous>, transform_indices = @transform_30, window_bounds = array<i64: 8, 128>}]} {
    %c0 = arith.constant 0 : index
    %c0_0 = arith.constant 0 : index
    %0 = vector.load %arg1[%c0, %c0_0] : memref<8x6xf32, #tpu.memory_space<vmem>>, vector<8x6xf32>
    %c0_1 = arith.constant 0 : index
    %c0_2 = arith.constant 0 : index
    %1 = vector.load %arg3[%c0_1, %c0_2] : memref<6x128xf32, #tpu.memory_space<vmem>>, vector<6x128xf32>
    %cst = arith.constant dense<0.000000e+00> : vector<8x128xf32>
    %2 = tpu.matmul %0, %1, %cst {dimension_numbers = #tpu.dot_dimension_numbers<[1], [0], [0], [1], [0, 0, 1, 1], [], []>} : vector<8x6xf32>, vector<6x128xf32>, vector<8x128xf32> -> vector<8x128xf32>
    %c0_3 = arith.constant 0 : index
    %c0_4 = arith.constant 0 : index
    %3 = vector.load %arg4[%c0_3, %c0_4] : memref<1x128xf32, #tpu.memory_space<vmem>>, vector<1x128xf32>
    %4 = vector.broadcast %3 : vector<1x128xf32> to vector<8x128xf32>
    %5 = arith.addf %2, %4 : vector<8x128xf32>
    %c0_5 = arith.constant 0 : index
    %c0_6 = arith.constant 0 : index
    %6 = vector.load %arg2[%c0_5, %c0_6] : memref<12x9xf32, #tpu.memory_space<vmem>>, vector<12x9xf32>
    %c0_7 = arith.constant 0 : index
    %c0_8 = arith.constant 0 : index
    %7 = vector.load %arg5[%c0_7, %c0_8] : memref<9x64xf32, #tpu.memory_space<vmem>>, vector<9x64xf32>
    %cst_9 = arith.constant dense<0.000000e+00> : vector<12x64xf32>
    %8 = tpu.matmul %6, %7, %cst_9 {dimension_numbers = #tpu.dot_dimension_numbers<[1], [0], [0], [1], [0, 0, 1, 1], [], []>} : vector<12x9xf32>, vector<9x64xf32>, vector<12x64xf32> -> vector<12x64xf32>
    %c0_10 = arith.constant 0 : index
    %c0_11 = arith.constant 0 : index
    %9 = vector.load %arg6[%c0_10, %c0_11] : memref<1x64xf32, #tpu.memory_space<vmem>>, vector<1x64xf32>
    %10 = vector.broadcast %9 : vector<1x64xf32> to vector<12x64xf32>
    %11 = arith.addf %8, %10 : vector<12x64xf32>
    %cst_12 = arith.constant 0.000000e+00 : f32
    %12 = vector.broadcast %cst_12 : f32 to vector<12x64xf32>
    %13 = arith.maximumf %11, %12 : vector<12x64xf32>
    %c0_13 = arith.constant 0 : index
    %c0_14 = arith.constant 0 : index
    %14 = vector.load %arg7[%c0_13, %c0_14] : memref<64x256xf32, #tpu.memory_space<vmem>>, vector<64x256xf32>
    %cst_15 = arith.constant dense<0.000000e+00> : vector<12x256xf32>
    %15 = tpu.matmul %13, %14, %cst_15 {dimension_numbers = #tpu.dot_dimension_numbers<[1], [0], [0], [1], [0, 0, 1, 1], [], []>} : vector<12x64xf32>, vector<64x256xf32>, vector<12x256xf32> -> vector<12x256xf32>
    %c0_16 = arith.constant 0 : index
    %c0_17 = arith.constant 0 : index
    %16 = vector.load %arg8[%c0_16, %c0_17] : memref<1x256xf32, #tpu.memory_space<vmem>>, vector<1x256xf32>
    %17 = vector.broadcast %16 : vector<1x256xf32> to vector<12x256xf32>
    %18 = arith.addf %15, %17 : vector<12x256xf32>
    %cst_18 = arith.constant 0.000000e+00 : f32
    %19 = vector.broadcast %cst_18 : f32 to vector<12x256xf32>
    %20 = arith.subf %19, %18 : vector<12x256xf32>
    %21 = math.exp %20 : vector<12x256xf32>
    %cst_19 = arith.constant 1.000000e+00 : f32
    %22 = vector.broadcast %cst_19 : f32 to vector<12x256xf32>
    %23 = arith.addf %22, %21 : vector<12x256xf32>
    %cst_20 = arith.constant 1.000000e+00 : f32
    %24 = vector.broadcast %cst_20 : f32 to vector<12x256xf32>
    %25 = arith.divf %24, %23 : vector<12x256xf32>
    %26 = vector.extract_strided_slice %25 {offsets = [0, 0], sizes = [12, 128], strides = [1, 1]} : vector<12x256xf32> to vector<12x128xf32>
    %27 = vector.extract_strided_slice %25 {offsets = [0, 128], sizes = [12, 128], strides = [1, 1]} : vector<12x256xf32> to vector<12x128xf32>
    %cst_21 = arith.constant 0.000000e+00 : f32
    %28 = vector.broadcast %cst_21 : f32 to vector<8x128xf32>
    %c0_22 = arith.constant 0 : index
    %c0_23 = arith.constant 0 : index
    %29 = vector.load %arg9[%c0_22, %c0_23] : memref<24x8xf32, #tpu.memory_space<vmem>>, vector<8x8xf32>
    %c0_24 = arith.constant 0 : index
    %c0_25 = arith.constant 0 : index
    %30 = vector.load %arg10[%c0_24, %c0_25] : memref<24x12xf32, #tpu.memory_space<vmem>>, vector<8x12xf32>
    %cst_26 = arith.constant dense<0.000000e+00> : vector<8x128xf32>
    %31 = tpu.matmul %30, %26, %cst_26 {dimension_numbers = #tpu.dot_dimension_numbers<[1], [0], [0], [1], [0, 0, 1, 1], [], []>} : vector<8x12xf32>, vector<12x128xf32>, vector<8x128xf32> -> vector<8x128xf32>
    %cst_27 = arith.constant dense<0.000000e+00> : vector<8x128xf32>
    %32 = tpu.matmul %29, %5, %cst_27 {dimension_numbers = #tpu.dot_dimension_numbers<[1], [0], [0], [1], [0, 0, 1, 1], [], []>} : vector<8x8xf32>, vector<8x128xf32>, vector<8x128xf32> -> vector<8x128xf32>
    %33 = arith.mulf %31, %32 : vector<8x128xf32>
    %34 = arith.addf %28, %33 : vector<8x128xf32>
    %cst_28 = arith.constant dense<0.000000e+00> : vector<8x128xf32>
    %35 = tpu.matmul %30, %27, %cst_28 {dimension_numbers = #tpu.dot_dimension_numbers<[1], [0], [0], [1], [0, 0, 1, 1], [], []>} : vector<8x12xf32>, vector<12x128xf32>, vector<8x128xf32> -> vector<8x128xf32>
    %36 = arith.addf %34, %35 : vector<8x128xf32>
    %c8 = arith.constant 8 : index
    %c0_29 = arith.constant 0 : index
    %37 = vector.load %arg9[%c8, %c0_29] : memref<24x8xf32, #tpu.memory_space<vmem>>, vector<8x8xf32>
    %c8_30 = arith.constant 8 : index
    %c0_31 = arith.constant 0 : index
    %38 = vector.load %arg10[%c8_30, %c0_31] : memref<24x12xf32, #tpu.memory_space<vmem>>, vector<8x12xf32>
    %cst_32 = arith.constant dense<0.000000e+00> : vector<8x128xf32>
    %39 = tpu.matmul %38, %26, %cst_32 {dimension_numbers = #tpu.dot_dimension_numbers<[1], [0], [0], [1], [0, 0, 1, 1], [], []>} : vector<8x12xf32>, vector<12x128xf32>, vector<8x128xf32> -> vector<8x128xf32>
    %cst_33 = arith.constant dense<0.000000e+00> : vector<8x128xf32>
    %40 = tpu.matmul %37, %5, %cst_33 {dimension_numbers = #tpu.dot_dimension_numbers<[1], [0], [0], [1], [0, 0, 1, 1], [], []>} : vector<8x8xf32>, vector<8x128xf32>, vector<8x128xf32> -> vector<8x128xf32>
    %41 = arith.mulf %39, %40 : vector<8x128xf32>
    %42 = arith.addf %36, %41 : vector<8x128xf32>
    %cst_34 = arith.constant dense<0.000000e+00> : vector<8x128xf32>
    %43 = tpu.matmul %38, %27, %cst_34 {dimension_numbers = #tpu.dot_dimension_numbers<[1], [0], [0], [1], [0, 0, 1, 1], [], []>} : vector<8x12xf32>, vector<12x128xf32>, vector<8x128xf32> -> vector<8x128xf32>
    %44 = arith.addf %42, %43 : vector<8x128xf32>
    %c16 = arith.constant 16 : index
    %c0_35 = arith.constant 0 : index
    %45 = vector.load %arg9[%c16, %c0_35] : memref<24x8xf32, #tpu.memory_space<vmem>>, vector<8x8xf32>
    %c16_36 = arith.constant 16 : index
    %c0_37 = arith.constant 0 : index
    %46 = vector.load %arg10[%c16_36, %c0_37] : memref<24x12xf32, #tpu.memory_space<vmem>>, vector<8x12xf32>
    %cst_38 = arith.constant dense<0.000000e+00> : vector<8x128xf32>
    %47 = tpu.matmul %46, %26, %cst_38 {dimension_numbers = #tpu.dot_dimension_numbers<[1], [0], [0], [1], [0, 0, 1, 1], [], []>} : vector<8x12xf32>, vector<12x128xf32>, vector<8x128xf32> -> vector<8x128xf32>
    %cst_39 = arith.constant dense<0.000000e+00> : vector<8x128xf32>
    %48 = tpu.matmul %45, %5, %cst_39 {dimension_numbers = #tpu.dot_dimension_numbers<[1], [0], [0], [1], [0, 0, 1, 1], [], []>} : vector<8x8xf32>, vector<8x128xf32>, vector<8x128xf32> -> vector<8x128xf32>
    %49 = arith.mulf %47, %48 : vector<8x128xf32>
    %50 = arith.addf %44, %49 : vector<8x128xf32>
    %cst_40 = arith.constant dense<0.000000e+00> : vector<8x128xf32>
    %51 = tpu.matmul %46, %27, %cst_40 {dimension_numbers = #tpu.dot_dimension_numbers<[1], [0], [0], [1], [0, 0, 1, 1], [], []>} : vector<8x12xf32>, vector<12x128xf32>, vector<8x128xf32> -> vector<8x128xf32>
    %52 = arith.addf %50, %51 : vector<8x128xf32>
    %cst_41 = arith.constant 0.333333343 : f32
    %53 = vector.broadcast %cst_41 : f32 to vector<8x128xf32>
    %54 = arith.mulf %52, %53 : vector<8x128xf32>
    %c0_42 = arith.constant 0 : index
    %c0_43 = arith.constant 0 : index
    %55 = vector.load %arg31[%c0_42, %c0_43] : memref<8x128xf32, #tpu.memory_space<vmem>>, vector<8x128xf32>
    tpu.vector_store %arg31[%c0_42, %c0_43], %54 {strides = array<i32>} : memref<8x128xf32, #tpu.memory_space<vmem>>, vector<8x128xf32>,
    %c0_44 = arith.constant 0 : index
    %c0_45 = arith.constant 0 : index
    %56 = vector.load %arg11[%c0_44, %c0_45] : memref<128x128xf32, #tpu.memory_space<vmem>>, vector<128x128xf32>
    %cst_46 = arith.constant dense<0.000000e+00> : vector<8x128xf32>
    %57 = tpu.matmul %5, %56, %cst_46 {dimension_numbers = #tpu.dot_dimension_numbers<[1], [0], [0], [1], [0, 0, 1, 1], [], []>} : vector<8x128xf32>, vector<128x128xf32>, vector<8x128xf32> -> vector<8x128xf32>
    %c0_47 = arith.constant 0 : index
    %c0_48 = arith.constant 0 : index
    %58 = vector.load %arg12[%c0_47, %c0_48] : memref<1x128xf32, #tpu.memory_space<vmem>>, vector<1x128xf32>
    %59 = vector.broadcast %58 : vector<1x128xf32> to vector<8x128xf32>
    %60 = arith.addf %57, %59 : vector<8x128xf32>
    %c0_49 = arith.constant 0 : index
    %c0_50 = arith.constant 0 : index
    %61 = vector.load %arg13[%c0_49, %c0_50] : memref<128x640xf32, #tpu.memory_space<vmem>>, vector<128x640xf32>
    %cst_51 = arith.constant dense<0.000000e+00> : vector<8x640xf32>
    %62 = tpu.matmul %60, %61, %cst_51 {dimension_numbers = #tpu.dot_dimension_numbers<[1], [0], [0], [1], [0, 0, 1, 1], [], []>} : vector<8x128xf32>, vector<128x640xf32>, vector<8x640xf32> -> vector<8x640xf32>
    %c0_52 = arith.constant 0 : index
    %c0_53 = arith.constant 0 : index
    %63 = vector.load %arg15[%c0_52, %c0_53] : memref<1x128xf32, #tpu.memory_space<vmem>>, vector<1x128xf32>
    %c0_54 = arith.constant 0 : index
    %c0_55 = arith.constant 0 : index
    %64 = vector.load %arg14[%c0_54, %c0_55] : memref<16x40xf32, #tpu.memory_space<vmem>>, vector<16x8xf32>
    %65 = vector.extract_strided_slice %62 {offsets = [0, 0], sizes = [8, 128], strides = [1, 1]} : vector<8x640xf32> to vector<8x128xf32>
    %cst_56 = arith.constant dense<0.000000e+00> : vector<16x128xf32>
    %66 = tpu.matmul %64, %65, %cst_56 {dimension_numbers = #tpu.dot_dimension_numbers<[1], [0], [0], [1], [0, 0, 1, 1], [], []>} : vector<16x8xf32>, vector<8x128xf32>, vector<16x128xf32> -> vector<16x128xf32>
    %67 = vector.broadcast %63 : vector<1x128xf32> to vector<16x128xf32>
    %68 = arith.addf %67, %66 : vector<16x128xf32>
    %c0_57 = arith.constant 0 : index
    %c8_58 = arith.constant 8 : index
    %69 = vector.load %arg14[%c0_57, %c8_58] : memref<16x40xf32, #tpu.memory_space<vmem>>, vector<16x8xf32>
    %70 = vector.extract_strided_slice %62 {offsets = [0, 128], sizes = [8, 128], strides = [1, 1]} : vector<8x640xf32> to vector<8x128xf32>
    %cst_59 = arith.constant dense<0.000000e+00> : vector<16x128xf32>
    %71 = tpu.matmul %69, %70, %cst_59 {dimension_numbers = #tpu.dot_dimension_numbers<[1], [0], [0], [1], [0, 0, 1, 1], [], []>} : vector<16x8xf32>, vector<8x128xf32>, vector<16x128xf32> -> vector<16x128xf32>
    %72 = arith.addf %68, %71 : vector<16x128xf32>
    %c0_60 = arith.constant 0 : index
    %c16_61 = arith.constant 16 : index
    %73 = vector.load %arg14[%c0_60, %c16_61] : memref<16x40xf32, #tpu.memory_space<vmem>>, vector<16x8xf32>
    %74 = vector.extract_strided_slice %62 {offsets = [0, 256], sizes = [8, 128], strides = [1, 1]} : vector<8x640xf32> to vector<8x128xf32>
    %cst_62 = arith.constant dense<0.000000e+00> : vector<16x128xf32>
    %75 = tpu.matmul %73, %74, %cst_62 {dimension_numbers = #tpu.dot_dimension_numbers<[1], [0], [0], [1], [0, 0, 1, 1], [], []>} : vector<16x8xf32>, vector<8x128xf32>, vector<16x128xf32> -> vector<16x128xf32>
    %76 = arith.addf %72, %75 : vector<16x128xf32>
    %c0_63 = arith.constant 0 : index
    %c24 = arith.constant 24 : index
    %77 = vector.load %arg14[%c0_63, %c24] : memref<16x40xf32, #tpu.memory_space<vmem>>, vector<16x8xf32>
    %78 = vector.extract_strided_slice %62 {offsets = [0, 384], sizes = [8, 128], strides = [1, 1]} : vector<8x640xf32> to vector<8x128xf32>
    %cst_64 = arith.constant dense<0.000000e+00> : vector<16x128xf32>
    %79 = tpu.matmul %77, %78, %cst_64 {dimension_numbers = #tpu.dot_dimension_numbers<[1], [0], [0], [1], [0, 0, 1, 1], [], []>} : vector<16x8xf32>, vector<8x128xf32>, vector<16x128xf32> -> vector<16x128xf32>
    %80 = arith.addf %76, %79 : vector<16x128xf32>
    %c0_65 = arith.constant 0 : index
    %c32 = arith.constant 32 : index
    %81 = vector.load %arg14[%c0_65, %c32] : memref<16x40xf32, #tpu.memory_space<vmem>>, vector<16x8xf32>
    %82 = vector.extract_strided_slice %62 {offsets = [0, 512], sizes = [8, 128], strides = [1, 1]} : vector<8x640xf32> to vector<8x128xf32>
    %cst_66 = arith.constant dense<0.000000e+00> : vector<16x128xf32>
    %83 = tpu.matmul %81, %82, %cst_66 {dimension_numbers = #tpu.dot_dimension_numbers<[1], [0], [0], [1], [0, 0, 1, 1], [], []>} : vector<16x8xf32>, vector<8x128xf32>, vector<16x128xf32> -> vector<16x128xf32>
    %84 = arith.addf %80, %83 : vector<16x128xf32>
    %cst_67 = arith.constant 0.000000e+00 : f32
    %85 = vector.broadcast %cst_67 : f32 to vector<16x128xf32>
    %86 = arith.maximumf %84, %85 : vector<16x128xf32>
    %c0_68 = arith.constant 0 : index
    %c0_69 = arith.constant 0 : index
    %87 = vector.load %arg16[%c0_68, %c0_69] : memref<128x640xf32, #tpu.memory_space<vmem>>, vector<128x640xf32>
    %cst_70 = arith.constant dense<0.000000e+00> : vector<16x640xf32>
    %88 = tpu.matmul %86, %87, %cst_70 {dimension_numbers = #tpu.dot_dimension_numbers<[1], [0], [0], [1], [0, 0, 1, 1], [], []>} : vector<16x128xf32>, vector<128x640xf32>, vector<16x640xf32> -> vector<16x640xf32>
    %c0_71 = arith.constant 0 : index
    %c0_72 = arith.constant 0 : index
    %89 = vector.load %arg18[%c0_71, %c0_72] : memref<1x128xf32, #tpu.memory_space<vmem>>, vector<1x128xf32>
    %c0_73 = arith.constant 0 : index
    %c0_74 = arith.constant 0 : index
    %90 = vector.load %arg17[%c0_73, %c0_74] : memref<32x80xf32, #tpu.memory_space<vmem>>, vector<32x16xf32>
    %91 = vector.extract_strided_slice %88 {offsets = [0, 0], sizes = [16, 128], strides = [1, 1]} : vector<16x640xf32> to vector<16x128xf32>
    %cst_75 = arith.constant dense<0.000000e+00> : vector<32x128xf32>
    %92 = tpu.matmul %90, %91, %cst_75 {dimension_numbers = #tpu.dot_dimension_numbers<[1], [0], [0], [1], [0, 0, 1, 1], [], []>} : vector<32x16xf32>, vector<16x128xf32>, vector<32x128xf32> -> vector<32x128xf32>
    %93 = vector.broadcast %89 : vector<1x128xf32> to vector<32x128xf32>
    %94 = arith.addf %93, %92 : vector<32x128xf32>
    %c0_76 = arith.constant 0 : index
    %c16_77 = arith.constant 16 : index
    %95 = vector.load %arg17[%c0_76, %c16_77] : memref<32x80xf32, #tpu.memory_space<vmem>>, vector<32x16xf32>
    %96 = vector.extract_strided_slice %88 {offsets = [0, 128], sizes = [16, 128], strides = [1, 1]} : vector<16x640xf32> to vector<16x128xf32>
    %cst_78 = arith.constant dense<0.000000e+00> : vector<32x128xf32>
    %97 = tpu.matmul %95, %96, %cst_78 {dimension_numbers = #tpu.dot_dimension_numbers<[1], [0], [0], [1], [0, 0, 1, 1], [], []>} : vector<32x16xf32>, vector<16x128xf32>, vector<32x128xf32> -> vector<32x128xf32>
    %98 = arith.addf %94, %97 : vector<32x128xf32>
    %c0_79 = arith.constant 0 : index
    %c32_80 = arith.constant 32 : index
    %99 = vector.load %arg17[%c0_79, %c32_80] : memref<32x80xf32, #tpu.memory_space<vmem>>, vector<32x16xf32>
    %100 = vector.extract_strided_slice %88 {offsets = [0, 256], sizes = [16, 128], strides = [1, 1]} : vector<16x640xf32> to vector<16x128xf32>
    %cst_81 = arith.constant dense<0.000000e+00> : vector<32x128xf32>
    %101 = tpu.matmul %99, %100, %cst_81 {dimension_numbers = #tpu.dot_dimension_numbers<[1], [0], [0], [1], [0, 0, 1, 1], [], []>} : vector<32x16xf32>, vector<16x128xf32>, vector<32x128xf32> -> vector<32x128xf32>
    %102 = arith.addf %98, %101 : vector<32x128xf32>
    %c0_82 = arith.constant 0 : index
    %c48 = arith.constant 48 : index
    %103 = vector.load %arg17[%c0_82, %c48] : memref<32x80xf32, #tpu.memory_space<vmem>>, vector<32x16xf32>
    %104 = vector.extract_strided_slice %88 {offsets = [0, 384], sizes = [16, 128], strides = [1, 1]} : vector<16x640xf32> to vector<16x128xf32>
    %cst_83 = arith.constant dense<0.000000e+00> : vector<32x128xf32>
    %105 = tpu.matmul %103, %104, %cst_83 {dimension_numbers = #tpu.dot_dimension_numbers<[1], [0], [0], [1], [0, 0, 1, 1], [], []>} : vector<32x16xf32>, vector<16x128xf32>, vector<32x128xf32> -> vector<32x128xf32>
    %106 = arith.addf %102, %105 : vector<32x128xf32>
    %c0_84 = arith.constant 0 : index
    %c64 = arith.constant 64 : index
    %107 = vector.load %arg17[%c0_84, %c64] : memref<32x80xf32, #tpu.memory_space<vmem>>, vector<32x16xf32>
    %108 = vector.extract_strided_slice %88 {offsets = [0, 512], sizes = [16, 128], strides = [1, 1]} : vector<16x640xf32> to vector<16x128xf32>
    %cst_85 = arith.constant dense<0.000000e+00> : vector<32x128xf32>
    %109 = tpu.matmul %107, %108, %cst_85 {dimension_numbers = #tpu.dot_dimension_numbers<[1], [0], [0], [1], [0, 0, 1, 1], [], []>} : vector<32x16xf32>, vector<16x128xf32>, vector<32x128xf32> -> vector<32x128xf32>
    %110 = arith.addf %106, %109 : vector<32x128xf32>
    %cst_86 = arith.constant 0.000000e+00 : f32
    %111 = vector.broadcast %cst_86 : f32 to vector<32x128xf32>
    %112 = arith.maximumf %110, %111 : vector<32x128xf32>
    %c0_87 = arith.constant 0 : index
    %c0_88 = arith.constant 0 : index
    %113 = vector.load %arg19[%c0_87, %c0_88] : memref<128x640xf32, #tpu.memory_space<vmem>>, vector<128x640xf32>
    %cst_89 = arith.constant dense<0.000000e+00> : vector<32x640xf32>
    %114 = tpu.matmul %112, %113, %cst_89 {dimension_numbers = #tpu.dot_dimension_numbers<[1], [0], [0], [1], [0, 0, 1, 1], [], []>} : vector<32x128xf32>, vector<128x640xf32>, vector<32x640xf32> -> vector<32x640xf32>
    %c0_90 = arith.constant 0 : index
    %c0_91 = arith.constant 0 : index
    %115 = vector.load %arg21[%c0_90, %c0_91] : memref<1x128xf32, #tpu.memory_space<vmem>>, vector<1x128xf32>
    %c0_92 = arith.constant 0 : index
    %c0_93 = arith.constant 0 : index
    %116 = vector.load %arg20[%c0_92, %c0_93] : memref<64x160xf32, #tpu.memory_space<vmem>>, vector<64x32xf32>
    %117 = vector.extract_strided_slice %114 {offsets = [0, 0], sizes = [32, 128], strides = [1, 1]} : vector<32x640xf32> to vector<32x128xf32>
    %cst_94 = arith.constant dense<0.000000e+00> : vector<64x128xf32>
    %118 = tpu.matmul %116, %117, %cst_94 {dimension_numbers = #tpu.dot_dimension_numbers<[1], [0], [0], [1], [0, 0, 1, 1], [], []>} : vector<64x32xf32>, vector<32x128xf32>, vector<64x128xf32> -> vector<64x128xf32>
    %119 = vector.broadcast %115 : vector<1x128xf32> to vector<64x128xf32>
    %120 = arith.addf %119, %118 : vector<64x128xf32>
    %c0_95 = arith.constant 0 : index
    %c32_96 = arith.constant 32 : index
    %121 = vector.load %arg20[%c0_95, %c32_96] : memref<64x160xf32, #tpu.memory_space<vmem>>, vector<64x32xf32>
    %122 = vector.extract_strided_slice %114 {offsets = [0, 128], sizes = [32, 128], strides = [1, 1]} : vector<32x640xf32> to vector<32x128xf32>
    %cst_97 = arith.constant dense<0.000000e+00> : vector<64x128xf32>
    %123 = tpu.matmul %121, %122, %cst_97 {dimension_numbers = #tpu.dot_dimension_numbers<[1], [0], [0], [1], [0, 0, 1, 1], [], []>} : vector<64x32xf32>, vector<32x128xf32>, vector<64x128xf32> -> vector<64x128xf32>
    %124 = arith.addf %120, %123 : vector<64x128xf32>
    %c0_98 = arith.constant 0 : index
    %c64_99 = arith.constant 64 : index
    %125 = vector.load %arg20[%c0_98, %c64_99] : memref<64x160xf32, #tpu.memory_space<vmem>>, vector<64x32xf32>
    %126 = vector.extract_strided_slice %114 {offsets = [0, 256], sizes = [32, 128], strides = [1, 1]} : vector<32x640xf32> to vector<32x128xf32>
    %cst_100 = arith.constant dense<0.000000e+00> : vector<64x128xf32>
    %127 = tpu.matmul %125, %126, %cst_100 {dimension_numbers = #tpu.dot_dimension_numbers<[1], [0], [0], [1], [0, 0, 1, 1], [], []>} : vector<64x32xf32>, vector<32x128xf32>, vector<64x128xf32> -> vector<64x128xf32>
    %128 = arith.addf %124, %127 : vector<64x128xf32>
    %c0_101 = arith.constant 0 : index
    %c96 = arith.constant 96 : index
    %129 = vector.load %arg20[%c0_101, %c96] : memref<64x160xf32, #tpu.memory_space<vmem>>, vector<64x32xf32>
    %130 = vector.extract_strided_slice %114 {offsets = [0, 384], sizes = [32, 128], strides = [1, 1]} : vector<32x640xf32> to vector<32x128xf32>
    %cst_102 = arith.constant dense<0.000000e+00> : vector<64x128xf32>
    %131 = tpu.matmul %129, %130, %cst_102 {dimension_numbers = #tpu.dot_dimension_numbers<[1], [0], [0], [1], [0, 0, 1, 1], [], []>} : vector<64x32xf32>, vector<32x128xf32>, vector<64x128xf32> -> vector<64x128xf32>
    %132 = arith.addf %128, %131 : vector<64x128xf32>
    %c0_103 = arith.constant 0 : index
    %c128 = arith.constant 128 : index
    %133 = vector.load %arg20[%c0_103, %c128] : memref<64x160xf32, #tpu.memory_space<vmem>>, vector<64x32xf32>
    %134 = vector.extract_strided_slice %114 {offsets = [0, 512], sizes = [32, 128], strides = [1, 1]} : vector<32x640xf32> to vector<32x128xf32>
    %cst_104 = arith.constant dense<0.000000e+00> : vector<64x128xf32>
    %135 = tpu.matmul %133, %134, %cst_104 {dimension_numbers = #tpu.dot_dimension_numbers<[1], [0], [0], [1], [0, 0, 1, 1], [], []>} : vector<64x32xf32>, vector<32x128xf32>, vector<64x128xf32> -> vector<64x128xf32>
    %136 = arith.addf %132, %135 : vector<64x128xf32>
    %cst_105 = arith.constant 0.000000e+00 : f32
    %137 = vector.broadcast %cst_105 : f32 to vector<64x128xf32>
    %138 = arith.maximumf %136, %137 : vector<64x128xf32>
    %c0_106 = arith.constant 0 : index
    %c0_107 = arith.constant 0 : index
    %139 = vector.load %arg22[%c0_106, %c0_107] : memref<128x640xf32, #tpu.memory_space<vmem>>, vector<128x640xf32>
    %cst_108 = arith.constant dense<0.000000e+00> : vector<64x640xf32>
    %140 = tpu.matmul %138, %139, %cst_108 {dimension_numbers = #tpu.dot_dimension_numbers<[1], [0], [0], [1], [0, 0, 1, 1], [], []>} : vector<64x128xf32>, vector<128x640xf32>, vector<64x640xf32> -> vector<64x640xf32>
    %c0_109 = arith.constant 0 : index
    %c0_110 = arith.constant 0 : index
    %141 = vector.load %arg24[%c0_109, %c0_110] : memref<1x128xf32, #tpu.memory_space<vmem>>, vector<1x128xf32>
    %c0_111 = arith.constant 0 : index
    %c0_112 = arith.constant 0 : index
    %142 = vector.load %arg23[%c0_111, %c0_112] : memref<128x320xf32, #tpu.memory_space<vmem>>, vector<128x64xf32>
    %143 = vector.extract_strided_slice %140 {offsets = [0, 0], sizes = [64, 128], strides = [1, 1]} : vector<64x640xf32> to vector<64x128xf32>
    %cst_113 = arith.constant dense<0.000000e+00> : vector<128x128xf32>
    %144 = tpu.matmul %142, %143, %cst_113 {dimension_numbers = #tpu.dot_dimension_numbers<[1], [0], [0], [1], [0, 0, 1, 1], [], []>} : vector<128x64xf32>, vector<64x128xf32>, vector<128x128xf32> -> vector<128x128xf32>
    %145 = vector.broadcast %141 : vector<1x128xf32> to vector<128x128xf32>
    %146 = arith.addf %145, %144 : vector<128x128xf32>
    %c0_114 = arith.constant 0 : index
    %c64_115 = arith.constant 64 : index
    %147 = vector.load %arg23[%c0_114, %c64_115] : memref<128x320xf32, #tpu.memory_space<vmem>>, vector<128x64xf32>
    %148 = vector.extract_strided_slice %140 {offsets = [0, 128], sizes = [64, 128], strides = [1, 1]} : vector<64x640xf32> to vector<64x128xf32>
    %cst_116 = arith.constant dense<0.000000e+00> : vector<128x128xf32>
    %149 = tpu.matmul %147, %148, %cst_116 {dimension_numbers = #tpu.dot_dimension_numbers<[1], [0], [0], [1], [0, 0, 1, 1], [], []>} : vector<128x64xf32>, vector<64x128xf32>, vector<128x128xf32> -> vector<128x128xf32>
    %150 = arith.addf %146, %149 : vector<128x128xf32>
    %c0_117 = arith.constant 0 : index
    %c128_118 = arith.constant 128 : index
    %151 = vector.load %arg23[%c0_117, %c128_118] : memref<128x320xf32, #tpu.memory_space<vmem>>, vector<128x64xf32>
    %152 = vector.extract_strided_slice %140 {offsets = [0, 256], sizes = [64, 128], strides = [1, 1]} : vector<64x640xf32> to vector<64x128xf32>
    %cst_119 = arith.constant dense<0.000000e+00> : vector<128x128xf32>
    %153 = tpu.matmul %151, %152, %cst_119 {dimension_numbers = #tpu.dot_dimension_numbers<[1], [0], [0], [1], [0, 0, 1, 1], [], []>} : vector<128x64xf32>, vector<64x128xf32>, vector<128x128xf32> -> vector<128x128xf32>
    %154 = arith.addf %150, %153 : vector<128x128xf32>
    %c0_120 = arith.constant 0 : index
    %c192 = arith.constant 192 : index
    %155 = vector.load %arg23[%c0_120, %c192] : memref<128x320xf32, #tpu.memory_space<vmem>>, vector<128x64xf32>
    %156 = vector.extract_strided_slice %140 {offsets = [0, 384], sizes = [64, 128], strides = [1, 1]} : vector<64x640xf32> to vector<64x128xf32>
    %cst_121 = arith.constant dense<0.000000e+00> : vector<128x128xf32>
    %157 = tpu.matmul %155, %156, %cst_121 {dimension_numbers = #tpu.dot_dimension_numbers<[1], [0], [0], [1], [0, 0, 1, 1], [], []>} : vector<128x64xf32>, vector<64x128xf32>, vector<128x128xf32> -> vector<128x128xf32>
    %158 = arith.addf %154, %157 : vector<128x128xf32>
    %c0_122 = arith.constant 0 : index
    %c256 = arith.constant 256 : index
    %159 = vector.load %arg23[%c0_122, %c256] : memref<128x320xf32, #tpu.memory_space<vmem>>, vector<128x64xf32>
    %160 = vector.extract_strided_slice %140 {offsets = [0, 512], sizes = [64, 128], strides = [1, 1]} : vector<64x640xf32> to vector<64x128xf32>
    %cst_123 = arith.constant dense<0.000000e+00> : vector<128x128xf32>
    %161 = tpu.matmul %159, %160, %cst_123 {dimension_numbers = #tpu.dot_dimension_numbers<[1], [0], [0], [1], [0, 0, 1, 1], [], []>} : vector<128x64xf32>, vector<64x128xf32>, vector<128x128xf32> -> vector<128x128xf32>
    %162 = arith.addf %158, %161 : vector<128x128xf32>
    %cst_124 = arith.constant 0.000000e+00 : f32
    %163 = vector.broadcast %cst_124 : f32 to vector<128x128xf32>
    %164 = arith.maximumf %162, %163 : vector<128x128xf32>
    %c0_125 = arith.constant 0 : index
    %c0_126 = arith.constant 0 : index
    %165 = vector.load %arg25[%c0_125, %c0_126] : memref<128x640xf32, #tpu.memory_space<vmem>>, vector<128x640xf32>
    %cst_127 = arith.constant dense<0.000000e+00> : vector<128x640xf32>
    %166 = tpu.matmul %164, %165, %cst_127 {dimension_numbers = #tpu.dot_dimension_numbers<[1], [0], [0], [1], [0, 0, 1, 1], [], []>} : vector<128x128xf32>, vector<128x640xf32>, vector<128x640xf32> -> vector<128x640xf32>
    %c0_128 = arith.constant 0 : index
    %c0_129 = arith.constant 0 : index
    %167 = vector.load %arg27[%c0_128, %c0_129] : memref<1x128xf32, #tpu.memory_space<vmem>>, vector<1x128xf32>
    %c0_130 = arith.constant 0 : index
    %c0_131 = arith.constant 0 : index
    %168 = vector.load %arg26[%c0_130, %c0_131] : memref<256x640xf32, #tpu.memory_space<vmem>>, vector<256x128xf32>
    %169 = vector.extract_strided_slice %166 {offsets = [0, 0], sizes = [128, 128], strides = [1, 1]} : vector<128x640xf32> to vector<128x128xf32>
    %cst_132 = arith.constant dense<0.000000e+00> : vector<256x128xf32>
    %170 = tpu.matmul %168, %169, %cst_132 {dimension_numbers = #tpu.dot_dimension_numbers<[1], [0], [0], [1], [0, 0, 1, 1], [], []>} : vector<256x128xf32>, vector<128x128xf32>, vector<256x128xf32> -> vector<256x128xf32>
    %171 = vector.broadcast %167 : vector<1x128xf32> to vector<256x128xf32>
    %172 = arith.addf %171, %170 : vector<256x128xf32>
    %c0_133 = arith.constant 0 : index
    %c128_134 = arith.constant 128 : index
    %173 = vector.load %arg26[%c0_133, %c128_134] : memref<256x640xf32, #tpu.memory_space<vmem>>, vector<256x128xf32>
    %174 = vector.extract_strided_slice %166 {offsets = [0, 128], sizes = [128, 128], strides = [1, 1]} : vector<128x640xf32> to vector<128x128xf32>
    %cst_135 = arith.constant dense<0.000000e+00> : vector<256x128xf32>
    %175 = tpu.matmul %173, %174, %cst_135 {dimension_numbers = #tpu.dot_dimension_numbers<[1], [0], [0], [1], [0, 0, 1, 1], [], []>} : vector<256x128xf32>, vector<128x128xf32>, vector<256x128xf32> -> vector<256x128xf32>
    %176 = arith.addf %172, %175 : vector<256x128xf32>
    %c0_136 = arith.constant 0 : index
    %c256_137 = arith.constant 256 : index
    %177 = vector.load %arg26[%c0_136, %c256_137] : memref<256x640xf32, #tpu.memory_space<vmem>>, vector<256x128xf32>
    %178 = vector.extract_strided_slice %166 {offsets = [0, 256], sizes = [128, 128], strides = [1, 1]} : vector<128x640xf32> to vector<128x128xf32>
    %cst_138 = arith.constant dense<0.000000e+00> : vector<256x128xf32>
    %179 = tpu.matmul %177, %178, %cst_138 {dimension_numbers = #tpu.dot_dimension_numbers<[1], [0], [0], [1], [0, 0, 1, 1], [], []>} : vector<256x128xf32>, vector<128x128xf32>, vector<256x128xf32> -> vector<256x128xf32>
    %180 = arith.addf %176, %179 : vector<256x128xf32>
    %c0_139 = arith.constant 0 : index
    %c384 = arith.constant 384 : index
    %181 = vector.load %arg26[%c0_139, %c384] : memref<256x640xf32, #tpu.memory_space<vmem>>, vector<256x128xf32>
    %182 = vector.extract_strided_slice %166 {offsets = [0, 384], sizes = [128, 128], strides = [1, 1]} : vector<128x640xf32> to vector<128x128xf32>
    %cst_140 = arith.constant dense<0.000000e+00> : vector<256x128xf32>
    %183 = tpu.matmul %181, %182, %cst_140 {dimension_numbers = #tpu.dot_dimension_numbers<[1], [0], [0], [1], [0, 0, 1, 1], [], []>} : vector<256x128xf32>, vector<128x128xf32>, vector<256x128xf32> -> vector<256x128xf32>
    %184 = arith.addf %180, %183 : vector<256x128xf32>
    %c0_141 = arith.constant 0 : index
    %c512 = arith.constant 512 : index
    %185 = vector.load %arg26[%c0_141, %c512] : memref<256x640xf32, #tpu.memory_space<vmem>>, vector<256x128xf32>
    %186 = vector.extract_strided_slice %166 {offsets = [0, 512], sizes = [128, 128], strides = [1, 1]} : vector<128x640xf32> to vector<128x128xf32>
    %cst_142 = arith.constant dense<0.000000e+00> : vector<256x128xf32>
    %187 = tpu.matmul %185, %186, %cst_142 {dimension_numbers = #tpu.dot_dimension_numbers<[1], [0], [0], [1], [0, 0, 1, 1], [], []>} : vector<256x128xf32>, vector<128x128xf32>, vector<256x128xf32> -> vector<256x128xf32>
    %188 = arith.addf %184, %187 : vector<256x128xf32>
    %cst_143 = arith.constant 0.000000e+00 : f32
    %189 = vector.broadcast %cst_143 : f32 to vector<256x128xf32>
    %190 = arith.maximumf %188, %189 : vector<256x128xf32>
    %c0_144 = arith.constant 0 : index
    %c0_145 = arith.constant 0 : index
    %191 = vector.load %arg28[%c0_144, %c0_145] : memref<128x192xf32, #tpu.memory_space<vmem>>, vector<128x192xf32>
    %cst_146 = arith.constant dense<0.000000e+00> : vector<256x192xf32>
    %192 = tpu.matmul %190, %191, %cst_146 {dimension_numbers = #tpu.dot_dimension_numbers<[1], [0], [0], [1], [0, 0, 1, 1], [], []>} : vector<256x128xf32>, vector<128x192xf32>, vector<256x192xf32> -> vector<256x192xf32>
    %c0_147 = arith.constant 0 : index
    %c0_148 = arith.constant 0 : index
    %193 = vector.load %arg29[%c0_147, %c0_148] : memref<1x192xf32, #tpu.memory_space<vmem>>, vector<1x192xf32>
    %194 = vector.broadcast %193 : vector<1x192xf32> to vector<256x192xf32>
    %195 = arith.addf %192, %194 : vector<256x192xf32>
    %c0_149 = arith.constant 0 : index
    %c0_150 = arith.constant 0 : index
    %196 = vector.load %arg30[%c0_149, %c0_150] : memref<256x192xf32, #tpu.memory_space<vmem>>, vector<256x192xf32>
    tpu.vector_store %arg30[%c0_149, %c0_150], %195 {strides = array<i32>} : memref<256x192xf32, #tpu.memory_space<vmem>>, vector<256x192xf32>,
    return
  }
  func.func @transform_0(%arg0: i32) -> (i32, i32) {
    %c0_i32 = arith.constant 0 : i32
    %c0_i32_0 = arith.constant 0 : i32
    %c0_i32_1 = arith.constant 0 : i32
    return %c0_i32, %c0_i32_0 : i32, i32
  }
  func.func @transform_1(%arg0: i32) -> (i32, i32) {
    %c0_i32 = arith.constant 0 : i32
    %c0_i32_0 = arith.constant 0 : i32
    %c0_i32_1 = arith.constant 0 : i32
    return %c0_i32, %c0_i32_0 : i32, i32
  }
  func.func @transform_2(%arg0: i32) -> (i32, i32) {
    %c0_i32 = arith.constant 0 : i32
    %c0_i32_0 = arith.constant 0 : i32
    %c0_i32_1 = arith.constant 0 : i32
    return %c0_i32, %c0_i32_0 : i32, i32
  }
  func.func @transform_3(%arg0: i32) -> (i32, i32) {
    %c0_i32 = arith.constant 0 : i32
    %c0_i32_0 = arith.constant 0 : i32
    %c0_i32_1 = arith.constant 0 : i32
    return %c0_i32, %c0_i32_0 : i32, i32
  }
  func.func @transform_4(%arg0: i32) -> (i32, i32) {
    %c0_i32 = arith.constant 0 : i32
    %c0_i32_0 = arith.constant 0 : i32
    %c0_i32_1 = arith.constant 0 : i32
    return %c0_i32, %c0_i32_0 : i32, i32
  }
  func.func @transform_5(%arg0: i32) -> (i32, i32) {
    %c0_i32 = arith.constant 0 : i32
    %c0_i32_0 = arith.constant 0 : i32
    %c0_i32_1 = arith.constant 0 : i32
    return %c0_i32, %c0_i32_0 : i32, i32
  }
  func.func @transform_6(%arg0: i32) -> (i32, i32) {
    %c0_i32 = arith.constant 0 : i32
    %c0_i32_0 = arith.constant 0 : i32
    %c0_i32_1 = arith.constant 0 : i32
    return %c0_i32, %c0_i32_0 : i32, i32
  }
  func.func @transform_7(%arg0: i32) -> (i32, i32) {
    %c0_i32 = arith.constant 0 : i32
    %c0_i32_0 = arith.constant 0 : i32
    %c0_i32_1 = arith.constant 0 : i32
    return %c0_i32, %c0_i32_0 : i32, i32
  }
  func.func @transform_8(%arg0: i32) -> (i32, i32) {
    %c0_i32 = arith.constant 0 : i32
    %c0_i32_0 = arith.constant 0 : i32
    %c0_i32_1 = arith.constant 0 : i32
    return %c0_i32, %c0_i32_0 : i32, i32
  }
  func.func @transform_9(%arg0: i32) -> (i32, i32) {
    %c0_i32 = arith.constant 0 : i32
    %c0_i32_0 = arith.constant 0 : i32
    %c0_i32_1 = arith.constant 0 : i32
    return %c0_i32, %c0_i32_0 : i32, i32
  }
  func.func @transform_10(%arg0: i32) -> (i32, i32) {
    %c0_i32 = arith.constant 0 : i32
    %c0_i32_0 = arith.constant 0 : i32
    %c0_i32_1 = arith.constant 0 : i32
    return %c0_i32, %c0_i32_0 : i32, i32
  }
  func.func @transform_11(%arg0: i32) -> (i32, i32) {
    %c0_i32 = arith.constant 0 : i32
    %c0_i32_0 = arith.constant 0 : i32
    %c0_i32_1 = arith.constant 0 : i32
    return %c0_i32, %c0_i32_0 : i32, i32
  }
  func.func @transform_12(%arg0: i32) -> (i32, i32) {
    %c0_i32 = arith.constant 0 : i32
    %c0_i32_0 = arith.constant 0 : i32
    %c0_i32_1 = arith.constant 0 : i32
    return %c0_i32, %c0_i32_0 : i32, i32
  }
  func.func @transform_13(%arg0: i32) -> (i32, i32) {
    %c0_i32 = arith.constant 0 : i32
    %c0_i32_0 = arith.constant 0 : i32
    %c0_i32_1 = arith.constant 0 : i32
    return %c0_i32, %c0_i32_0 : i32, i32
  }
  func.func @transform_14(%arg0: i32) -> (i32, i32) {
    %c0_i32 = arith.constant 0 : i32
    %c0_i32_0 = arith.constant 0 : i32
    %c0_i32_1 = arith.constant 0 : i32
    return %c0_i32, %c0_i32_0 : i32, i32
  }
  func.func @transform_15(%arg0: i32) -> (i32, i32) {
    %c0_i32 = arith.constant 0 : i32
    %c0_i32_0 = arith.constant 0 : i32
    %c0_i32_1 = arith.constant 0 : i32
    return %c0_i32, %c0_i32_0 : i32, i32
  }
  func.func @transform_16(%arg0: i32) -> (i32, i32) {
    %c0_i32 = arith.constant 0 : i32
    %c0_i32_0 = arith.constant 0 : i32
    %c0_i32_1 = arith.constant 0 : i32
    return %c0_i32, %c0_i32_0 : i32, i32
  }
  func.func @transform_17(%arg0: i32) -> (i32, i32) {
    %c0_i32 = arith.constant 0 : i32
    %c0_i32_0 = arith.constant 0 : i32
    %c0_i32_1 = arith.constant 0 : i32
    return %c0_i32, %c0_i32_0 : i32, i32
  }
  func.func @transform_18(%arg0: i32) -> (i32, i32) {
    %c0_i32 = arith.constant 0 : i32
    %c0_i32_0 = arith.constant 0 : i32
    %c0_i32_1 = arith.constant 0 : i32
    return %c0_i32, %c0_i32_0 : i32, i32
  }
  func.func @transform_19(%arg0: i32) -> (i32, i32) {
    %c0_i32 = arith.constant 0 : i32
    %c0_i32_0 = arith.constant 0 : i32
    %c0_i32_1 = arith.constant 0 : i32
    return %c0_i32, %c0_i32_0 : i32, i32
  }
  func.func @transform_20(%arg0: i32) -> (i32, i32) {
    %c0_i32 = arith.constant 0 : i32
    %c0_i32_0 = arith.constant 0 : i32
    %c0_i32_1 = arith.constant 0 : i32
    return %c0_i32, %c0_i32_0 : i32, i32
  }
  func.func @transform_21(%arg0: i32) -> (i32, i32) {
    %c0_i32 = arith.constant 0 : i32
    %c0_i32_0 = arith.constant 0 : i32
    %c0_i32_1 = arith.constant 0 : i32
    return %c0_i32, %c0_i32_0 : i32, i32
  }
  func.func @transform_22(%arg0: i32) -> (i32, i32) {
    %c0_i32 = arith.constant 0 : i32
    %c0_i32_0 = arith.constant 0 : i32
    %c0_i32_1 = arith.constant 0 : i32
    return %c0_i32, %c0_i32_0 : i32, i32
  }
  func.func @transform_23(%arg0: i32) -> (i32, i32) {
    %c0_i32 = arith.constant 0 : i32
    %c0_i32_0 = arith.constant 0 : i32
    %c0_i32_1 = arith.constant 0 : i32
    return %c0_i32, %c0_i32_0 : i32, i32
  }
  func.func @transform_24(%arg0: i32) -> (i32, i32) {
    %c0_i32 = arith.constant 0 : i32
    %c0_i32_0 = arith.constant 0 : i32
    %c0_i32_1 = arith.constant 0 : i32
    return %c0_i32, %c0_i32_0 : i32, i32
  }
  func.func @transform_25(%arg0: i32) -> (i32, i32) {
    %c0_i32 = arith.constant 0 : i32
    %c0_i32_0 = arith.constant 0 : i32
    %c0_i32_1 = arith.constant 0 : i32
    return %c0_i32, %c0_i32_0 : i32, i32
  }
  func.func @transform_26(%arg0: i32) -> (i32, i32) {
    %c0_i32 = arith.constant 0 : i32
    %c0_i32_0 = arith.constant 0 : i32
    %c0_i32_1 = arith.constant 0 : i32
    return %c0_i32, %c0_i32_0 : i32, i32
  }
  func.func @transform_27(%arg0: i32) -> (i32, i32) {
    %c0_i32 = arith.constant 0 : i32
    %c0_i32_0 = arith.constant 0 : i32
    %c0_i32_1 = arith.constant 0 : i32
    return %c0_i32, %c0_i32_0 : i32, i32
  }
  func.func @transform_28(%arg0: i32) -> (i32, i32) {
    %c0_i32 = arith.constant 0 : i32
    %c0_i32_0 = arith.constant 0 : i32
    %c0_i32_1 = arith.constant 0 : i32
    return %c0_i32, %c0_i32_0 : i32, i32
  }
  func.func @transform_29(%arg0: i32) -> (i32, i32) {
    %c0_i32 = arith.constant 0 : i32
    %c0_i32_0 = arith.constant 0 : i32
    %c0_i32_1 = arith.constant 0 : i32
    return %c0_i32, %c0_i32_0 : i32, i32
  }
  func.func @transform_30(%arg0: i32) -> (i32, i32) {
    %c0_i32 = arith.constant 0 : i32
    %c0_i32_0 = arith.constant 0 : i32
    %c0_i32_1 = arith.constant 0 : i32
    return %c0_i32, %c0_i32_0 : i32, i32
  }
}

</mosaic_0001>

<bundles_post_ra>
// kernel: model_forward.1
= control target key start
LH: loop header
LB: loop body
LE: loop exit
PB: predicated region body
PF: predicated region fallthrough
CT: control target
= control target key end

     0   :  { %s11451_s6 = smov 1   ;;  %s11452_s10 = smov 2   ;;  %s13554_s0 = inlined_call_operand.smem [shape: u32[31], index: -1, kind: input, shape index: {}] }
   0x1   :  { %s11516_s5 = sld [smem:[%s13554_s0]]   ;;  %s11453_s14 = smov 3  }
   0x2   :  { %s11521_s9 = sld [smem:[%s13554_s0 + %s11451_s6]]   ;;  %s11454_s18 = smov 4  }
   0x3   :  { %s11526_s13 = sld [smem:[%s13554_s0 + %s11452_s10]]   ;;  %s11455_s22 = smov 5  }
   0x4   :  { %s11531_s17 = sld [smem:[%s13554_s0 + %s11453_s14]]   ;;  %s11456_s26 = smov 6  }
   0x5   :  { %s11536_s21 = sld [smem:[%s13554_s0 + %s11454_s18]]   ;;  %s11457_s30 = smov 7  }
   0x6   :  { %s11541_s25 = sld [smem:[%s13554_s0 + %s11455_s22]]   ;;  %s11458_s4 = smov 8  }
   0x7   :  { %s11546_s29 = sld [smem:[%s13554_s0 + %s11456_s26]]   ;;  %s11459_s10 = smov 9  }
   0x8   :  { %s11551_s3 = sld [smem:[%s13554_s0 + %s11457_s30]]   ;;  %s11460_s15 = smov 10  }
   0x9   :  { %s11556_s8 = sld [smem:[%s13554_s0 + %s11458_s4]]   ;;  %s11461_s20 = smov 11  }
   0xa   :  { %13565 = sst [smem:[#allocation28_spill]] %s11531_s17  ;;  %s11462_s26 = smov 12  }
   0xb   :  { %s11561_s14 = sld [smem:[%s13554_s0 + %s11459_s10]]   ;;  %s11463_s1 = smov 13  }
   0xc   :  { %13566 = sst [smem:[#allocation29_spill]] %s11541_s25  ;;  %s11464_s7 = smov 14  }
   0xd   :  { %s11566_s19 = sld [smem:[%s13554_s0 + %s11460_s15]]   ;;  %s11465_s15 = smov 15  }
   0xe   :  { %13567 = sst [smem:[#allocation30_spill]] %s11551_s3  ;;  %s11466_s22 = smov 16  }
   0xf   :  { %13568 = sst [smem:[#allocation31_spill]] %s11556_s8  ;;  %s11467_s28 = smov 17  }
  0x10   :  { %s11571_s24 = sld [smem:[%s13554_s0 + %s11461_s20]]  }
  0x11   :  { %13569 = sst [smem:[#allocation32_spill]] %s11561_s14 }
  0x12   :  { %s11576_s30 = sld [smem:[%s13554_s0 + %s11462_s26]]  }
  0x13   :  { %13570 = sst [smem:[#allocation33_spill]] %s11566_s19 }
  0x14   :  { %s11581_s6 = sld [smem:[%s13554_s0 + %s11463_s1]]  }
  0x15   :  { %s11586_s12 = sld [smem:[%s13554_s0 + %s11464_s7]]   ;;  %s11468_s7 = smov 18  }
  0x16   :  { %s11591_s20 = sld [smem:[%s13554_s0 + %s11465_s15]]   ;;  %s11469_s15 = smov 19  }
  0x17   :  { %s11596_s27 = sld [smem:[%s13554_s0 + %s11466_s22]]   ;;  %s11470_s22 = smov 20  }
  0x18   :  { %13571 = sst [smem:[#allocation34_spill]] %s11576_s30 }
  0x19   :  { %s11601_s4 = sld [smem:[%s13554_s0 + %s11467_s28]]   ;;  %s11471_s28 = smov 21  }
  0x1a   :  { %s11606_s30 = sld [smem:[%s13554_s0 + %s11468_s7]]   ;;  %s11472_s7 = smov 22  }
  0x1b   :  { %s11616_s8 = sld [smem:[%s13554_s0 + %s11470_s22]]   ;;  %s11474_s22 = smov 24  }
  0x1c   :  { %13572 = sst [smem:[#allocation35_spill]] %s11591_s20 }
  0x1d   :  { %s11611_s20 = sld [smem:[%s13554_s0 + %s11469_s15]]   ;;  %s11473_s15 = smov 23  }
  0x1e   :  { %s11621_s19 = sld [smem:[%s13554_s0 + %s11471_s28]]   ;;  %s11475_s28 = smov 25  }
  0x1f   :  { %s11631_s14 = sld [smem:[%s13554_s0 + %s11473_s15]]   ;;  %s11477_s15 = smov 27  }
  0x20   :  { %13573 = sst [smem:[#allocation36_spill]] %s11606_s30 }
  0x21   :  { %s11626_s30 = sld [smem:[%s13554_s0 + %s11472_s7]]   ;;  %s11476_s7 = smov 26  }
  0x22   :  { %s11636_s17 = sld [smem:[%s13554_s0 + %s11474_s22]]   ;;  %s11478_s22 = smov 28  }
  0x23   :  { %s11651_s3 = sld [smem:[%s13554_s0 + %s11477_s15]]  }
  0x24   :  { %13574 = sst [smem:[#allocation37_spill]] %s11621_s19 }
  0x25   :  { %s11641_s19 = sld [smem:[%s13554_s0 + %s11475_s28]]   ;;  %s11479_s28 = smov 29  }
  0x27   :  { %13575 = sst [smem:[#allocation38_spill]] %s11626_s30 }
  0x28   :  { %13576 = sst [smem:[#allocation39_spill]] %s11636_s17 }
  0x29   :  { %s11646_s30 = sld [smem:[%s13554_s0 + %s11476_s7]]   ;;  %s11480_s7 = smov 30  }
  0x2a   :  { %s11656_s17 = sld [smem:[%s13554_s0 + %s11478_s22]]  }
  0x2b   :  { %13577 = sst [smem:[#allocation40_spill]] %s11641_s19 }
  0x2c   :  { %s11661_s19 = sld [smem:[%s13554_s0 + %s11479_s28]]  }
  0x2d   :  { %s11666_s25 = sld [smem:[%s13554_s0 + %s11480_s7]]  }
  0x2e   :  { %67 = vsyncpa [#allocation3], 0 }
  0x2f   :  { %68 = vsyncpa [#allocation5], 0 }
  0x30   :  { %69 = vsyncpa [#allocation8], 0 }
  0x31   :  { %70 = vsyncpa [#allocation11], 0 }
  0x32   :  { %71 = vsyncpa [#allocation14], 0 }
  0x33   :  { %72 = vsyncpa [#allocation17], 0 }
  0x34   :  { %73 = vsyncpa [#allocation20], 0  ;;  %s11481_s15 = smov [#allocation4]   ;;  %s11482_s18 = smov [#allocation7]  }
  0x35   :  { %s94_s16 = sshll.u32 %s11481_s15, 4  ;;  %s130_s22 = sshll.u32 %s11482_s18, 4  ;;  %s95_s16 = int_to_ptr.vmem [resolvable:$true] %s94_s16  ;;  %s131_s22 = int_to_ptr.vmem [resolvable:$true] %s130_s22 }
  0x36   :  { %s11173_s23 = scalar_lea.hbm %s11526_s13, 128 }
  0x37   :  { %p11174_p0 = scmp.ne.s32.totalorder %s11526_s13, %s11173_s23  ;;  %p11177_p1 = scmp.lt.u32.totalorder %s11173_s23, %s11526_s13 }
  0x39   :  { %p11179_p2 = pnand %p11177_p1, %p11174_p0 }
  0x3b   :  { %11182 = shalt.err (!%p11179_p2)
}
  0x3c   :  { %s11183_s0 = scalar_lea.vmem %s95_s16, 128  ;;  %p11188_p4 = scmp.lt.s32.totalorder %s95_s16, %s95_s16 }
  0x3d   :  { %p11184_p3 = scmp.ne.s32.totalorder %s95_s16, %s11183_s0  ;;  %p11189_p5 = scmp.lt.s32.totalorder %s11183_s0, %s11183_s0 }
  0x3f   :  { %p11190_p6 = por %p11189_p5, %p11188_p4 }
  0x41   :  { %p11191_p7 = pnand %p11190_p6, %p11184_p3 }
  0x43   :  { %11194 = shalt.err (!%p11191_p7)
}
  0x44   :  { %97 = dma.hbm_to_vmem [thread:$0]  %s11526_s13, 128, %s95_s16, [#allocation5]  }
  0x45   :  { %s11195_s26 = scalar_lea.hbm %s11571_s24, 16 }
  0x46   :  { %p11196_p8 = scmp.ne.s32.totalorder %s11571_s24, %s11195_s26  ;;  %p11199_p9 = scmp.lt.u32.totalorder %s11195_s26, %s11571_s24 }
  0x48   :  { %p11201_p10 = pnand %p11199_p9, %p11196_p8 }
  0x4a   :  { %11204 = shalt.err (!%p11201_p10)
}
  0x4b   :  { %s11205_s28 = scalar_lea.vmem %s131_s22, 16  ;;  %s11209_s1 = scalar_lea.vmem %s131_s22, 32 }
  0x4c   :  { %p11206_p11 = scmp.ne.s32.totalorder %s131_s22, %s11205_s28  ;;  %p11210_p12 = scmp.lt.s32.totalorder %s131_s22, %s131_s22 }
  0x4d   :  { %p11211_p13 = scmp.lt.s32.totalorder %s11209_s1, %s11205_s28 }
  0x4f   :  { %p11212_p0 = por %p11211_p13, %p11210_p12 }
  0x51   :  { %p11213_p1 = pnand %p11212_p0, %p11206_p11 }
  0x53   :  { %11216 = shalt.err (!%p11213_p1)
}
  0x54   :  { %133 = dma.hbm_to_vmem [thread:$0]  %s11571_s24, 16, %s131_s22, [#allocation8]  }
  0x55   :  { %s11483_s2 = smov [#allocation10]   ;;  %s11484_s7 = smov [#allocation13]  }
  0x56   :  { %s154_s13 = sshll.u32 %s11483_s2, 4  ;;  %s178_s10 = sshll.u32 %s11484_s7, 4  ;;  %s155_s13 = int_to_ptr.vmem [resolvable:$true] %s154_s13  ;;  %s179_s10 = int_to_ptr.vmem [resolvable:$true] %s178_s10 }
  0x57   :  { %s11217_s11 = scalar_lea.hbm %s11586_s12, 16 }
  0x58   :  { %p11218_p2 = scmp.ne.s32.totalorder %s11586_s12, %s11217_s11  ;;  %p11221_p3 = scmp.lt.u32.totalorder %s11217_s11, %s11586_s12 }
  0x5a   :  { %p11223_p4 = pnand %p11221_p3, %p11218_p2 }
  0x5c   :  { %11226 = shalt.err (!%p11223_p4)
}
  0x5d   :  { %s11227_s15 = scalar_lea.vmem %s155_s13, 16  ;;  %s11231_s16 = scalar_lea.vmem %s155_s13, 32 }
  0x5e   :  { %p11228_p5 = scmp.ne.s32.totalorder %s155_s13, %s11227_s15  ;;  %p11232_p6 = scmp.lt.s32.totalorder %s155_s13, %s155_s13 }
  0x5f   :  { %p11233_p7 = scmp.lt.s32.totalorder %s11231_s16, %s11227_s15 }
  0x61   :  { %p11234_p8 = por %p11233_p7, %p11232_p6 }
  0x63   :  { %p11235_p9 = pnand %p11234_p8, %p11228_p5 }
  0x65   :  { %11238 = shalt.err (!%p11235_p9)
}
  0x66   :  { %157 = dma.hbm_to_vmem [thread:$0]  %s11586_s12, 16, %s155_s13, [#allocation11]  }
  0x67   :  { %s11239_s24 = scalar_lea.hbm %s11601_s4, 16 }
  0x68   :  { %p11240_p10 = scmp.ne.s32.totalorder %s11601_s4, %s11239_s24  ;;  %p11243_p11 = scmp.lt.u32.totalorder %s11239_s24, %s11601_s4 }
  0x6a   :  { %p11245_p12 = pnand %p11243_p11, %p11240_p10 }
  0x6c   :  { %11248 = shalt.err (!%p11245_p12)
}
  0x6d   :  { %s11249_s18 = scalar_lea.vmem %s179_s10, 16  ;;  %s11253_s22 = scalar_lea.vmem %s179_s10, 32 }
  0x6e   :  { %p11250_p13 = scmp.ne.s32.totalorder %s179_s10, %s11249_s18  ;;  %p11254_p0 = scmp.lt.s32.totalorder %s179_s10, %s179_s10 }
  0x6f   :  { %p11255_p1 = scmp.lt.s32.totalorder %s11253_s22, %s11249_s18 }
  0x71   :  { %p11256_p2 = por %p11255_p1, %p11254_p0 }
  0x73   :  { %p11257_p3 = pnand %p11256_p2, %p11250_p13 }
  0x75   :  { %11260 = shalt.err (!%p11257_p3)
}
  0x76   :  { %181 = dma.hbm_to_vmem [thread:$0]  %s11601_s4, 16, %s179_s10, [#allocation14]  }
  0x77   :  { %s11485_s23 = smov [#allocation16]   ;;  %s11486_s0 = smov [#allocation2]  }
  0x78   :  { %s202_s12 = sshll.u32 %s11485_s23, 4  ;;  %s81_s26 = sshll.u32 %s11486_s0, 4  ;;  %s203_s12 = int_to_ptr.vmem [resolvable:$true] %s202_s12  ;;  %s11684_s26 = int_to_ptr.vmem [resolvable:$true] %s81_s26 }
  0x79   :  { %s11261_s28 = scalar_lea.hbm %s11616_s8, 16 }
  0x7a   :  { %p11262_p4 = scmp.ne.s32.totalorder %s11616_s8, %s11261_s28  ;;  %p11265_p5 = scmp.lt.u32.totalorder %s11261_s28, %s11616_s8 }
  0x7c   :  { %p11267_p6 = pnand %p11265_p5, %p11262_p4 }
  0x7e   :  { %11270 = shalt.err (!%p11267_p6)
}
  0x7f   :  { %s11271_s1 = scalar_lea.vmem %s203_s12, 16  ;;  %s11275_s2 = scalar_lea.vmem %s203_s12, 32 }
  0x80   :  { %p11272_p7 = scmp.ne.s32.totalorder %s203_s12, %s11271_s1  ;;  %p11276_p8 = scmp.lt.s32.totalorder %s203_s12, %s203_s12 }
  0x81   :  { %p11277_p9 = scmp.lt.s32.totalorder %s11275_s2, %s11271_s1 }
  0x83   :  { %p11278_p10 = por %p11277_p9, %p11276_p8 }
  0x85   :  { %p11279_p11 = pnand %p11278_p10, %p11272_p7 }
  0x87   :  { %11282 = shalt.err (!%p11279_p11)
}
  0x88   :  { %205 = dma.hbm_to_vmem [thread:$0]  %s11616_s8, 16, %s203_s12, [#allocation17]  }
  0x89   :  { %s11283_s4 = scalar_lea.hbm %s11521_s9, 256 }
  0x8a   :  { %p11284_p12 = scmp.ne.s32.totalorder %s11521_s9, %s11283_s4  ;;  %p11287_p13 = scmp.lt.u32.totalorder %s11283_s4, %s11521_s9 }
  0x8c   :  { %p11289_p0 = pnand %p11287_p13, %p11284_p12 }
  0x8e   :  { %11292 = shalt.err (!%p11289_p0)
}
  0x8f   :  { %s11293_s13 = scalar_lea.vmem %s11684_s26, 256  ;;  %p11298_p2 = scmp.lt.s32.totalorder %s11684_s26, %s11684_s26 }
  0x90   :  { %p11294_p1 = scmp.ne.s32.totalorder %s11684_s26, %s11293_s13  ;;  %p11299_p3 = scmp.lt.s32.totalorder %s11293_s13, %s11293_s13 }
  0x92   :  { %p11300_p4 = por %p11299_p3, %p11298_p2 }
  0x94   :  { %p11301_p5 = pnand %p11300_p4, %p11294_p1 }
  0x96   :  { %11304 = shalt.err (!%p11301_p5)
}
  0x97   :  { %s11487_s7 = smov 128   ;;  %s11488_s8 = smov 8  }
  0x98   :  { %87 = dma.hbm_to_vmem [thread:$0]  %s11521_s9, 256, %s11684_s26, [#allocation3], %s11487_s7, %s11487_s7, %s11488_s8  }
  0x99   :  { %s11489_s10 = smov [#allocation6]   ;;  %s11490_s15 = smov [#allocation9]  }
  0x9a   :  { %s105_s11 = sshll.u32 %s11489_s10, 4  ;;  %s141_s16 = sshll.u32 %s11490_s15, 4  ;;  %s106_s11 = int_to_ptr.vmem [resolvable:$true] %s105_s11  ;;  %s11702_s16 = int_to_ptr.vmem [resolvable:$true] %s141_s16 }
  0x9b   :  { %s11305_s24 = scalar_lea.hbm %s11536_s21, 256 }
  0x9c   :  { %p11306_p6 = scmp.ne.s32.totalorder %s11536_s21, %s11305_s24  ;;  %p11309_p7 = scmp.lt.u32.totalorder %s11305_s24, %s11536_s21 }
  0x9e   :  { %p11311_p8 = pnand %p11309_p7, %p11306_p6 }
  0xa0   :  { %11314 = shalt.err (!%p11311_p8)
}
  0xa1   :  { %s11315_s18 = scalar_lea.vmem %s106_s11, 256  ;;  %p11320_p10 = scmp.lt.s32.totalorder %s106_s11, %s106_s11 }
  0xa2   :  { %p11316_p9 = scmp.ne.s32.totalorder %s106_s11, %s11315_s18  ;;  %p11321_p11 = scmp.lt.s32.totalorder %s11315_s18, %s11315_s18 }
  0xa4   :  { %p11322_p12 = por %p11321_p11, %p11320_p10 }
  0xa6   :  { %p11323_p13 = pnand %p11322_p12, %p11316_p9 }
  0xa8   :  { %11326 = shalt.err (!%p11323_p13)
}
  0xa9   :  { %111 = dma.hbm_to_vmem [thread:$0]  %s11536_s21, 256, %s106_s11, [#allocation5], %s11487_s7, %s11487_s7, %s11488_s8  }
  0xaa   :  { %s11327_s9 = scalar_lea.hbm %s11581_s6, 256 }
  0xab   :  { %p11328_p0 = scmp.ne.s32.totalorder %s11581_s6, %s11327_s9  ;;  %p11331_p1 = scmp.lt.u32.totalorder %s11327_s9, %s11581_s6 }
  0xad   :  { %p11333_p2 = pnand %p11331_p1, %p11328_p0 }
  0xaf   :  { %11336 = shalt.err (!%p11333_p2)
}
  0xb0   :  { %s11337_s22 = scalar_lea.vmem %s11702_s16, 256  ;;  %p11342_p4 = scmp.lt.s32.totalorder %s11702_s16, %s11702_s16 }
  0xb1   :  { %p11338_p3 = scmp.ne.s32.totalorder %s11702_s16, %s11337_s22  ;;  %p11343_p5 = scmp.lt.s32.totalorder %s11337_s22, %s11337_s22 }
  0xb3   :  { %p11344_p6 = por %p11343_p5, %p11342_p4 }
  0xb5   :  { %p11345_p7 = pnand %p11344_p6, %p11338_p3 }
  0xb7   :  { %11348 = shalt.err (!%p11345_p7)
}
  0xb8   :  { %147 = dma.hbm_to_vmem [thread:$0]  %s11581_s6, 256, %s11702_s16, [#allocation8], %s11487_s7, %s11487_s7, %s11488_s8  }
  0xb9   :  { %s11491_s21 = smov [#allocation12]   ;;  %s11492_s12 = smov [#allocation15]  }
  0xba   :  { %s165_s23 = sshll.u32 %s11491_s21, 4  ;;  %s189_s0 = sshll.u32 %s11492_s12, 4  ;;  %s166_s23 = int_to_ptr.vmem [resolvable:$true] %s165_s23  ;;  %s11723_s0 = int_to_ptr.vmem [resolvable:$true] %s189_s0 }
  0xbb   :  { %s11349_s26 = scalar_lea.hbm %s11596_s27, 512 }
  0xbc   :  { %p11350_p8 = scmp.ne.s32.totalorder %s11596_s27, %s11349_s26  ;;  %p11353_p9 = scmp.lt.u32.totalorder %s11349_s26, %s11596_s27 }
  0xbe   :  { %p11355_p10 = pnand %p11353_p9, %p11350_p8 }
  0xc0   :  { %11358 = shalt.err (!%p11355_p10)
}
  0xc1   :  { %s11359_s28 = scalar_lea.vmem %s166_s23, 512  ;;  %p11364_p12 = scmp.lt.s32.totalorder %s166_s23, %s166_s23 }
  0xc2   :  { %p11360_p11 = scmp.ne.s32.totalorder %s166_s23, %s11359_s28  ;;  %p11365_p13 = scmp.lt.s32.totalorder %s11359_s28, %s11359_s28 }
  0xc4   :  { %p11366_p0 = por %p11365_p13, %p11364_p12 }
  0xc6   :  { %p11367_p1 = pnand %p11366_p0, %p11360_p11 }
  0xc8   :  { %11370 = shalt.err (!%p11367_p1)
}
  0xc9   :  { %171 = dma.hbm_to_vmem [thread:$0]  %s11596_s27, 512, %s166_s23, [#allocation11], %s11487_s7, %s11487_s7, %s11488_s8  }
  0xca   :  { %s11371_s6 = scalar_lea.hbm %s11611_s20, 2048 }
  0xcb   :  { %p11372_p2 = scmp.ne.s32.totalorder %s11611_s20, %s11371_s6  ;;  %p11375_p3 = scmp.lt.u32.totalorder %s11371_s6, %s11611_s20 }
  0xcd   :  { %p11377_p4 = pnand %p11375_p3, %p11372_p2 }
  0xcf   :  { %11380 = shalt.err (!%p11377_p4)
}
  0xd0   :  { %s11381_s1 = scalar_lea.vmem %s11723_s0, 2048  ;;  %p11386_p6 = scmp.lt.s32.totalorder %s11723_s0, %s11723_s0 }
  0xd1   :  { %p11382_p5 = scmp.ne.s32.totalorder %s11723_s0, %s11381_s1  ;;  %p11387_p7 = scmp.lt.s32.totalorder %s11381_s1, %s11381_s1 }
  0xd3   :  { %p11388_p8 = por %p11387_p7, %p11386_p6 }
  0xd5   :  { %p11389_p9 = pnand %p11388_p8, %p11382_p5 }
  0xd7   :  { %11392 = shalt.err (!%p11389_p9)
}
  0xd8   :  { %s11493_s2 = smov 256   ;;  %s11494_s27 = smov 16  }
  0xd9   :  { %195 = dma.hbm_to_vmem [thread:$0]  %s11611_s20, 2048, %s11723_s0, [#allocation14], %s11493_s2, %s11493_s2, %s11494_s27  }
  0xda   :  { %s11495_s4 = smov [#allocation18]   ;;  %s11496_s7 = smov [#allocation19]  }
  0xdb   :  { %s216_s13 = sshll.u32 %s11495_s4, 4  ;;  %s230_s8 = sshll.u32 %s11496_s7, 4  ;;  %s217_s13 = int_to_ptr.vmem [resolvable:$true] %s216_s13  ;;  %s231_s8 = int_to_ptr.vmem [resolvable:$true] %s230_s8 }
  0xdc   :  { %s11393_s10 = scalar_lea.hbm %s11631_s14, 16 }
  0xdd   :  { %p11394_p10 = scmp.ne.s32.totalorder %s11631_s14, %s11393_s10  ;;  %p11397_p11 = scmp.lt.u32.totalorder %s11393_s10, %s11631_s14 }
  0xdf   :  { %p11399_p12 = pnand %p11397_p11, %p11394_p10 }
  0xe1   :  { %11402 = shalt.err (!%p11399_p12)
}
  0xe2   :  { %s11403_s11 = scalar_lea.vmem %s217_s13, 16  ;;  %s11407_s15 = scalar_lea.vmem %s217_s13, 32 }
  0xe3   :  { %p11404_p13 = scmp.ne.s32.totalorder %s217_s13, %s11403_s11  ;;  %p11408_p0 = scmp.lt.s32.totalorder %s217_s13, %s217_s13 }
  0xe4   :  { %p11409_p1 = scmp.lt.s32.totalorder %s11407_s15, %s11403_s11 }
  0xe6   :  { %p11410_p2 = por %p11409_p1, %p11408_p0 }
  0xe8   :  { %p11411_p3 = pnand %p11410_p2, %p11404_p13 }
  0xea   :  { %11414 = shalt.err (!%p11411_p3)
}
  0xeb   :  { %219 = dma.hbm_to_vmem [thread:$0]  %s11631_s14, 16, %s217_s13, [#allocation17]  }
  0xec   :  { %s11415_s20 = scalar_lea.hbm %s11646_s30, 16 }
  0xed   :  { %p11416_p4 = scmp.ne.s32.totalorder %s11646_s30, %s11415_s20  ;;  %p11419_p5 = scmp.lt.u32.totalorder %s11415_s20, %s11646_s30 }
  0xef   :  { %p11421_p6 = pnand %p11419_p5, %p11416_p4 }
  0xf1   :  { %11424 = shalt.err (!%p11421_p6)
}
  0xf2   :  { %s11425_s16 = scalar_lea.vmem %s231_s8, 16  ;;  %s11429_s24 = scalar_lea.vmem %s231_s8, 32 }
  0xf3   :  { %p11426_p7 = scmp.ne.s32.totalorder %s231_s8, %s11425_s16  ;;  %p11430_p8 = scmp.lt.s32.totalorder %s231_s8, %s231_s8 }
  0xf4   :  { %p11431_p9 = scmp.lt.s32.totalorder %s11429_s24, %s11425_s16 }
  0xf6   :  { %p11432_p10 = por %p11431_p9, %p11430_p8 }
  0xf8   :  { %p11433_p11 = pnand %p11432_p10, %p11426_p7 }
  0xfa   :  { %11436 = shalt.err (!%p11433_p11)
}
  0xfb   :  { %233 = dma.hbm_to_vmem [thread:$0]  %s11646_s30, 16, %s231_s8, [#allocation20]  }
  0xfc   :  { %11437 = dma.done.wait [#allocation3], 256  }
  0xfd   :  { %11438 = vsyncadd [#allocation3], 4294967040 }
  0xfe   :  { %11439 = dma.done.wait [#allocation5], 384  }
  0xff   :  { %11440 = vsyncadd [#allocation5], 4294966912 }
 0x100   :  { %11441 = dma.done.wait [#allocation8], 272  }
 0x101   :  { %11442 = vsyncadd [#allocation8], 4294967024 }
 0x102   :  { %11443 = dma.done.wait [#allocation11], 528  }
 0x103   :  { %11444 = vsyncadd [#allocation11], 4294966768 }
 0x104   :  { %11445 = dma.done.wait [#allocation14], 2064  }
 0x105   :  { %11446 = vsyncadd [#allocation14], 4294965232 }
 0x106   :  { %11447 = dma.done.wait [#allocation17], 32  }
 0x107   :  { %11448 = vsyncadd [#allocation17], 4294967264 }
 0x108   :  { %11449 = dma.done.wait [#allocation20], 16  }
 0x109   :  { %11450 = vsyncadd [#allocation20], 4294967280  ;;  %v11497_v0 = vmov 0.0   ;;  %vm11498_vm0 = vmmov 0   ;;  %vm287_vm1 = vcmask 1045504   ;;  %vm379_vm2 = vcmask 1040384  }
 0x10a   :  { %8822 = vmatprep.subr.mxu0 %v11497_v0  ;;  %8824 = vmatprep.mubr.msk.f32.mxu0 %vm11498_vm0, %v11497_v0  ;;  %vm283_vm3 = vcmask 48128   ;;  %v275_v1 = vld [vmem:[#allocation4] sm:$0x3f]  ;;  %v274_v2 = vld [vmem:[%s11516_s5] sm:$0xff]  ;;  %v363_v3 = vld [vmem:[#allocation6] sm:$0xff]  ;;  %vm372_vm4 = vcmask 72704   ;;  %v478_v42 = vlaneseq }
 0x10b   :  { %559 = vmatprep.mubr.f32.mxu1 %v11497_v0  ;;  %8823 = vmatpush3.msk.msra.mxu0 %vm287_vm1, %v275_v1  ;;  %v364_v4 = vld [vmem:[#allocation6 + $0x8] sm:$0x1]  ;;  %vm11499_vm5 = vmmov 1   ;;  %v461_v7 = vld [vmem:[%s11546_s29 + $0x8] sm:$0xff]  ;;  %v463_v8 = vld [vmem:[%s11546_s29 + $0x18] sm:$0xff]  ;;  %s13578_s5 = sld [smem:[#allocation29_spill]] }
 0x10c   :  { %vm9910_vm6 = vmpackc.low %vm379_vm2, %vm11499_vm5  ;;  %v361_v5 = vld [vmem:[#allocation2] sm:$0xff]  ;;  %8825 = vmatmul.mubr.msk.f32.vlgmr.msra.gmra.mrb[0].mxu0 %vm283_vm3, %v274_v2  ;;  %v9909_v6 = vpack.c.bf16 %v364_v4, %v363_v3  ;;  %v9915_v10 = vpack.c.bf16 %v463_v8, %v461_v7  ;;  %v462_v11 = vld [vmem:[%s11546_s29 + $0x10] sm:$0xff]  ;;  %s13579_s14 = sld [smem:[#allocation30_spill]]  ;;  %vm488_vm7 = vcmask 523264   ;;  %v11500_v41 = vmov 0.0|0.0   ;;  %s13581_s30 = sld [smem:[#allocation32_spill]] }
 0x10d   :  { %v460_v9 = vld [vmem:[%s11546_s29] sm:$0xff]  ;;  %8831 = vmatprep.mubr.msk.f32.mxu0 %vm372_vm4, %v361_v5  ;;  %v465_v12 = vld [vmem:[%s11546_s29 + $0x28] sm:$0xff]  ;;  %v467_v13 = vld [vmem:[%s11546_s29 + $0x38] sm:$0xff]  ;;  %v11785_v43 = vshrl.u32 %v478_v42, 7  ;;  %vm602_vm8 = vcmask 1043456   ;;  %s13582_s18 = sld [smem:[#allocation33_spill]] }
 0x10e   :  { %9911 = vmatprep.subr.msk.bf16.mxu0 %vm9910_vm6, %v9909_v6  ;;  %v9917_v14 = vpack.c.bf16 %v462_v11, %v460_v9  ;;  %v9919_v15 = vpack.c.bf16 %v467_v13, %v465_v12  ;;  %v362_v16 = vld [vmem:[#allocation2 + $0x8] sm:$0xf]  ;;  %9916 = vmatprep.subr.bf16.mxu1 %v9915_v10  ;;  %v464_v17 = vld [vmem:[%s11546_s29 + $0x20] sm:$0xff]  ;;  %v466_v18 = vld [vmem:[%s11546_s29 + $0x30] sm:$0xff]  ;;  %s13585_s9 = sld [smem:[#allocation31_spill]]  ;;  %vm598_vm10 = vcmask 97280  }
 0x10f   :  { %9914 = vmatpush3.bf16.msk.msra.mxu0 %vm9910_vm6, %v9909_v6  ;;  %v9921_v19 = vpack.c.bf16 %v466_v18, %v464_v17  ;;  %v469_v20 = vld [vmem:[%s11546_s29 + $0x48] sm:$0xff]  ;;  %v471_v21 = vld [vmem:[%s11546_s29 + $0x58] sm:$0xff]  ;;  %v468_v22 = vld [vmem:[%s11546_s29 + $0x40] sm:$0xff]  ;;  %v480_v44 = vsub.s32 0, %v11785_v43  ;;  %v484_v46 = vsub.s32 1, %v11785_v43  ;;  %vm676_vm11 = vcmask 64512  }
 0x110   :  { %9918 = vmatpush1.bf16.msra.mxu1 %v9917_v14  ;;  %v9923_v23 = vpack.c.bf16 %v471_v21, %v469_v20  ;;  %v470_v24 = vld [vmem:[%s11546_s29 + $0x50] sm:$0xff]  ;;  %v473_v26 = vld [vmem:[%s11546_s29 + $0x68] sm:$0xff]  ;;  %v475_v27 = vld [vmem:[%s11546_s29 + $0x78] sm:$0xff]  ;;  %9947 = vmatprep.subr.bf16.mxu0 %v11500_v41  ;;  %s13586_s22 = sld [smem:[#allocation34_spill]]  ;;  %s11501_s21 = smov 120   ;;  %vm2403_vm12 = vcmask 130048  }
 0x111   :  { %9920 = vmatprep.subr.bf16.mxu1 %v9919_v15  ;;  %v9925_v25 = vpack.c.bf16 %v470_v24, %v468_v22  ;;  %v9927_v28 = vpack.c.bf16 %v475_v27, %v473_v26  ;;  %v472_v29 = vld [vmem:[%s11546_s29 + $0x60] sm:$0xff]  ;;  %v474_v30 = vld [vmem:[%s11546_s29 + $0x70] sm:$0xff]  ;;  %s13580_s29 = sld [smem:[#allocation28_spill]]  ;;  %vm11795_vm9 = vmpackc.low %vm602_vm8, %vm11499_vm5  ;;  %s11502_s23 = smov 112   ;;  %vm3287_vm13 = vcmask 261120  }
 0x112   :  { %8832 = vmatmul.mubr.msk.f32.vlgmr.msra.gmra.mrb[2].mxu0 %vm372_vm4, %v362_v16  ;;  %v9929_v31 = vpack.c.bf16 %v474_v30, %v472_v29  ;;  %v8022_v34 = vld [vmem:[%s13578_s5] ss:$0 sm:$0xff]  ;;  %s11503_s12 = smov 104   ;;  %s11504_s0 = smov 96  }
 0x113   :  { %8876 = vmatprep.mubr.msk.f32.mxu0 %vm11498_vm0, %v11497_v0  ;;  %v476_v45 = vld [vmem:[%s13579_s14] sm:$0x3]  ;;  %v1271_v21 = vld [vmem:[%s13582_s18 + $0x8] sm:$0xff]  ;;  %v1272_v26 = vld [vmem:[%s13582_s18 + $0x10] sm:$0xff]  ;;  %s11505_s26 = smov 80   ;;  %s11506_s28 = smov 64  }
 0x114   :  { %9922 = vmatpush1.bf16.msra.mxu1 %v9921_v19  ;;  %v481_v47 = vrot.slane %v476_v45, %v480_v44  ;;  %v485_v48 = vrot.slane %v476_v45, %v484_v46  ;;  %v597_v18 = vld [vmem:[%s13581_s30] sm:$0xff]  ;;  %v11808_v19 = vld [vmem:[%s13581_s30 + $0x10] sm:$0xff]  ;;  %v1273_v27 = vld [vmem:[%s13582_s18 + $0x18] sm:$0xff]  ;;  %s13588_s6 = sld [smem:[#allocation36_spill]]  ;;  %s11507_s1 = smov 32  }
 0x115   :  { %9924 = vmatprep.subr.bf16.mxu1 %v9923_v23  ;;  %v1270_v20 = vld [vmem:[%s13582_s18] sm:$0xff]  ;;  %v1047_v24 = vld [vmem:[%s13585_s9 + $0x10] sm:$0xff]  ;;  %v1275_v30 = vld [vmem:[%s13582_s18 + $0x28] sm:$0xff]  ;;  %s13589_s2 = sld [smem:[#allocation37_spill]]  ;;  %s13590_s27 = sld [smem:[#allocation38_spill]] }
 0x116   :  { %v596_v23 = vld [vmem:[%s13585_s9] sm:$0xff]  ;;  %v1281_v42 = vld [vmem:[%s13582_s18 + $0x58] sm:$0xff]  ;;  %v1384_v13 = vld [vmem:[%s13586_s22 + $0xa8] sm:$0xff]  ;;  %s13591_s4 = sld [smem:[#allocation39_spill]]  ;;  %s13592_s13 = sld [smem:[#allocation40_spill]] }
 0x117   :  { %v8019_v16 = vld [vmem:[%s13580_s29] ss:$0 sm:$0xff] }
 0x118   :  { %9926 = vmatpush1.bf16.msra.mxu1 %v9925_v25  ;;  %v9956_v25 = vpack.c.bf16 %v1271_v21, %v1270_v20  ;;  %v1274_v29 = vld [vmem:[%s13582_s18 + $0x20] sm:$0xff] }
 0x119   :  { %9928 = vmatprep.subr.bf16.mxu1 %v9927_v28  ;;  %v9959_v28 = vpack.c.bf16 %v1273_v27, %v1272_v26  ;;  %v1391_v21 = vld [vmem:[%s13586_s22 + $0xe0] sm:$0xff]  ;;  %v1394_v26 = vld [vmem:[%s13586_s22 + $0xf8] sm:$0xff] }
 0x11a   :  { %v1399_v27 = vld [vmem:[%s13586_s22 + $0x120] sm:$0xff] }
 0x11c   :  { %9930 = vmatpush1.bf16.msra.mxu1 %v9929_v31  ;;  %v827_v31 = vld [vmem:[%s13581_s30 + $0x8] sm:$0xff] }
 0x11d   :  { %9931 = vmatprep.subr.bf16.mxu1 %v11500_v41 }
 0x1df   :  { %v11775_v32 = vpop.f32.mrb[0].mxu0 }
 0x1e0   :  { %v8826_v33 = vpop.f32.mrb[1].mxu0  ;;  %v11815_v22 = vadd.f32 %v8019_v16, %v11775_v32  ;;  %v9962_v32 = vpack.c.bf16 %v1275_v30, %v1274_v29  ;;  %v1393_v29 = vld [vmem:[%s13586_s22 + $0xf0] sm:$0xff]  ;;  %v1398_v30 = vld [vmem:[%s13586_s22 + $0x118] sm:$0xff] }
 0x1e1   :  { %v1276_v33 = vld [vmem:[%s13582_s18 + $0x30] sm:$0xff] }
 0x1e5   :  { %v8833_v35 = vpop.f32.mrb[2].mxu0 }
 0x1e6   :  { %v449_v36 = vpop.f32.mrb[3].mxu0  ;;  %v455_v38 = vadd.f32 %v8833_v35, %v8022_v34  ;;  %v826_v35 = vld [vmem:[%s13585_s9 + $0x8] sm:$0xff] }
 0x1e7   :  { %v450_v37 = vadd.f32 %v8022_v34, %v449_v36  ;;  %v1277_v34 = vld [vmem:[%s13582_s18 + $0x38] sm:$0xff] }
 0x1e8   :  { %v459_v40 = vmax.f32 %v455_v38, 0.0  ;;  %v9965_v36 = vpack.c.bf16 %v1277_v34, %v1276_v33  ;;  %v1279_v38 = vld [vmem:[%s13582_s18 + $0x48] sm:$0xff]  ;;  %v1401_v33 = vld [vmem:[%s13586_s22 + $0x130] sm:$0xff]  ;;  %v1395_v34 = vld [vmem:[%s13586_s22 + $0x100] sm:$0xff] }
 0x1e9   :  { %v458_v39 = vmax.f32 %v450_v37, 0.0  ;;  %v1278_v37 = vld [vmem:[%s13582_s18 + $0x40] sm:$0xff] }
 0x1eb   :  { %8026 = vmatmul.mubr.msk.f32.vlgmr.msra.gmra.mrb[0].mxu1 %vm488_vm7, %v458_v39  ;;  %v9968_v39 = vpack.c.bf16 %v1279_v38, %v1278_v37  ;;  %v1404_v38 = vld [vmem:[%s13586_s22 + $0x148] sm:$0xff] }
 0x1ec   :  { %565 = vmatprep.mubr.f32.mxu1 %v11497_v0 }
 0x1ef   :  { %8027 = vmatmul.mubr.msk.f32.gmra.mrb[2].mxu1 %vm488_vm7, %v459_v40  ;;  %v1280_v40 = vld [vmem:[%s13582_s18 + $0x50] sm:$0xff] }
 0x1f0   :  { %8838 = vmatprep.mubr.msk.f32.mxu1 %vm11498_vm0, %v11497_v0  ;;  %v9971_v45 = vpack.c.bf16 %v1281_v42, %v1280_v40  ;;  %v1403_v40 = vld [vmem:[%s13586_s22 + $0x140] sm:$0xff] }
 0x2be   :  { %v561_v49 = vpop.f32.mrb[0].mxu1 }
 0x2bf   :  { %v562_v50 = vadd.f32 %v561_v49, %v481_v47  ;;  %v563_v51 = vpop.f32.mrb[1].mxu1 }
 0x2c0   :  { %v564_v52 = vadd.f32 %v563_v51, %v485_v48  ;;  %v1285_v51 = vld [vmem:[%s13582_s18 + $0x78] sm:$0xff] }
 0x2c1   :  { %v572_v53 = vsub.f32 0.0, %v562_v50  ;;  %v1284_v50 = vld [vmem:[%s13582_s18 + $0x70] sm:$0xff] }
 0x2c2   :  { %v573_v54 = vsub.f32 0.0, %v564_v52  ;;  %v567_v55 = vpop.f32.mrb[2].mxu1  ;;  %v9977_v52 = vpack.c.bf16 %v1285_v51, %v1284_v50  ;;  %v1405_v51 = vld [vmem:[%s13586_s22 + $0x150] sm:$0xff] }
 0x2c3   :  { %v576_v56 = vmul.f32 1.442695, %v572_v53  ;;  %v568_v57 = vadd.f32 %v567_v55, %v481_v47  ;;  %v569_v58 = vpop.f32.mrb[3].mxu1  ;;  %v1282_v47 = vld [vmem:[%s13582_s18 + $0x60] sm:$0xff]  ;;  %v1364_v53 = vld [vmem:[%s13586_s22 + $0x8] sm:$0xff] }
 0x2c4   :  { %v578_v59 = vmul.f32 1.442695, %v573_v54  ;;  %v570_v60 = vadd.f32 %v569_v58, %v485_v48  ;;  %v1283_v48 = vld [vmem:[%s13582_s18 + $0x68] sm:$0xff]  ;;  %v1369_v54 = vld [vmem:[%s13586_s22 + $0x30] sm:$0xff]  ;;  %v1366_v58 = vld [vmem:[%s13586_s22 + $0x18] sm:$0xff] }
 0x2c5   :  { %11157 = vpow2.f32 %v576_v56  ;;  %v574_v61 = vsub.f32 0.0, %v568_v57  ;;  %v9974_v49 = vpack.c.bf16 %v1283_v48, %v1282_v47  ;;  %v9979_v55 = vpack.c.bf16 %v1369_v54, %v1364_v53  ;;  %v1363_v56 = vld [vmem:[%s13586_s22] sm:$0xff]  ;;  %v1368_v57 = vld [vmem:[%s13586_s22 + $0x28] sm:$0xff]  ;;  %v1406_v47 = vld [vmem:[%s13586_s22 + $0x158] sm:$0xff] }
 0x2c6   :  { %11159 = vpow2.f32 %v578_v59  ;;  %v575_v62 = vsub.f32 0.0, %v570_v60  ;;  %v9981_v59 = vpack.c.bf16 %v1368_v57, %v1363_v56  ;;  %v1371_v60 = vld [vmem:[%s13586_s22 + $0x40] sm:$0xff]  ;;  %v1414_v53 = vld [vmem:[%s13586_s22 + $0x198] sm:$0xff]  ;;  %v1413_v56 = vld [vmem:[%s13586_s22 + $0x190] sm:$0xff] }
 0x2c7   :  { %v580_v63 = vmul.f32 1.442695, %v574_v61  ;;  %v1365_v61 = vld [vmem:[%s13586_s22 + $0x10] sm:$0xff]  ;;  %v1411_v48 = vld [vmem:[%s13586_s22 + $0x180] sm:$0xff]  ;;  %v1418_v57 = vld [vmem:[%s13586_s22 + $0x1b8] sm:$0xff] }
 0x2c8   :  { %v582_v1 = vmul.f32 1.442695, %v575_v62  ;;  %v1370_v62 = vld [vmem:[%s13586_s22 + $0x38] sm:$0xff]  ;;  %v10027_v50 = vpack.c.bf16 %v1411_v48, %v1406_v47 }
 0x2c9   :  { %11161 = vpow2.f32 %v580_v63  ;;  %v10011_v63 = vpack.c.bf16 %v1371_v60, %v1366_v58  ;;  %v1416_v60 = vld [vmem:[%s13586_s22 + $0x1a8] sm:$0xff] }
 0x2ca   :  { %11163 = vpow2.f32 %v582_v1  ;;  %v10013_v1 = vpack.c.bf16 %v1370_v62, %v1365_v61  ;;  %v1421_v61 = vld [vmem:[%s13586_s22 + $0x1d0] sm:$0xff]  ;;  %v1415_v62 = vld [vmem:[%s13586_s22 + $0x1a0] sm:$0xff] }
 0x2cf   :  { %v11158_v2 = vpop.eup %11157 }
 0x2d0   :  { %v11160_v3 = vpop.eup %11159  ;;  %v584_v4 = vadd.f32 1.0, %v11158_v2  ;;  %v1374_v2 = vld [vmem:[%s13586_s22 + $0x58] sm:$0xff] }
 0x2d1   :  { %v585_v5 = vadd.f32 1.0, %v11160_v3  ;;  %v1379_v3 = vld [vmem:[%s13586_s22 + $0x80] sm:$0xff] }
 0x2d2   :  { %11165 = vrcp.f32 %v584_v4  ;;  %v1373_v4 = vld [vmem:[%s13586_s22 + $0x50] sm:$0xff] }
 0x2d3   :  { %v11162_v6 = vpop.eup %11161  ;;  %11167 = vrcp.f32 %v585_v5  ;;  %v9983_v5 = vpack.c.bf16 %v1379_v3, %v1374_v2  ;;  %v1424_v3 = vld [vmem:[%s13586_s22 + $0x1e8] sm:$0xff] }
 0x2d4   :  { %v11164_v7 = vpop.eup %11163  ;;  %v586_v8 = vadd.f32 1.0, %v11162_v6  ;;  %v1378_v6 = vld [vmem:[%s13586_s22 + $0x78] sm:$0xff] }
 0x2d5   :  { %v587_v9 = vadd.f32 1.0, %v11164_v7  ;;  %v1376_v7 = vld [vmem:[%s13586_s22 + $0x68] sm:$0xff] }
 0x2d6   :  { %11169 = vrcp.f32 %v586_v8  ;;  %v1381_v8 = vld [vmem:[%s13586_s22 + $0x90] sm:$0xff] }
 0x2d7   :  { %11171 = vrcp.f32 %v587_v9  ;;  %v9985_v9 = vpack.c.bf16 %v1378_v6, %v1373_v4  ;;  %v1429_v4 = vld [vmem:[%s13586_s22 + $0x210] sm:$0xff]  ;;  %v1423_v6 = vld [vmem:[%s13586_s22 + $0x1e0] sm:$0xff] }
 0x2dc   :  { %v11166_v10 = vpop.eup %11165 }
 0x2dd   :  { %v11168_v11 = vpop.eup %11167 }
 0x2e0   :  { %v11170_v12 = vpop.eup %11169 }
 0x2e1   :  { %v11172_v14 = vpop.eup %11171  ;;  %v9932_v15 = vpack.c.bf16 %v11170_v12, %v11166_v10  ;;  %v10015_v10 = vpack.c.bf16 %v1381_v8, %v1376_v7  ;;  %v1380_v12 = vld [vmem:[%s13586_s22 + $0x88] sm:$0xff]  ;;  %v1426_v8 = vld [vmem:[%s13586_s22 + $0x1f8] sm:$0xff] }
 0x2e2   :  { %v11800_v17 = vpack.c.bf16 %v11172_v14, %v11168_v11  ;;  %v1375_v11 = vld [vmem:[%s13586_s22 + $0x60] sm:$0xff]  ;;  %v1428_v7 = vld [vmem:[%s13586_s22 + $0x208] sm:$0xff] }
 0x2e3   :  { %9934 = vmatpush3.bf16.msk.msra.mxu1 %vm11795_vm9, %v9932_v15  ;;  %9950 = vmatpush3.bf16.msk.msra.mxu0 %vm11795_vm9, %v9932_v15  ;;  %v10017_v14 = vpack.c.bf16 %v1380_v12, %v1375_v11  ;;  %v1425_v11 = vld [vmem:[%s13586_s22 + $0x1f0] sm:$0xff]  ;;  %v1430_v12 = vld [vmem:[%s13586_s22 + $0x218] sm:$0xff] }
 0x2e4   :  { %8841 = vmatprep.subr.mxu1 %v11497_v0  ;;  %8879 = vmatprep.subr.mxu0 %v11497_v0 }
 0x2e6   :  { %8839 = vmatmul.mubr.msk.f32.vlgmr.msra.gmra.mrb[4].mxu1 %vm598_vm10, %v597_v18  ;;  %8877 = vmatmul.mubr.msk.f32.vlgmr.msra.gmra.mrb[4].mxu0 %vm598_vm10, %v11808_v19 }
 0x2e7   :  { %8842 = vmatpush3.msra.mxu1 %v11815_v22  ;;  %8880 = vmatpush3.msra.mxu0 %v11815_v22 }
 0x2e8   :  { %8843 = vmatprep.mubr.msk.f32.mxu1 %vm11498_vm0, %v11497_v0  ;;  %9935 = vmatprep.subr.bf16.mxu1 %v11500_v41 }
 0x2e9   :  { %8881 = vmatprep.mubr.msk.f32.mxu0 %vm11498_vm0, %v11497_v0  ;;  %9955 = vmatprep.subr.bf16.mxu0 %v11500_v41 }
 0x2ea   :  { %8844 = vmatmul.mubr.msk.f32.vlgmr.msra.gmra.mrb[6].mxu1 %vm676_vm11, %v596_v23  ;;  %8882 = vmatmul.mubr.msk.f32.vlgmr.msra.gmra.mrb[6].mxu0 %vm676_vm11, %v1047_v24  ;;  %v1390_v23 = vld [vmem:[%s13586_s22 + $0xd8] sm:$0xff] }
 0x2eb   :  { %9938 = vmatpush3.bf16.msk.msra.mxu1 %vm11795_vm9, %v11800_v17  ;;  %9957 = vmatpush3.bf16.msra.mxu0 %v9956_v25 }
 0x2ec   :  { %8850 = vmatprep.mubr.msk.f32.mxu1 %vm11498_vm0, %v11497_v0  ;;  %9939 = vmatprep.subr.bf16.mxu1 %v11500_v41 }
 0x2ed   :  { %9958 = vmatprep.subr.bf16.mxu0 %v11500_v41  ;;  %8923 = vmatprep.mubr.msk.f32.mxu0 %vm11498_vm0, %v11497_v0 }
 0x2ee   :  { %8851 = vmatmul.mubr.msk.f32.vlgmr.msra.gmra.mrb[8].mxu1 %vm598_vm10, %v597_v18  ;;  %v1388_v18 = vld [vmem:[%s13586_s22 + $0xc8] sm:$0xff] }
 0x2ef   :  { %9942 = vmatpush3.bf16.msk.msra.mxu1 %vm11795_vm9, %v9932_v15  ;;  %9960 = vmatpush3.bf16.msra.mxu0 %v9959_v28  ;;  %v1389_v15 = vld [vmem:[%s13586_s22 + $0xd0] sm:$0xff]  ;;  %v9991_v28 = vpack.c.bf16 %v1399_v27, %v1394_v26 }
 0x2f0   :  { %8857 = vmatprep.mubr.msk.f32.mxu1 %vm11498_vm0, %v11497_v0  ;;  %8860 = vmatprep.subr.mxu1 %v11497_v0  ;;  %v9987_v16 = vpack.c.bf16 %v1389_v15, %v1384_v13  ;;  %v1434_v15 = vld [vmem:[%s13586_s22 + $0x238] sm:$0xff]  ;;  %v1656_v27 = vld [vmem:[#allocation9] sm:$0xff] }
 0x2f1   :  { %9961 = vmatprep.subr.bf16.mxu0 %v11500_v41  ;;  %1747 = vrot.lane.b32.xlu0 %v1656_v27, %s11501_s21 }
 0x2f2   :  { %8858 = vmatmul.mubr.msk.f32.vlgmr.msra.gmra.mrb[10].mxu1 %vm598_vm10, %v827_v31  ;;  %1832 = vrot.lane.b32.xlu1 %v1656_v27, %s11502_s23 }
 0x2f3   :  { %8861 = vmatpush3.msra.mxu1 %v11815_v22  ;;  %9963 = vmatpush3.bf16.msra.mxu0 %v9962_v32  ;;  %v9993_v32 = vpack.c.bf16 %v1398_v30, %v1393_v29 }
 0x2f4   :  { %8862 = vmatprep.mubr.msk.f32.mxu1 %vm11498_vm0, %v11497_v0  ;;  %9943 = vmatprep.subr.bf16.mxu1 %v11500_v41 }
 0x2f5   :  { %9964 = vmatprep.subr.bf16.mxu0 %v11500_v41 }
 0x2f6   :  { %8863 = vmatmul.mubr.msk.f32.vlgmr.msra.gmra.mrb[12].mxu1 %vm676_vm11, %v826_v35  ;;  %v1400_v35 = vld [vmem:[%s13586_s22 + $0x128] sm:$0xff] }
 0x2f7   :  { %9946 = vmatpush3.bf16.msk.msra.mxu1 %vm11795_vm9, %v11800_v17  ;;  %9966 = vmatpush3.bf16.msra.mxu0 %v9965_v36  ;;  %v10025_v37 = vpack.c.bf16 %v1400_v35, %v1395_v34 }
 0x2f8   :  { %8869 = vmatprep.mubr.msk.f32.mxu1 %vm11498_vm0, %v11497_v0  ;;  %9951 = vmatprep.subr.bf16.mxu1 %v11500_v41 }
 0x2f9   :  { %9967 = vmatprep.subr.bf16.mxu0 %v11500_v41 }
 0x2fa   :  { %8870 = vmatmul.mubr.msk.f32.vlgmr.msra.gmra.mrb[8].mxu1 %vm598_vm10, %v827_v31  ;;  %v1396_v31 = vld [vmem:[%s13586_s22 + $0x108] sm:$0xff] }
 0x2fb   :  { %9954 = vmatpush3.bf16.msk.msra.mxu1 %vm11795_vm9, %v11800_v17  ;;  %9969 = vmatpush3.bf16.msra.mxu0 %v9968_v39  ;;  %v1383_v17 = vld [vmem:[%s13586_s22 + $0xa0] sm:$0xff]  ;;  %v10023_v36 = vpack.c.bf16 %v1401_v33, %v1396_v31  ;;  %v1409_v39 = vld [vmem:[%s13586_s22 + $0x170] sm:$0xff] }
 0x2fc   :  { %9970 = vmatprep.subr.bf16.mxu0 %v11500_v41  ;;  %8888 = vmatprep.mubr.msk.f32.mxu1 %vm11498_vm0, %v11497_v0  ;;  %v9989_v20 = vpack.c.bf16 %v1388_v18, %v1383_v17  ;;  %v9995_v42 = vpack.c.bf16 %v1409_v39, %v1404_v38  ;;  %v1433_v18 = vld [vmem:[%s13586_s22 + $0x230] sm:$0xff] }
 0x2fd   :  { %9980 = vmatprep.subr.bf16.mxu1 %v9979_v55  ;;  %v1419_v55 = vld [vmem:[%s13586_s22 + $0x1c0] sm:$0xff] }
 0x2fe   :  { %v9999_v58 = vpack.c.bf16 %v1419_v55, %v1414_v53  ;;  %v1372_v55 = vld [vmem:[%s13586_s22 + $0x48] sm:$0xff] }
 0x2ff   :  { %9972 = vmatpush3.bf16.msra.mxu0 %v9971_v45  ;;  %v1408_v45 = vld [vmem:[%s13586_s22 + $0x168] sm:$0xff] }
 0x300   :  { %9973 = vmatprep.subr.bf16.mxu0 %v11500_v41 }
 0x302   :  { %8889 = vmatmul.mubr.msk.f32.vlgmr.msra.gmra.mrb[8].mxu1 %vm598_vm10, %v11808_v19  ;;  %v1386_v19 = vld [vmem:[%s13586_s22 + $0xb8] sm:$0xff] }
 0x303   :  { %9975 = vmatpush3.bf16.msra.mxu0 %v9974_v49  ;;  %1507 = vmatprep.mubr.f32.mxu1 %v11497_v0  ;;  %v10019_v24 = vpack.c.bf16 %v1391_v21, %v1386_v19  ;;  %v9997_v49 = vpack.c.bf16 %v1408_v45, %v1403_v40  ;;  %v1438_v19 = vld [vmem:[%s13586_s22 + $0x258] sm:$0xff] }
 0x304   :  { %9976 = vmatprep.subr.bf16.mxu0 %v11500_v41  ;;  %9982 = vmatpush1.bf16.msra.mxu1 %v9981_v59  ;;  %v10001_v59 = vpack.c.bf16 %v1418_v57, %v1413_v56  ;;  %v10009_v21 = vpack.c.bf16 %v1438_v19, %v1433_v18  ;;  %v8043_v56 = vld [vmem:[#allocation7] ss:$0 sm:$0xff] }
 0x305   :  { %9984 = vmatprep.subr.bf16.mxu1 %v9983_v5  ;;  %v10003_v5 = vpack.c.bf16 %v1429_v4, %v1424_v3  ;;  %v1397_v4 = vld [vmem:[%s13586_s22 + $0x110] sm:$0xff] }
 0x307   :  { %9978 = vmatpush3.bf16.msra.mxu0 %v9977_v52  ;;  %v1410_v52 = vld [vmem:[%s13586_s22 + $0x178] sm:$0xff] }
 0x308   :  { %10012 = vmatprep.subr.bf16.mxu0 %v10011_v63  ;;  %9986 = vmatpush1.bf16.msra.mxu1 %v9985_v9  ;;  %v10029_v54 = vpack.c.bf16 %v1410_v52, %v1405_v51  ;;  %v10031_v63 = vpack.c.bf16 %v1421_v61, %v1416_v60  ;;  %v10005_v9 = vpack.c.bf16 %v1428_v7, %v1423_v6  ;;  %v1377_v61 = vld [vmem:[%s13586_s22 + $0x70] sm:$0xff]  ;;  %v1407_v7 = vld [vmem:[%s13586_s22 + $0x160] sm:$0xff] }
 0x309   :  { %9988 = vmatprep.subr.bf16.mxu1 %v9987_v16  ;;  %v1439_v16 = vld [vmem:[%s13586_s22 + $0x260] sm:$0xff] }
 0x30a   :  { %8924 = vmatmul.mubr.f32.vlgmr.msra.gmra.mrb[8].mxu0 %v11815_v22  ;;  %v1385_v22 = vld [vmem:[%s13586_s22 + $0xb0] sm:$0xff]  ;;  %v10007_v17 = vpack.c.bf16 %v1439_v16, %v1434_v15 }
 0x30b   :  { %1578 = vmatprep.mubr.f32.mxu0 %v11497_v0  ;;  %10014 = vmatpush1.bf16.msra.mxu0 %v10013_v1  ;;  %v10021_v25 = vpack.c.bf16 %v1390_v23, %v1385_v22  ;;  %v1420_v1 = vld [vmem:[%s13586_s22 + $0x1c8] sm:$0xff]  ;;  %v1441_v22 = vld [vmem:[%s13586_s22 + $0x270] sm:$0xff]  ;;  %v1435_v23 = vld [vmem:[%s13586_s22 + $0x240] sm:$0xff] }
 0x30c   :  { %10016 = vmatprep.subr.bf16.mxu0 %v10015_v10  ;;  %9990 = vmatpush1.bf16.msra.mxu1 %v9989_v20  ;;  %v10033_v2 = vpack.c.bf16 %v1420_v1, %v1415_v62  ;;  %v1431_v10 = vld [vmem:[%s13586_s22 + $0x220] sm:$0xff]  ;;  %v1436_v20 = vld [vmem:[%s13586_s22 + $0x248] sm:$0xff]  ;;  %v1382_v62 = vld [vmem:[%s13586_s22 + $0x98] sm:$0xff] }
 0x30d   :  { %9992 = vmatprep.subr.bf16.mxu1 %v9991_v28  ;;  %v10035_v13 = vpack.c.bf16 %v1431_v10, %v1426_v8  ;;  %v11958_v28 = vld [vmem:[#allocation9 + $0x8] sm:$0xff]  ;;  %v1387_v1 = vld [vmem:[%s13586_s22 + $0xc0] sm:$0xff]  ;;  %v1412_v8 = vld [vmem:[%s13586_s22 + $0x188] sm:$0xff] }
 0x30e   :  { %1749 = vrot.lane.b32.xlu0 %v11958_v28, %s11501_s21  ;;  %1834 = vrot.lane.b32.xlu1 %v11958_v28, %s11502_s23  ;;  %v1417_v10 = vld [vmem:[%s13586_s22 + $0x1b0] sm:$0xff] }
 0x30f   :  { %10018 = vmatpush1.bf16.msra.mxu0 %v10017_v14  ;;  %v10037_v14 = vpack.c.bf16 %v1430_v12, %v1425_v11  ;;  %v1422_v11 = vld [vmem:[%s13586_s22 + $0x1d8] sm:$0xff]  ;;  %v1437_v16 = vld [vmem:[%s13586_s22 + $0x250] sm:$0xff] }
 0x310   :  { %10020 = vmatprep.subr.bf16.mxu0 %v10019_v24  ;;  %9994 = vmatpush1.bf16.msra.mxu1 %v9993_v32  ;;  %v10039_v24 = vpack.c.bf16 %v1441_v22, %v1436_v20  ;;  %v10059_v12 = vpack.c.bf16 %v1422_v11, %v1417_v10 }
 0x311   :  { %9996 = vmatprep.subr.bf16.mxu1 %v9995_v42 }
 0x312   :  { %1917 = vrot.lane.b32.xlu0 %v1656_v27, %s11503_s12  ;;  %1919 = vrot.lane.b32.xlu1 %v11958_v28, %s11503_s12 }
 0x313   :  { %10022 = vmatpush1.bf16.msra.mxu0 %v10021_v25  ;;  %v1440_v25 = vld [vmem:[%s13586_s22 + $0x268] sm:$0xff] }
 0x314   :  { %10024 = vmatprep.subr.bf16.mxu0 %v10023_v36  ;;  %9998 = vmatpush1.bf16.msra.mxu1 %v9997_v49  ;;  %v10041_v26 = vpack.c.bf16 %v1440_v25, %v1435_v23 }
 0x315   :  { %10000 = vmatprep.subr.bf16.mxu1 %v9999_v58 }
 0x316   :  { %2002 = vrot.lane.b32.xlu0 %v1656_v27, %s11504_s0  ;;  %2004 = vrot.lane.b32.xlu1 %v11958_v28, %s11504_s0 }
 0x317   :  { %10026 = vmatpush1.bf16.msra.mxu0 %v10025_v37 }
 0x318   :  { %10028 = vmatprep.subr.bf16.mxu0 %v10027_v50  ;;  %10002 = vmatpush1.bf16.msra.mxu1 %v10001_v59 }
 0x319   :  { %10004 = vmatprep.subr.bf16.mxu1 %v10003_v5  ;;  %v1402_v5 = vld [vmem:[%s13586_s22 + $0x138] sm:$0xff] }
 0x31a   :  { %v10053_v6 = vpack.c.bf16 %v1402_v5, %v1397_v4 }
 0x31b   :  { %10030 = vmatpush1.bf16.msra.mxu0 %v10029_v54  ;;  %v1367_v54 = vld [vmem:[%s13586_s22 + $0x20] sm:$0xff] }
 0x31c   :  { %10032 = vmatprep.subr.bf16.mxu0 %v10031_v63  ;;  %10006 = vmatpush1.bf16.msra.mxu1 %v10005_v9  ;;  %v10044_v58 = vpack.c.bf16 %v1372_v55, %v1367_v54  ;;  %v10047_v63 = vpack.c.bf16 %v1382_v62, %v1377_v61  ;;  %v10056_v9 = vpack.c.bf16 %v1412_v8, %v1407_v7 }
 0x31d   :  { %10008 = vmatprep.subr.bf16.mxu1 %v10007_v17  ;;  %v1442_v17 = vld [vmem:[%s13586_s22 + $0x278] sm:$0xff] }
 0x31e   :  { %v10065_v18 = vpack.c.bf16 %v1442_v17, %v1437_v16 }
 0x31f   :  { %10034 = vmatpush1.bf16.msra.mxu0 %v10033_v2  ;;  %v1392_v2 = vld [vmem:[%s13586_s22 + $0xe8] sm:$0xff] }
 0x320   :  { %10036 = vmatprep.subr.bf16.mxu0 %v10035_v13  ;;  %10010 = vmatpush1.bf16.msra.mxu1 %v10009_v21  ;;  %v10050_v3 = vpack.c.bf16 %v1392_v2, %v1387_v1  ;;  %v1427_v13 = vld [vmem:[%s13586_s22 + $0x200] sm:$0xff] }
 0x321   :  { %10043 = vmatprep.subr.bf16.mxu1 %v11500_v41 }
 0x323   :  { %10038 = vmatpush1.bf16.msra.mxu0 %v10037_v14  ;;  %v1432_v14 = vld [vmem:[%s13586_s22 + $0x228] sm:$0xff] }
 0x324   :  { %10040 = vmatprep.subr.bf16.mxu0 %v10039_v24  ;;  %v10062_v15 = vpack.c.bf16 %v1432_v14, %v1427_v13 }
 0x327   :  { %10042 = vmatpush1.bf16.msra.mxu0 %v10041_v26 }
 0x363   :  { %v1748_v2 = vpop.permute.xlu0 %1747 }
 0x364   :  { %v1833_v8 = vpop.permute.xlu1 %1832 }
 0x380   :  { %v1750_v7 = vpop.permute.xlu0 %1749 }
 0x3b9   :  { %v1118_v29 = vpop.f32.mrb[4].mxu0  ;;  %v672_v30 = vpop.f32.mrb[4].mxu1 }
 0x3ba   :  { %v8878_v31 = vpop.f32.mrb[5].mxu0  ;;  %v8840_v32 = vpop.f32.mrb[5].mxu1 }
 0x3bd   :  { %v1191_v33 = vpop.f32.mrb[6].mxu0  ;;  %v746_v34 = vpop.f32.mrb[6].mxu1 }
 0x3be   :  { %v1195_v35 = vmul.f32 %v1191_v33, %v1118_v29  ;;  %v8883_v36 = vpop.f32.mrb[7].mxu0  ;;  %v750_v37 = vmul.f32 %v746_v34, %v672_v30  ;;  %v8845_v38 = vpop.f32.mrb[7].mxu1 }
 0x3c5   :  { %v897_v39 = vpop.f32.mrb[10].mxu1 }
 0x3c6   :  { %v8859_v40 = vpop.f32.mrb[11].mxu1 }
 0x3c9   :  { %v970_v42 = vpop.f32.mrb[12].mxu1 }
 0x3ca   :  { %v974_v45 = vmul.f32 %v970_v42, %v897_v39  ;;  %v8864_v47 = vpop.f32.mrb[13].mxu1 }
 0x3cc   :  { %v10783_v48 = vadd.f32 %v974_v45, %v750_v37 }
 0x3ce   :  { %v10784_v49 = vadd.f32 %v10783_v48, %v1195_v35 }
 0x3d5   :  { %v1263_v50 = vpop.f32.mrb[8].mxu1 }
 0x3d6   :  { %v10785_v51 = vadd.f32 %v10784_v49, %v1263_v50  ;;  %v8890_v52 = vpop.f32.mrb[9].mxu1 }
 0x3d8   :  { %v1268_v53 = vmul.f32 0.33333334, %v10785_v51 }
 0x3da   :  { %1269 = vst [vmem:[%s11666_s25] sm:$0xff] %v1268_v53  ;;  %s13587_s25 = sld [smem:[#allocation35_spill]] }
 0x3dd   :  { %v1359_v57 = vpop.f32.mrb[8].mxu0 }
 0x3de   :  { %v1360_v59 = vadd.f32 %v8043_v56, %v1359_v57  ;;  %v8925_v60 = vpop.f32.mrb[9].mxu0 }
 0x3e0   :  { %1508 = vmatmul.mubr.f32.vlgmr.msra.gmra.mrb[14].mxu1 %v1360_v59  ;;  %1579 = vmatmul.mubr.f32.vlgmr.msra.gmra.mrb[10].mxu0 %v1360_v59  ;;  %v2090_v19 = vld [vmem:[%s13587_s25 + $0x8] sm:$0xff]  ;;  %v2095_v20 = vld [vmem:[%s13587_s25 + $0x30] sm:$0xff]  ;;  %v2089_v21 = vld [vmem:[%s13587_s25] sm:$0xff] }
 0x3e1   :  { %10045 = vmatpush3.bf16.msra.mxu1 %v10044_v58  ;;  %8958 = vmatprep.mubr.msk.f32.mxu1 %vm11498_vm0, %v11497_v0  ;;  %v10067_v22 = vpack.c.bf16 %v2095_v20, %v2090_v19  ;;  %v2094_v23 = vld [vmem:[%s13587_s25 + $0x28] sm:$0xff]  ;;  %v2100_v25 = vld [vmem:[%s13587_s25 + $0x58] sm:$0xff]  ;;  %v2105_v26 = vld [vmem:[%s13587_s25 + $0x80] sm:$0xff] }
 0x3e2   :  { %10046 = vmatprep.subr.bf16.mxu1 %v11500_v41  ;;  %8963 = vmatprep.mubr.msk.f32.mxu0 %vm676_vm11, %v1656_v27  ;;  %v10069_v24 = vpack.c.bf16 %v2094_v23, %v2089_v21  ;;  %v2104_v27 = vld [vmem:[%s13587_s25 + $0x78] sm:$0xff]  ;;  %v10071_v29 = vpack.c.bf16 %v2105_v26, %v2100_v25  ;;  %v2110_v31 = vld [vmem:[%s13587_s25 + $0xa8] sm:$0xff]  ;;  %v2115_v32 = vld [vmem:[%s13587_s25 + $0xd0] sm:$0xff] }
 0x3e3   :  { %v10075_v33 = vpack.c.bf16 %v2115_v32, %v2110_v31  ;;  %v2109_v34 = vld [vmem:[%s13587_s25 + $0xa0] sm:$0xff]  ;;  %v2114_v35 = vld [vmem:[%s13587_s25 + $0xc8] sm:$0xff]  ;;  %v2120_v37 = vld [vmem:[%s13587_s25 + $0xf8] sm:$0xff] }
 0x3e4   :  { %v10077_v36 = vpack.c.bf16 %v2114_v35, %v2109_v34  ;;  %v2125_v38 = vld [vmem:[%s13587_s25 + $0x120] sm:$0xff]  ;;  %v2119_v39 = vld [vmem:[%s13587_s25 + $0xf0] sm:$0xff]  ;;  %v2124_v42 = vld [vmem:[%s13587_s25 + $0x118] sm:$0xff] }
 0x3e5   :  { %10048 = vmatpush3.bf16.msra.mxu1 %v10047_v63  ;;  %v10079_v40 = vpack.c.bf16 %v2125_v38, %v2120_v37  ;;  %v10081_v45 = vpack.c.bf16 %v2124_v42, %v2119_v39  ;;  %v2130_v47 = vld [vmem:[%s13587_s25 + $0x148] sm:$0xff]  ;;  %v2135_v48 = vld [vmem:[%s13587_s25 + $0x170] sm:$0xff]  ;;  %v2129_v49 = vld [vmem:[%s13587_s25 + $0x140] sm:$0xff] }
 0x3e6   :  { %10049 = vmatprep.subr.bf16.mxu1 %v11500_v41  ;;  %v10083_v50 = vpack.c.bf16 %v2135_v48, %v2130_v47  ;;  %v2134_v51 = vld [vmem:[%s13587_s25 + $0x168] sm:$0xff]  ;;  %v2140_v53 = vld [vmem:[%s13587_s25 + $0x198] sm:$0xff]  ;;  %v2145_v54 = vld [vmem:[%s13587_s25 + $0x1c0] sm:$0xff] }
 0x3e7   :  { %v10085_v52 = vpack.c.bf16 %v2134_v51, %v2129_v49  ;;  %v2139_v55 = vld [vmem:[%s13587_s25 + $0x190] sm:$0xff]  ;;  %v10087_v56 = vpack.c.bf16 %v2145_v54, %v2140_v53  ;;  %v2144_v57 = vld [vmem:[%s13587_s25 + $0x1b8] sm:$0xff]  ;;  %v2149_v61 = vld [vmem:[%s13587_s25 + $0x1e0] sm:$0xff] }
 0x3e8   :  { %v10089_v58 = vpack.c.bf16 %v2144_v57, %v2139_v55  ;;  %v2155_v60 = vld [vmem:[%s13587_s25 + $0x210] sm:$0xff]  ;;  %v2154_v63 = vld [vmem:[%s13587_s25 + $0x208] sm:$0xff]  ;;  %v2097_v13 = vld [vmem:[%s13587_s25 + $0x40] sm:$0xff] }
 0x3e9   :  { %10051 = vmatpush3.bf16.msra.mxu1 %v10050_v3  ;;  %v10093_v1 = vpack.c.bf16 %v2154_v63, %v2149_v61  ;;  %v2091_v14 = vld [vmem:[%s13587_s25 + $0x10] sm:$0xff]  ;;  %v2102_v16 = vld [vmem:[%s13587_s25 + $0x68] sm:$0xff]  ;;  %v2112_v26 = vld [vmem:[%s13587_s25 + $0xb8] sm:$0xff] }
 0x3ea   :  { %10052 = vmatprep.subr.bf16.mxu1 %v11500_v41  ;;  %v2107_v17 = vld [vmem:[%s13587_s25 + $0x90] sm:$0xff]  ;;  %v2106_v25 = vld [vmem:[%s13587_s25 + $0x88] sm:$0xff]  ;;  %v2116_v31 = vld [vmem:[%s13587_s25 + $0xd8] sm:$0xff] }
 0x3eb   :  { %v10103_v23 = vpack.c.bf16 %v2107_v17, %v2102_v16  ;;  %v2122_v32 = vld [vmem:[%s13587_s25 + $0x108] sm:$0xff]  ;;  %v2132_v38 = vld [vmem:[%s13587_s25 + $0x158] sm:$0xff]  ;;  %v2137_v39 = vld [vmem:[%s13587_s25 + $0x180] sm:$0xff] }
 0x3ec   :  { %v2126_v37 = vld [vmem:[%s13587_s25 + $0x128] sm:$0xff]  ;;  %v10115_v42 = vpack.c.bf16 %v2137_v39, %v2132_v38  ;;  %v2136_v47 = vld [vmem:[%s13587_s25 + $0x178] sm:$0xff]  ;;  %v2147_v49 = vld [vmem:[%s13587_s25 + $0x1d0] sm:$0xff] }
 0x3ed   :  { %10054 = vmatpush3.bf16.msra.mxu1 %v10053_v6  ;;  %v2142_v48 = vld [vmem:[%s13587_s25 + $0x1a8] sm:$0xff]  ;;  %v2152_v54 = vld [vmem:[%s13587_s25 + $0x1f8] sm:$0xff]  ;;  %v2157_v55 = vld [vmem:[%s13587_s25 + $0x220] sm:$0xff] }
 0x3ee   :  { %10055 = vmatprep.subr.bf16.mxu1 %v11500_v41  ;;  %v10119_v51 = vpack.c.bf16 %v2147_v49, %v2142_v48  ;;  %v2146_v53 = vld [vmem:[%s13587_s25 + $0x1c8] sm:$0xff]  ;;  %v10123_v57 = vpack.c.bf16 %v2157_v55, %v2152_v54  ;;  %v2160_v61 = vld [vmem:[%s13587_s25 + $0x238] sm:$0xff]  ;;  %v2153_v38 = vld [vmem:[%s13587_s25 + $0x200] sm:$0xff] }
 0x3ef   :  { %v8046_v16 = vld [vmem:[#allocation10] ss:$0 sm:$0xff]  ;;  %v2158_v39 = vld [vmem:[%s13587_s25 + $0x228] sm:$0xff]  ;;  %v2941_v49 = vld [vmem:[%s13588_s6 + $0x30] sm:$0xff] }
 0x3f0   :  { %v2936_v48 = vld [vmem:[%s13588_s6 + $0x8] sm:$0xff]  ;;  %v2946_v54 = vld [vmem:[%s13588_s6 + $0x58] sm:$0xff]  ;;  %v2951_v55 = vld [vmem:[%s13588_s6 + $0x80] sm:$0xff] }
 0x3f1   :  { %10057 = vmatpush3.bf16.msra.mxu1 %v10056_v9  ;;  %v1918_v9 = vpop.permute.xlu0 %1917 }
 0x3f2   :  { %10058 = vmatprep.subr.bf16.mxu1 %v11500_v41 }
 0x3f5   :  { %10060 = vmatpush3.bf16.msra.mxu1 %v10059_v12  ;;  %v2003_v11 = vpop.permute.xlu0 %2002  ;;  %v2092_v12 = vld [vmem:[%s13587_s25 + $0x18] sm:$0xff] }
 0x3f6   :  { %10061 = vmatprep.subr.bf16.mxu1 %v11500_v41 }
 0x3f9   :  { %10063 = vmatpush3.bf16.msra.mxu1 %v10062_v15  ;;  %v2096_v15 = vld [vmem:[%s13587_s25 + $0x38] sm:$0xff] }
 0x3fa   :  { %10064 = vmatprep.subr.bf16.mxu1 %v11500_v41  ;;  %v2099_v41 = vld [vmem:[%s13587_s25 + $0x50] sm:$0xff]  ;;  %v10101_v21 = vpack.c.bf16 %v2096_v15, %v2091_v14 }
 0x3fb   :  { %v10073_v30 = vpack.c.bf16 %v2104_v27, %v2099_v41  ;;  %v2117_v41 = vld [vmem:[%s13587_s25 + $0xe0] sm:$0xff]  ;;  %v12080_v14 = vld [vmem:[#allocation12 + $0x10] sm:$0xff]  ;;  %v12082_v15 = vld [vmem:[#allocation12 + $0x18] sm:$0xff] }
 0x3fd   :  { %10066 = vmatpush3.bf16.msra.mxu1 %v10065_v18  ;;  %v10099_v18 = vpack.c.bf16 %v2097_v13, %v2092_v12  ;;  %v12072_v12 = vld [vmem:[#allocation12] sm:$0xff]  ;;  %v12074_v13 = vld [vmem:[#allocation12 + $0x8] sm:$0xff] }
 0x3fe   :  { %10068 = vmatprep.subr.bf16.mxu1 %v10067_v22  ;;  %2511 = vrot.lane.b32.xlu0 %v12072_v12, %s11502_s23 }
 0x3ff   :  { %2513 = vrot.lane.b32.xlu1 %v12074_v13, %s11502_s23 }
 0x400   :  { %8959 = vmatmul.mubr.f32.vlgmr.msra.gmra.mrb[16].mxu1 %v1360_v59  ;;  %v2150_v59 = vld [vmem:[%s13587_s25 + $0x1e8] sm:$0xff] }
 0x401   :  { %2233 = vmatprep.mubr.f32.mxu1 %v11497_v0  ;;  %10070 = vmatpush1.bf16.msra.mxu1 %v10069_v24  ;;  %v10091_v62 = vpack.c.bf16 %v2155_v60, %v2150_v59  ;;  %v2101_v24 = vld [vmem:[%s13587_s25 + $0x60] sm:$0xff]  ;;  %v2156_v59 = vld [vmem:[%s13587_s25 + $0x218] sm:$0xff] }
 0x402   :  { %10072 = vmatprep.subr.bf16.mxu1 %v10071_v29  ;;  %v10105_v27 = vpack.c.bf16 %v2106_v25, %v2101_v24  ;;  %v10107_v29 = vpack.c.bf16 %v2117_v41, %v2112_v26  ;;  %2515 = vrot.lane.b32.xlu0 %v12080_v14, %s11502_s23  ;;  %v2113_v25 = vld [vmem:[%s13587_s25 + $0xc0] sm:$0xff]  ;;  %v2118_v26 = vld [vmem:[%s13587_s25 + $0xe8] sm:$0xff] }
 0x403   :  { %2517 = vrot.lane.b32.xlu1 %v12082_v15, %s11502_s23 }
 0x405   :  { %10074 = vmatpush1.bf16.msra.mxu1 %v10073_v30  ;;  %v2111_v30 = vld [vmem:[%s13587_s25 + $0xb0] sm:$0xff] }
 0x406   :  { %10076 = vmatprep.subr.bf16.mxu1 %v10075_v33  ;;  %v2127_v33 = vld [vmem:[%s13587_s25 + $0x130] sm:$0xff]  ;;  %v10109_v34 = vpack.c.bf16 %v2116_v31, %v2111_v30  ;;  %2616 = vrot.lane.b32.xlu0 %v12072_v12, %s11504_s0  ;;  %v2128_v30 = vld [vmem:[%s13587_s25 + $0x138] sm:$0xff] }
 0x407   :  { %v10111_v35 = vpack.c.bf16 %v2127_v33, %v2122_v32  ;;  %2618 = vrot.lane.b32.xlu1 %v12074_v13, %s11504_s0  ;;  %v2133_v32 = vld [vmem:[%s13587_s25 + $0x160] sm:$0xff]  ;;  %v2138_v33 = vld [vmem:[%s13587_s25 + $0x188] sm:$0xff] }
 0x409   :  { %10078 = vmatpush1.bf16.msra.mxu1 %v10077_v36  ;;  %v2121_v36 = vld [vmem:[%s13587_s25 + $0x100] sm:$0xff] }
 0x40a   :  { %10080 = vmatprep.subr.bf16.mxu1 %v10079_v40  ;;  %v10113_v40 = vpack.c.bf16 %v2126_v37, %v2121_v36  ;;  %2620 = vrot.lane.b32.xlu0 %v12080_v14, %s11504_s0  ;;  %v2148_v36 = vld [vmem:[%s13587_s25 + $0x1d8] sm:$0xff] }
 0x40b   :  { %2622 = vrot.lane.b32.xlu1 %v12082_v15, %s11504_s0 }
 0x40d   :  { %10082 = vmatpush1.bf16.msra.mxu1 %v10081_v45  ;;  %v2131_v45 = vld [vmem:[%s13587_s25 + $0x150] sm:$0xff] }
 0x40e   :  { %10084 = vmatprep.subr.bf16.mxu1 %v10083_v50  ;;  %v10117_v50 = vpack.c.bf16 %v2136_v47, %v2131_v45  ;;  %2721 = vrot.lane.b32.xlu0 %v12072_v12, %s11505_s26  ;;  %v2168_v45 = vld [vmem:[%s13587_s25 + $0x278] sm:$0xff] }
 0x40f   :  { %2723 = vrot.lane.b32.xlu1 %v12074_v13, %s11505_s26 }
 0x411   :  { %10086 = vmatpush1.bf16.msra.mxu1 %v10085_v52  ;;  %v2141_v52 = vld [vmem:[%s13587_s25 + $0x1a0] sm:$0xff] }
 0x412   :  { %10088 = vmatprep.subr.bf16.mxu1 %v10087_v56  ;;  %v10121_v56 = vpack.c.bf16 %v2146_v53, %v2141_v52  ;;  %2725 = vrot.lane.b32.xlu0 %v12080_v14, %s11505_s26  ;;  %v2940_v52 = vld [vmem:[%s13588_s6 + $0x28] sm:$0xff] }
 0x413   :  { %2727 = vrot.lane.b32.xlu1 %v12082_v15, %s11505_s26 }
 0x415   :  { %10090 = vmatpush1.bf16.msra.mxu1 %v10089_v58  ;;  %v2151_v58 = vld [vmem:[%s13587_s25 + $0x1f0] sm:$0xff] }
 0x416   :  { %10092 = vmatprep.subr.bf16.mxu1 %v10091_v62  ;;  %v10125_v60 = vpack.c.bf16 %v2156_v59, %v2151_v58  ;;  %v2165_v62 = vld [vmem:[%s13587_s25 + $0x260] sm:$0xff]  ;;  %2826 = vrot.lane.b32.xlu0 %v12072_v12, %s11506_s28  ;;  %v10187_v58 = vpack.c.bf16 %v2951_v55, %v2946_v54 }
 0x417   :  { %v10095_v63 = vpack.c.bf16 %v2165_v62, %v2160_v61  ;;  %2828 = vrot.lane.b32.xlu1 %v12074_v13, %s11506_s28  ;;  %v2961_v61 = vld [vmem:[%s13588_s6 + $0xd0] sm:$0xff]  ;;  %v2943_v54 = vld [vmem:[%s13588_s6 + $0x40] sm:$0xff] }
 0x419   :  { %10094 = vmatpush1.bf16.msra.mxu1 %v10093_v1  ;;  %v2159_v1 = vld [vmem:[%s13587_s25 + $0x230] sm:$0xff] }
 0x41a   :  { %10096 = vmatprep.subr.bf16.mxu1 %v10095_v63  ;;  %2830 = vrot.lane.b32.xlu0 %v12080_v14, %s11506_s28  ;;  %v2955_v63 = vld [vmem:[%s13588_s6 + $0xa0] sm:$0xff] }
 0x41b   :  { %2832 = vrot.lane.b32.xlu1 %v12082_v15, %s11506_s28 }
 0x4b3   :  { %v1509_v3 = vpop.f32.mrb[14].mxu1  ;;  %v1580_v4 = vpop.f32.mrb[10].mxu0 }
 0x4b4   :  { %v1511_v5 = vpop.f32.mrb[15].mxu1  ;;  %v1582_v6 = vpop.f32.mrb[11].mxu0  ;;  %8961 = vmatprep.subr.mxu0 %v1509_v3 }
 0x4b5   :  { %8962 = vmatpush3.msra.mxu0 %v1509_v3  ;;  %v2162_v3 = vld [vmem:[%s13587_s25 + $0x248] sm:$0xff] }
 0x4b6   :  { %8964 = vmatmul.mubr.msk.f32.vlgmr.msra.gmra.mrb[12].mxu0 %vm676_vm11, %v11958_v28  ;;  %8966 = vmatprep.subr.mxu0 %v1511_v5  ;;  %v1835_v28 = vpop.permute.xlu1 %1834 }
 0x4b7   :  { %8967 = vmatpush3.msra.mxu0 %v1511_v5  ;;  %8968 = vmatprep.mubr.msk.f32.mxu0 %vm676_vm11, %v1748_v2  ;;  %v2164_v2 = vld [vmem:[%s13587_s25 + $0x258] sm:$0xff]  ;;  %v2167_v5 = vld [vmem:[%s13587_s25 + $0x270] sm:$0xff] }
 0x4b8   :  { %8971 = vmatprep.subr.mxu0 %v1580_v4 }
 0x4ba   :  { %v1920_v10 = vpop.permute.xlu1 %1919 }
 0x4be   :  { %8969 = vmatmul.mubr.msk.f32.vlgmr.msra.gmra.mrb[12].mxu0 %vm676_vm11, %v1750_v7  ;;  %v2005_v20 = vpop.permute.xlu1 %2004  ;;  %v2166_v7 = vld [vmem:[%s13587_s25 + $0x268] sm:$0xff] }
 0x4bf   :  { %8972 = vmatpush3.msra.mxu0 %v1580_v4  ;;  %8973 = vmatprep.mubr.msk.f32.mxu0 %vm676_vm11, %v1833_v8  ;;  %v10097_v4 = vpack.c.bf16 %v2164_v2, %v2159_v1  ;;  %v10127_v8 = vpack.c.bf16 %v2167_v5, %v2162_v3  ;;  %v2960_v1 = vld [vmem:[%s13588_s6 + $0xc8] sm:$0xff]  ;;  %v2966_v3 = vld [vmem:[%s13588_s6 + $0xf8] sm:$0xff] }
 0x4c0   :  { %8976 = vmatprep.subr.mxu0 %v1582_v6  ;;  %v10193_v2 = vpack.c.bf16 %v2960_v1, %v2955_v63  ;;  %v2948_v1 = vld [vmem:[%s13588_s6 + $0x68] sm:$0xff] }
 0x4c1   :  { %10098 = vmatpush1.bf16.msra.mxu1 %v10097_v4  ;;  %v2971_v4 = vld [vmem:[%s13588_s6 + $0x120] sm:$0xff] }
 0x4c2   :  { %v10195_v5 = vpack.c.bf16 %v2971_v4, %v2966_v3 }
 0x4c6   :  { %8974 = vmatmul.mubr.msk.f32.vlgmr.msra.gmra.mrb[12].mxu0 %vm676_vm11, %v1835_v28 }
 0x4c7   :  { %8977 = vmatpush3.msra.mxu0 %v1582_v6  ;;  %8978 = vmatprep.mubr.msk.f32.mxu0 %vm676_vm11, %v1918_v9  ;;  %v2161_v6 = vld [vmem:[%s13587_s25 + $0x240] sm:$0xff] }
 0x4c8   :  { %v10129_v28 = vpack.c.bf16 %v2166_v7, %v2161_v6  ;;  %v2093_v9 = vld [vmem:[%s13587_s25 + $0x20] sm:$0xff]  ;;  %v2965_v6 = vld [vmem:[%s13588_s6 + $0xf0] sm:$0xff]  ;;  %v2970_v7 = vld [vmem:[%s13588_s6 + $0x118] sm:$0xff] }
 0x4ce   :  { %8979 = vmatmul.mubr.msk.f32.vlgmr.msra.gmra.mrb[12].mxu0 %vm676_vm11, %v1920_v10  ;;  %v2098_v10 = vld [vmem:[%s13587_s25 + $0x48] sm:$0xff] }
 0x4cf   :  { %8983 = vmatprep.mubr.msk.f32.mxu0 %vm676_vm11, %v2003_v11  ;;  %v10131_v11 = vpack.c.bf16 %v2098_v10, %v2093_v9  ;;  %v10197_v9 = vpack.c.bf16 %v2970_v7, %v2965_v6  ;;  %v2947_v6 = vld [vmem:[%s13588_s6 + $0x60] sm:$0xff]  ;;  %v2952_v7 = vld [vmem:[%s13588_s6 + $0x88] sm:$0xff] }
 0x4d1   :  { %10132 = vmatprep.subr.bf16.mxu1 %v10131_v11 }
 0x4d3   :  { %v1651_v19 = vpop.f32.mrb[16].mxu1 }
 0x4d4   :  { %v8960_v22 = vpop.f32.mrb[17].mxu1  ;;  %8981 = vmatprep.subr.mxu0 %v1651_v19 }
 0x4d5   :  { %8982 = vmatpush3.msra.mxu0 %v1651_v19  ;;  %v2103_v19 = vld [vmem:[%s13587_s25 + $0x70] sm:$0xff] }
 0x4d6   :  { %8984 = vmatmul.mubr.msk.f32.vlgmr.msra.gmra.mrb[12].mxu0 %vm676_vm11, %v2005_v20  ;;  %10100 = vmatprep.subr.bf16.mxu0 %v10099_v18  ;;  %v2108_v20 = vld [vmem:[%s13587_s25 + $0x98] sm:$0xff] }
 0x4d7   :  { %10102 = vmatpush1.bf16.msra.mxu0 %v10101_v21  ;;  %2310 = vmatprep.mubr.f32.mxu0 %v11497_v0  ;;  %v10135_v24 = vpack.c.bf16 %v2108_v20, %v2103_v19  ;;  %v2985_v20 = vld [vmem:[%s13588_s6 + $0x190] sm:$0xff] }
 0x4d8   :  { %10104 = vmatprep.subr.bf16.mxu0 %v10103_v23 }
 0x4db   :  { %10106 = vmatpush1.bf16.msra.mxu0 %v10105_v27  ;;  %v10139_v27 = vpack.c.bf16 %v2118_v26, %v2113_v25  ;;  %v2995_v26 = vld [vmem:[%s13588_s6 + $0x1e0] sm:$0xff] }
 0x4dc   :  { %10108 = vmatprep.subr.bf16.mxu0 %v10107_v29  ;;  %v2123_v29 = vld [vmem:[%s13587_s25 + $0x110] sm:$0xff] }
 0x4dd   :  { %v10143_v31 = vpack.c.bf16 %v2128_v30, %v2123_v29  ;;  %v2512_v29 = vpop.permute.xlu0 %2511 }
 0x4df   :  { %10110 = vmatpush1.bf16.msra.mxu0 %v10109_v34  ;;  %v10147_v34 = vpack.c.bf16 %v2138_v33, %v2133_v32 }
 0x4e0   :  { %10112 = vmatprep.subr.bf16.mxu0 %v10111_v35  ;;  %v2143_v35 = vld [vmem:[%s13587_s25 + $0x1b0] sm:$0xff] }
 0x4e1   :  { %v10151_v37 = vpack.c.bf16 %v2148_v36, %v2143_v35  ;;  %v2516_v35 = vpop.permute.xlu0 %2515 }
 0x4e3   :  { %10114 = vmatpush1.bf16.msra.mxu0 %v10113_v40  ;;  %v10155_v40 = vpack.c.bf16 %v2158_v39, %v2153_v38 }
 0x4e4   :  { %10116 = vmatprep.subr.bf16.mxu0 %v10115_v42  ;;  %v2163_v42 = vld [vmem:[%s13587_s25 + $0x250] sm:$0xff] }
 0x4e5   :  { %v10159_v47 = vpack.c.bf16 %v2168_v45, %v2163_v42 }
 0x4e7   :  { %10118 = vmatpush1.bf16.msra.mxu0 %v10117_v50  ;;  %v2935_v50 = vld [vmem:[%s13588_s6] sm:$0xff] }
 0x4e8   :  { %10120 = vmatprep.subr.bf16.mxu0 %v10119_v51  ;;  %v10183_v51 = vpack.c.bf16 %v2941_v49, %v2936_v48  ;;  %v10185_v53 = vpack.c.bf16 %v2940_v52, %v2935_v50  ;;  %v2617_v49 = vpop.permute.xlu0 %2616 }
 0x4eb   :  { %10122 = vmatpush1.bf16.msra.mxu0 %v10121_v56  ;;  %v2945_v56 = vld [vmem:[%s13588_s6 + $0x50] sm:$0xff] }
 0x4ec   :  { %10124 = vmatprep.subr.bf16.mxu0 %v10123_v57  ;;  %v2950_v57 = vld [vmem:[%s13588_s6 + $0x78] sm:$0xff] }
 0x4ed   :  { %v10189_v59 = vpack.c.bf16 %v2950_v57, %v2945_v56 }
 0x4ef   :  { %10126 = vmatpush1.bf16.msra.mxu0 %v10125_v60  ;;  %v2956_v60 = vld [vmem:[%s13588_s6 + $0xa8] sm:$0xff] }
 0x4f0   :  { %10128 = vmatprep.subr.bf16.mxu0 %v10127_v8  ;;  %v10191_v62 = vpack.c.bf16 %v2961_v61, %v2956_v60  ;;  %v2976_v8 = vld [vmem:[%s13588_s6 + $0x148] sm:$0xff]  ;;  %v2937_v61 = vld [vmem:[%s13588_s6 + $0x10] sm:$0xff] }
 0x4f3   :  { %10130 = vmatpush1.bf16.msra.mxu0 %v10129_v28  ;;  %v2981_v28 = vld [vmem:[%s13588_s6 + $0x170] sm:$0xff] }
 0x4f4   :  { %v10199_v10 = vpack.c.bf16 %v2981_v28, %v2976_v8  ;;  %v2958_v8 = vld [vmem:[%s13588_s6 + $0xb8] sm:$0xff]  ;;  %v2963_v28 = vld [vmem:[%s13588_s6 + $0xe0] sm:$0xff] }
 0x5a9   :  { %v8985_v17 = vpop.f32.mrb[12].mxu0 }
 0x5aa   :  { %v2076_v18 = vpop.f32.mrb[13].mxu0  ;;  %v10786_v22 = vadd.f32 %v8985_v17, %v8046_v16  ;;  %v2991_v17 = vld [vmem:[%s13588_s6 + $0x1c0] sm:$0xff] }
 0x5ab   :  { %v10787_v21 = vadd.f32 %v8046_v16, %v2076_v18  ;;  %v2986_v16 = vld [vmem:[%s13588_s6 + $0x198] sm:$0xff] }
 0x5ac   :  { %v2088_v41 = vmax.f32 %v10786_v22, 0.0  ;;  %v10203_v19 = vpack.c.bf16 %v2991_v17, %v2986_v16  ;;  %v2996_v22 = vld [vmem:[%s13588_s6 + $0x1e8] sm:$0xff]  ;;  %v2962_v16 = vld [vmem:[%s13588_s6 + $0xd8] sm:$0xff] }
 0x5ad   :  { %v2087_v23 = vmax.f32 %v10787_v21, 0.0  ;;  %v2990_v21 = vld [vmem:[%s13588_s6 + $0x1b8] sm:$0xff]  ;;  %v2968_v17 = vld [vmem:[%s13588_s6 + $0x108] sm:$0xff] }
 0x5af   :  { %2234 = vmatmul.mubr.f32.vlgmr.msra.gmra.mrb[18].mxu1 %v2087_v23  ;;  %2311 = vmatmul.mubr.f32.vlgmr.msra.gmra.mrb[14].mxu0 %v2087_v23 }
 0x5b0   :  { %10134 = vmatpush3.bf16.msra.mxu1 %v10131_v11  ;;  %2239 = vmatprep.mubr.f32.mxu1 %v11497_v0  ;;  %v2975_v11 = vld [vmem:[%s13588_s6 + $0x140] sm:$0xff] }
 0x5b1   :  { %2316 = vmatprep.mubr.f32.mxu0 %v11497_v0  ;;  %10136 = vmatprep.subr.bf16.mxu1 %v10135_v24 }
 0x5b3   :  { %2240 = vmatmul.mubr.f32.gmra.mrb[20].mxu1 %v2088_v41  ;;  %2317 = vmatmul.mubr.f32.gmra.mrb[16].mxu0 %v2088_v41 }
 0x5b4   :  { %10138 = vmatpush3.bf16.msra.mxu1 %v10135_v24  ;;  %9018 = vmatprep.mubr.f32.mxu1 %v2087_v23  ;;  %v3001_v23 = vld [vmem:[%s13588_s6 + $0x210] sm:$0xff]  ;;  %v10205_v24 = vpack.c.bf16 %v2990_v21, %v2985_v20  ;;  %v2967_v21 = vld [vmem:[%s13588_s6 + $0x100] sm:$0xff] }
 0x5b5   :  { %10140 = vmatprep.subr.bf16.mxu1 %v10139_v27  ;;  %9025 = vmatprep.mubr.msk.f32.mxu0 %vm2403_vm12, %v12072_v12  ;;  %v2980_v12 = vld [vmem:[%s13588_s6 + $0x168] sm:$0xff]  ;;  %v10207_v25 = vpack.c.bf16 %v3001_v23, %v2996_v22  ;;  %v2978_v23 = vld [vmem:[%s13588_s6 + $0x158] sm:$0xff] }
 0x5b6   :  { %v10201_v18 = vpack.c.bf16 %v2980_v12, %v2975_v11  ;;  %v10223_v11 = vpack.c.bf16 %v2963_v28, %v2958_v8  ;;  %v2957_v12 = vld [vmem:[%s13588_s6 + $0xb0] sm:$0xff]  ;;  %v2972_v22 = vld [vmem:[%s13588_s6 + $0x128] sm:$0xff] }
 0x5b8   :  { %10142 = vmatpush3.bf16.msra.mxu1 %v10139_v27 }
 0x5b9   :  { %10144 = vmatprep.subr.bf16.mxu1 %v10143_v31 }
 0x5bc   :  { %10146 = vmatpush3.bf16.msra.mxu1 %v10143_v31 }
 0x5bd   :  { %10148 = vmatprep.subr.bf16.mxu1 %v10147_v34 }
 0x5c0   :  { %10150 = vmatpush3.bf16.msra.mxu1 %v10147_v34  ;;  %v2514_v34 = vpop.permute.xlu1 %2513 }
 0x5c1   :  { %10152 = vmatprep.subr.bf16.mxu1 %v10151_v37 }
 0x5c4   :  { %10154 = vmatpush3.bf16.msra.mxu1 %v10151_v37  ;;  %v2518_v48 = vpop.permute.xlu1 %2517 }
 0x5c5   :  { %10156 = vmatprep.subr.bf16.mxu1 %v10155_v40 }
 0x5c8   :  { %10158 = vmatpush3.bf16.msra.mxu1 %v10155_v40  ;;  %v2619_v50 = vpop.permute.xlu1 %2618 }
 0x5c9   :  { %10160 = vmatprep.subr.bf16.mxu1 %v10159_v47 }
 0x5cc   :  { %10162 = vmatpush3.bf16.msra.mxu1 %v10159_v47 }
 0x5cd   :  { %10184 = vmatprep.subr.bf16.mxu1 %v10183_v51  ;;  %v2621_v51 = vpop.permute.xlu0 %2620 }
 0x5cf   :  { %9019 = vmatmul.mubr.f32.vlgmr.msra.gmra.mrb[22].mxu1 %v2088_v41  ;;  %v3000_v41 = vld [vmem:[%s13588_s6 + $0x208] sm:$0xff] }
 0x5d0   :  { %3079 = vmatprep.mubr.f32.mxu1 %v11497_v0  ;;  %10186 = vmatpush1.bf16.msra.mxu1 %v10185_v53  ;;  %v10209_v27 = vpack.c.bf16 %v3000_v41, %v2995_v26  ;;  %v2938_v53 = vld [vmem:[%s13588_s6 + $0x18] sm:$0xff]  ;;  %v2977_v41 = vld [vmem:[%s13588_s6 + $0x150] sm:$0xff] }
 0x5d1   :  { %10188 = vmatprep.subr.bf16.mxu1 %v10187_v58 }
 0x5d4   :  { %10190 = vmatpush1.bf16.msra.mxu1 %v10189_v59  ;;  %v10215_v59 = vpack.c.bf16 %v2943_v54, %v2938_v53 }
 0x5d5   :  { %10192 = vmatprep.subr.bf16.mxu1 %v10191_v62  ;;  %v2942_v62 = vld [vmem:[%s13588_s6 + $0x38] sm:$0xff] }
 0x5d6   :  { %v10217_v3 = vpack.c.bf16 %v2942_v62, %v2937_v61  ;;  %v12226_v61 = vld [vmem:[#allocation15 + $0x30] sm:$0xff]  ;;  %v12232_v62 = vld [vmem:[#allocation15 + $0x40] sm:$0xff] }
 0x5d8   :  { %10194 = vmatpush1.bf16.msra.mxu1 %v10193_v2  ;;  %v2953_v2 = vld [vmem:[%s13588_s6 + $0x90] sm:$0xff] }
 0x5d9   :  { %10196 = vmatprep.subr.bf16.mxu1 %v10195_v5  ;;  %v10219_v5 = vpack.c.bf16 %v2953_v2, %v2948_v1  ;;  %v12240_v1 = vld [vmem:[#allocation15 + $0x60] sm:$0xff]  ;;  %v12242_v2 = vld [vmem:[#allocation15 + $0x70] sm:$0xff] }
 0x5dc   :  { %10198 = vmatpush1.bf16.msra.mxu1 %v10197_v9 }
 0x5dd   :  { %10200 = vmatprep.subr.bf16.mxu1 %v10199_v10  ;;  %v10221_v10 = vpack.c.bf16 %v2952_v7, %v2947_v6  ;;  %v2949_v6 = vld [vmem:[%s13588_s6 + $0x70] sm:$0xff]  ;;  %v2954_v7 = vld [vmem:[%s13588_s6 + $0x98] sm:$0xff] }
 0x5e0   :  { %10202 = vmatpush1.bf16.msra.mxu1 %v10201_v18  ;;  %v2973_v18 = vld [vmem:[%s13588_s6 + $0x130] sm:$0xff] }
 0x5e1   :  { %10204 = vmatprep.subr.bf16.mxu1 %v10203_v19  ;;  %v10225_v19 = vpack.c.bf16 %v2962_v16, %v2957_v12  ;;  %v10227_v20 = vpack.c.bf16 %v2973_v18, %v2968_v17  ;;  %v2959_v16 = vld [vmem:[%s13588_s6 + $0xc0] sm:$0xff]  ;;  %v2964_v17 = vld [vmem:[%s13588_s6 + $0xe8] sm:$0xff] }
 0x5e4   :  { %10206 = vmatpush1.bf16.msra.mxu1 %v10205_v24  ;;  %v2983_v24 = vld [vmem:[%s13588_s6 + $0x180] sm:$0xff] }
 0x5e5   :  { %10208 = vmatprep.subr.bf16.mxu1 %v10207_v25  ;;  %v10229_v25 = vpack.c.bf16 %v2972_v22, %v2967_v21  ;;  %v10231_v26 = vpack.c.bf16 %v2983_v24, %v2978_v23  ;;  %v2969_v21 = vld [vmem:[%s13588_s6 + $0x110] sm:$0xff]  ;;  %v2974_v22 = vld [vmem:[%s13588_s6 + $0x138] sm:$0xff] }
 0x5e8   :  { %10210 = vmatpush1.bf16.msra.mxu1 %v10209_v27  ;;  %v2982_v27 = vld [vmem:[%s13588_s6 + $0x178] sm:$0xff] }
 0x682   :  { %v2235_v30 = vpop.f32.mrb[18].mxu1  ;;  %v2312_v31 = vpop.f32.mrb[14].mxu0 }
 0x683   :  { %v2237_v32 = vpop.f32.mrb[19].mxu1  ;;  %v2314_v33 = vpop.f32.mrb[15].mxu0 }
 0x686   :  { %v2241_v36 = vpop.f32.mrb[20].mxu1  ;;  %v2318_v37 = vpop.f32.mrb[16].mxu0 }
 0x687   :  { %v10163_v38 = vpack.c.bf16 %v2241_v36, %v2235_v30  ;;  %v10171_v39 = vpack.c.bf16 %v2318_v37, %v2312_v31  ;;  %v2243_v40 = vpop.f32.mrb[21].mxu1  ;;  %v2320_v42 = vpop.f32.mrb[17].mxu0  ;;  %v2993_v30 = vld [vmem:[%s13588_s6 + $0x1d0] sm:$0xff]  ;;  %v10233_v31 = vpack.c.bf16 %v2982_v27, %v2977_v41  ;;  %v3003_v36 = vld [vmem:[%s13588_s6 + $0x220] sm:$0xff]  ;;  %v2984_v41 = vld [vmem:[%s13588_s6 + $0x188] sm:$0xff] }
 0x688   :  { %v10167_v45 = vpack.c.bf16 %v2243_v40, %v2237_v32  ;;  %v10175_v47 = vpack.c.bf16 %v2320_v42, %v2314_v33  ;;  %v2987_v33 = vld [vmem:[%s13588_s6 + $0x1a0] sm:$0xff]  ;;  %v3002_v40 = vld [vmem:[%s13588_s6 + $0x218] sm:$0xff] }
 0x689   :  { %10164 = vmatprep.subr.bf16.mxu0 %v10163_v38 }
 0x68a   :  { %10166 = vmatpush3.bf16.msra.mxu0 %v10163_v38 }
 0x68b   :  { %10168 = vmatprep.subr.bf16.mxu0 %v10167_v45 }
 0x68d   :  { %9026 = vmatmul.mubr.msk.f32.vlgmr.msra.gmra.mrb[18].mxu0 %vm2403_vm12, %v12074_v13  ;;  %v2623_v13 = vpop.permute.xlu1 %2622 }
 0x68e   :  { %10170 = vmatpush3.bf16.msra.mxu0 %v10167_v45  ;;  %9028 = vmatprep.mubr.msk.f32.mxu0 %vm2403_vm12, %v12080_v14  ;;  %v2722_v14 = vpop.permute.xlu0 %2721  ;;  %v3006_v45 = vld [vmem:[%s13588_s6 + $0x238] sm:$0xff] }
 0x68f   :  { %10172 = vmatprep.subr.bf16.mxu0 %v10171_v39 }
 0x691   :  { %9029 = vmatmul.mubr.msk.f32.gmra.mrb[20].mxu0 %vm2403_vm12, %v12082_v15  ;;  %v2724_v52 = vpop.permute.xlu1 %2723 }
 0x692   :  { %9035 = vmatprep.mubr.msk.f32.mxu0 %vm2403_vm12, %v2512_v29  ;;  %v2726_v15 = vpop.permute.xlu0 %2725  ;;  %v2988_v29 = vld [vmem:[%s13588_s6 + $0x1a8] sm:$0xff] }
 0x693   :  { %v10235_v32 = vpack.c.bf16 %v2993_v30, %v2988_v29  ;;  %v2989_v30 = vld [vmem:[%s13588_s6 + $0x1b0] sm:$0xff] }
 0x695   :  { %9036 = vmatmul.mubr.msk.f32.vlgmr.msra.gmra.mrb[18].mxu0 %vm2403_vm12, %v2514_v34  ;;  %v2728_v56 = vpop.permute.xlu1 %2727  ;;  %v2992_v34 = vld [vmem:[%s13588_s6 + $0x1c8] sm:$0xff] }
 0x696   :  { %10174 = vmatpush3.bf16.msra.mxu0 %v10171_v39  ;;  %9038 = vmatprep.mubr.msk.f32.mxu0 %vm2403_vm12, %v2516_v35  ;;  %v2827_v60 = vpop.permute.xlu0 %2826  ;;  %v2998_v35 = vld [vmem:[%s13588_s6 + $0x1f8] sm:$0xff]  ;;  %v10237_v37 = vpack.c.bf16 %v2992_v34, %v2987_v33  ;;  %v2997_v39 = vld [vmem:[%s13588_s6 + $0x1f0] sm:$0xff]  ;;  %v2999_v33 = vld [vmem:[%s13588_s6 + $0x200] sm:$0xff] }
 0x697   :  { %10176 = vmatprep.subr.bf16.mxu0 %v10175_v47  ;;  %v10239_v38 = vpack.c.bf16 %v3003_v36, %v2998_v35  ;;  %v10241_v42 = vpack.c.bf16 %v3002_v40, %v2997_v39  ;;  %v3004_v34 = vld [vmem:[%s13588_s6 + $0x228] sm:$0xff]  ;;  %v3009_v36 = vld [vmem:[%s13588_s6 + $0x250] sm:$0xff] }
 0x698   :  { %v10271_v35 = vpack.c.bf16 %v3004_v34, %v2999_v33  ;;  %v4020_v39 = vld [vmem:[%s13589_s2 + $0x8] sm:$0xff]  ;;  %v4025_v40 = vld [vmem:[%s13589_s2 + $0x30] sm:$0xff] }
 0x699   :  { %9039 = vmatmul.mubr.msk.f32.gmra.mrb[20].mxu0 %vm2403_vm12, %v2518_v48  ;;  %v2829_v63 = vpop.permute.xlu1 %2828 }
 0x69a   :  { %9045 = vmatprep.mubr.msk.f32.mxu0 %vm2403_vm12, %v2617_v49  ;;  %v2831_v4 = vpop.permute.xlu0 %2830  ;;  %v3005_v49 = vld [vmem:[%s13588_s6 + $0x230] sm:$0xff] }
 0x69d   :  { %9046 = vmatmul.mubr.msk.f32.vlgmr.msra.gmra.mrb[18].mxu0 %vm2403_vm12, %v2619_v50  ;;  %v2833_v9 = vpop.permute.xlu1 %2832  ;;  %v3010_v50 = vld [vmem:[%s13588_s6 + $0x258] sm:$0xff] }
 0x69e   :  { %10178 = vmatpush3.bf16.msra.mxu0 %v10175_v47  ;;  %9048 = vmatprep.mubr.msk.f32.mxu0 %vm2403_vm12, %v2621_v51  ;;  %v3011_v47 = vld [vmem:[%s13588_s6 + $0x260] sm:$0xff]  ;;  %v3008_v51 = vld [vmem:[%s13588_s6 + $0x248] sm:$0xff] }
 0x69f   :  { %v10211_v48 = vpack.c.bf16 %v3011_v47, %v3006_v45  ;;  %v10319_v45 = vpack.c.bf16 %v4025_v40, %v4020_v39  ;;  %v4024_v47 = vld [vmem:[%s13589_s2 + $0x28] sm:$0xff] }
 0x6a1   :  { %9049 = vmatmul.mubr.msk.f32.gmra.mrb[20].mxu0 %vm2403_vm12, %v2623_v13  ;;  %v10213_v13 = vpack.c.bf16 %v3010_v50, %v3005_v49  ;;  %10212 = vmatprep.subr.bf16.mxu1 %v10211_v48  ;;  %v4030_v48 = vld [vmem:[%s13589_s2 + $0x58] sm:$0xff]  ;;  %v4035_v49 = vld [vmem:[%s13589_s2 + $0x80] sm:$0xff] }
 0x6a2   :  { %v9020_v55 = vpop.f32.mrb[22].mxu1  ;;  %9055 = vmatprep.mubr.msk.f32.mxu0 %vm2403_vm12, %v2722_v14  ;;  %v3013_v14 = vld [vmem:[%s13588_s6 + $0x270] sm:$0xff] }
 0x6a3   :  { %v2389_v57 = vpop.f32.mrb[23].mxu1  ;;  %v10243_v53 = vpack.c.bf16 %v3013_v14, %v3008_v51  ;;  %10214 = vmatpush1.bf16.msra.mxu1 %v10213_v13  ;;  %v10323_v51 = vpack.c.bf16 %v4035_v49, %v4030_v48  ;;  %v4029_v13 = vld [vmem:[%s13589_s2 + $0x50] sm:$0xff]  ;;  %v4034_v14 = vld [vmem:[%s13589_s2 + $0x78] sm:$0xff] }
 0x6a4   :  { %v10179_v58 = vpack.c.bf16 %v9020_v55, %v2389_v57  ;;  %v2939_v55 = vld [vmem:[%s13588_s6 + $0x20] sm:$0xff] }
 0x6a5   :  { %9056 = vmatmul.mubr.msk.f32.vlgmr.msra.gmra.mrb[18].mxu0 %vm2403_vm12, %v2724_v52  ;;  %v3007_v52 = vld [vmem:[%s13588_s6 + $0x240] sm:$0xff] }
 0x6a6   :  { %10180 = vmatprep.subr.bf16.mxu0 %v10179_v58  ;;  %9058 = vmatprep.mubr.msk.f32.mxu0 %vm2403_vm12, %v2726_v15  ;;  %v3012_v15 = vld [vmem:[%s13588_s6 + $0x268] sm:$0xff] }
 0x6a7   :  { %10182 = vmatpush3.bf16.msra.mxu0 %v10179_v58  ;;  %v10245_v54 = vpack.c.bf16 %v3012_v15, %v3007_v52  ;;  %v12216_v58 = vld [vmem:[#allocation15] sm:$0xff]  ;;  %v4040_v52 = vld [vmem:[%s13589_s2 + $0xa8] sm:$0xff]  ;;  %v4045_v15 = vld [vmem:[%s13589_s2 + $0xd0] sm:$0xff] }
 0x6a8   :  { %10216 = vmatprep.subr.bf16.mxu0 %v10215_v59  ;;  %v12218_v59 = vld [vmem:[#allocation15 + $0x10] sm:$0xff]  ;;  %3431 = vrot.lane.b32.xlu0 %v12216_v58, %s11504_s0 }
 0x6a9   :  { %9059 = vmatmul.mubr.msk.f32.gmra.mrb[20].mxu0 %vm2403_vm12, %v2728_v56  ;;  %v2944_v56 = vld [vmem:[%s13588_s6 + $0x48] sm:$0xff]  ;;  %3433 = vrot.lane.b32.xlu1 %v12218_v59, %s11504_s0 }
 0x6aa   :  { %9065 = vmatprep.mubr.msk.f32.mxu0 %vm2403_vm12, %v2827_v60  ;;  %v10247_v57 = vpack.c.bf16 %v2944_v56, %v2939_v55  ;;  %v12224_v60 = vld [vmem:[#allocation15 + $0x20] sm:$0xff]  ;;  %v4044_v56 = vld [vmem:[%s13589_s2 + $0xc8] sm:$0xff] }
 0x6ab   :  { %v4039_v55 = vld [vmem:[%s13589_s2 + $0xa0] sm:$0xff] }
 0x6ac   :  { %10248 = vmatprep.subr.bf16.mxu1 %v10247_v57  ;;  %3435 = vrot.lane.b32.xlu0 %v12224_v60, %s11504_s0 }
 0x6ad   :  { %9066 = vmatmul.mubr.msk.f32.vlgmr.msra.gmra.mrb[18].mxu0 %vm2403_vm12, %v2829_v63  ;;  %3437 = vrot.lane.b32.xlu1 %v12226_v61, %s11504_s0  ;;  %v12234_v63 = vld [vmem:[#allocation15 + $0x50] sm:$0xff] }
 0x6ae   :  { %9068 = vmatprep.mubr.msk.f32.mxu0 %vm2403_vm12, %v2831_v4  ;;  %10218 = vmatpush1.bf16.msra.mxu0 %v10217_v3  ;;  %v8059_v3 = vld [vmem:[#allocation13] ss:$0 sm:$0xff] }
 0x6af   :  { %10220 = vmatprep.subr.bf16.mxu0 %v10219_v5 }
 0x6b0   :  { %3439 = vrot.lane.b32.xlu0 %v12232_v62, %s11504_s0 }
 0x6b1   :  { %9069 = vmatmul.mubr.msk.f32.gmra.mrb[20].mxu0 %vm2403_vm12, %v2833_v9  ;;  %3441 = vrot.lane.b32.xlu1 %v12234_v63, %s11504_s0 }
 0x6b2   :  { %10222 = vmatpush1.bf16.msra.mxu0 %v10221_v10  ;;  %3168 = vmatprep.mubr.f32.mxu0 %v11497_v0 }
 0x6b3   :  { %10224 = vmatprep.subr.bf16.mxu0 %v10223_v11  ;;  %v10251_v11 = vpack.c.bf16 %v2954_v7, %v2949_v6  ;;  %v4054_v6 = vld [vmem:[%s13589_s2 + $0x118] sm:$0xff]  ;;  %v4060_v7 = vld [vmem:[%s13589_s2 + $0x148] sm:$0xff] }
 0x6b4   :  { %3443 = vrot.lane.b32.xlu0 %v12240_v1, %s11504_s0 }
 0x6b5   :  { %3445 = vrot.lane.b32.xlu1 %v12242_v2, %s11504_s0 }
 0x6b6   :  { %10226 = vmatpush1.bf16.msra.mxu0 %v10225_v19 }
 0x6b7   :  { %10228 = vmatprep.subr.bf16.mxu0 %v10227_v20  ;;  %v10255_v20 = vpack.c.bf16 %v2964_v17, %v2959_v16  ;;  %v4075_v16 = vld [vmem:[%s13589_s2 + $0x1c0] sm:$0xff] }
 0x6b8   :  { %3576 = vrot.lane.b32.xlu0 %v12216_v58, %s11506_s28 }
 0x6b9   :  { %3578 = vrot.lane.b32.xlu1 %v12218_v59, %s11506_s28 }
 0x6ba   :  { %10230 = vmatpush1.bf16.msra.mxu0 %v10229_v25  ;;  %v10259_v25 = vpack.c.bf16 %v2974_v22, %v2969_v21  ;;  %v4080_v21 = vld [vmem:[%s13589_s2 + $0x1e8] sm:$0xff]  ;;  %v4085_v22 = vld [vmem:[%s13589_s2 + $0x210] sm:$0xff] }
 0x6bb   :  { %10232 = vmatprep.subr.bf16.mxu0 %v10231_v26  ;;  %v2979_v26 = vld [vmem:[%s13588_s6 + $0x160] sm:$0xff] }
 0x6bc   :  { %3580 = vrot.lane.b32.xlu0 %v12224_v60, %s11506_s28  ;;  %v10263_v29 = vpack.c.bf16 %v2984_v41, %v2979_v26  ;;  %v4084_v26 = vld [vmem:[%s13589_s2 + $0x208] sm:$0xff] }
 0x6bd   :  { %3582 = vrot.lane.b32.xlu1 %v12226_v61, %s11506_s28 }
 0x6be   :  { %10234 = vmatpush1.bf16.msra.mxu0 %v10233_v31  ;;  %v2994_v31 = vld [vmem:[%s13588_s6 + $0x1d8] sm:$0xff] }
 0x6bf   :  { %10236 = vmatprep.subr.bf16.mxu0 %v10235_v32  ;;  %v10267_v32 = vpack.c.bf16 %v2994_v31, %v2989_v30 }
 0x6c0   :  { %3584 = vrot.lane.b32.xlu0 %v12232_v62, %s11506_s28 }
 0x6c1   :  { %3586 = vrot.lane.b32.xlu1 %v12234_v63, %s11506_s28 }
 0x6c2   :  { %10238 = vmatpush1.bf16.msra.mxu0 %v10237_v37  ;;  %v3014_v37 = vld [vmem:[%s13588_s6 + $0x278] sm:$0xff] }
 0x6c3   :  { %10240 = vmatprep.subr.bf16.mxu0 %v10239_v38  ;;  %v10275_v38 = vpack.c.bf16 %v3014_v37, %v3009_v36 }
 0x6c4   :  { %3588 = vrot.lane.b32.xlu0 %v12240_v1, %s11506_s28 }
 0x6c5   :  { %3590 = vrot.lane.b32.xlu1 %v12242_v2, %s11506_s28 }
 0x6c6   :  { %10242 = vmatpush1.bf16.msra.mxu0 %v10241_v42  ;;  %v4019_v42 = vld [vmem:[%s13589_s2] sm:$0xff] }
 0x6c7   :  { %10244 = vmatprep.subr.bf16.mxu0 %v10243_v53  ;;  %v10321_v50 = vpack.c.bf16 %v4024_v47, %v4019_v42  ;;  %v10325_v53 = vpack.c.bf16 %v4034_v14, %v4029_v13 }
 0x6c8   :  { %3721 = vrot.lane.b32.xlu0 %v12216_v58, %s11507_s1 }
 0x6c9   :  { %3723 = vrot.lane.b32.xlu1 %v12218_v59, %s11507_s1 }
 0x6ca   :  { %10246 = vmatpush1.bf16.msra.mxu0 %v10245_v54  ;;  %v10327_v54 = vpack.c.bf16 %v4045_v15, %v4040_v52 }
 0x6cb   :  { %10320 = vmatprep.subr.bf16.mxu0 %v10319_v45 }
 0x6cc   :  { %3725 = vrot.lane.b32.xlu0 %v12224_v60, %s11507_s1 }
 0x6cd   :  { %3727 = vrot.lane.b32.xlu1 %v12226_v61, %s11507_s1 }
 0x6d0   :  { %3729 = vrot.lane.b32.xlu0 %v12232_v62, %s11507_s1 }
 0x6d1   :  { %3731 = vrot.lane.b32.xlu1 %v12234_v63, %s11507_s1 }
 0x6d4   :  { %3733 = vrot.lane.b32.xlu0 %v12240_v1, %s11507_s1 }
 0x6d5   :  { %3735 = vrot.lane.b32.xlu1 %v12242_v2, %s11507_s1 }
 0x71b   :  { %v3434_v49 = vpop.permute.xlu1 %3433 }
 0x780   :  { %v9067_v4 = vpop.f32.mrb[18].mxu0 }
 0x781   :  { %v2908_v5 = vpop.f32.mrb[19].mxu0  ;;  %v10788_v28 = vadd.f32 %v9067_v4, %v8059_v3 }
 0x782   :  { %v10789_v8 = vadd.f32 %v8059_v3, %v2908_v5  ;;  %v4049_v5 = vld [vmem:[%s13589_s2 + $0xf0] sm:$0xff] }
 0x783   :  { %v2932_v18 = vmax.f32 %v10788_v28, 0.0  ;;  %v10333_v28 = vpack.c.bf16 %v4054_v6, %v4049_v5 }
 0x784   :  { %v2931_v9 = vmax.f32 %v10789_v8, 0.0  ;;  %v9070_v10 = vpop.f32.mrb[20].mxu0  ;;  %v4065_v8 = vld [vmem:[%s13589_s2 + $0x170] sm:$0xff] }
 0x785   :  { %v2918_v12 = vpop.f32.mrb[21].mxu0  ;;  %v10790_v23 = vadd.f32 %v9070_v10, %v8059_v3  ;;  %v4059_v10 = vld [vmem:[%s13589_s2 + $0x140] sm:$0xff] }
 0x786   :  { %3080 = vmatmul.mubr.f32.vlgmr.msra.gmra.mrb[24].mxu1 %v2931_v9  ;;  %3169 = vmatmul.mubr.f32.vlgmr.msra.gmra.mrb[22].mxu0 %v2931_v9  ;;  %v10791_v19 = vadd.f32 %v8059_v3, %v2918_v12  ;;  %v10329_v3 = vpack.c.bf16 %v4044_v56, %v4039_v55  ;;  %v4070_v12 = vld [vmem:[%s13589_s2 + $0x198] sm:$0xff]  ;;  %v3438_v56 = vpop.permute.xlu1 %3437 }
 0x787   :  { %10250 = vmatpush3.bf16.msra.mxu1 %v10247_v57  ;;  %3085 = vmatprep.mubr.f32.mxu1 %v11497_v0  ;;  %v2934_v27 = vmax.f32 %v10790_v23, 0.0  ;;  %v4050_v57 = vld [vmem:[%s13589_s2 + $0xf8] sm:$0xff] }
 0x788   :  { %3174 = vmatprep.mubr.f32.mxu0 %v11497_v0  ;;  %10252 = vmatprep.subr.bf16.mxu1 %v10251_v11  ;;  %v2933_v24 = vmax.f32 %v10791_v19, 0.0  ;;  %v4069_v19 = vld [vmem:[%s13589_s2 + $0x190] sm:$0xff] }
 0x789   :  { %10322 = vmatpush1.bf16.msra.mxu0 %v10321_v50 }
 0x78a   :  { %3086 = vmatmul.mubr.f32.gmra.mrb[26].mxu1 %v2932_v18  ;;  %3175 = vmatmul.mubr.f32.gmra.mrb[24].mxu0 %v2932_v18 }
 0x78b   :  { %10254 = vmatpush3.bf16.msra.mxu1 %v10251_v11  ;;  %3091 = vmatprep.mubr.f32.mxu1 %v11497_v0  ;;  %v4064_v11 = vld [vmem:[%s13589_s2 + $0x168] sm:$0xff] }
 0x78c   :  { %3180 = vmatprep.mubr.f32.mxu0 %v11497_v0  ;;  %10256 = vmatprep.subr.bf16.mxu1 %v10255_v20  ;;  %v10337_v17 = vpack.c.bf16 %v4064_v11, %v4059_v10 }
 0x78d   :  { %10324 = vmatprep.subr.bf16.mxu0 %v10323_v51 }
 0x78e   :  { %3092 = vmatmul.mubr.f32.gmra.mrb[28].mxu1 %v2933_v24  ;;  %3181 = vmatmul.mubr.f32.gmra.mrb[26].mxu0 %v2933_v24 }
 0x78f   :  { %10258 = vmatpush3.bf16.msra.mxu1 %v10255_v20  ;;  %3097 = vmatprep.mubr.f32.mxu1 %v11497_v0  ;;  %v4074_v20 = vld [vmem:[%s13589_s2 + $0x1b8] sm:$0xff] }
 0x790   :  { %3186 = vmatprep.mubr.f32.mxu0 %v11497_v0  ;;  %10260 = vmatprep.subr.bf16.mxu1 %v10259_v25  ;;  %v10341_v23 = vpack.c.bf16 %v4074_v20, %v4069_v19 }
 0x791   :  { %10326 = vmatpush1.bf16.msra.mxu0 %v10325_v53 }
 0x792   :  { %3098 = vmatmul.mubr.f32.gmra.mrb[30].mxu1 %v2934_v27  ;;  %3187 = vmatmul.mubr.f32.gmra.mrb[28].mxu0 %v2934_v27 }
 0x793   :  { %10262 = vmatpush3.bf16.msra.mxu1 %v10259_v25  ;;  %9103 = vmatprep.mubr.f32.mxu1 %v2931_v9  ;;  %v10335_v9 = vpack.c.bf16 %v4065_v8, %v4060_v7  ;;  %v4079_v25 = vld [vmem:[%s13589_s2 + $0x1e0] sm:$0xff] }
 0x794   :  { %10264 = vmatprep.subr.bf16.mxu1 %v10263_v29  ;;  %4163 = vmatprep.mubr.f32.mxu0 %v11497_v0  ;;  %v10345_v41 = vpack.c.bf16 %v4084_v26, %v4079_v25  ;;  %v3869_v25 = vld [vmem:[#allocation15 + $0x38] sm:$0xff]  ;;  %v3870_v26 = vld [vmem:[#allocation15 + $0x48] sm:$0xff] }
 0x795   :  { %10328 = vmatprep.subr.bf16.mxu0 %v10327_v54 }
 0x796   :  { %10330 = vmatpush1.bf16.msra.mxu0 %v10329_v3 }
 0x797   :  { %10266 = vmatpush3.bf16.msra.mxu1 %v10263_v29 }
 0x798   :  { %10268 = vmatprep.subr.bf16.mxu1 %v10267_v32 }
 0x79b   :  { %10270 = vmatpush3.bf16.msra.mxu1 %v10267_v32  ;;  %v3432_v32 = vpop.permute.xlu0 %3431 }
 0x79c   :  { %10272 = vmatprep.subr.bf16.mxu1 %v10271_v35 }
 0x79f   :  { %10274 = vmatpush3.bf16.msra.mxu1 %v10271_v35  ;;  %v3436_v50 = vpop.permute.xlu0 %3435 }
 0x7a0   :  { %10276 = vmatprep.subr.bf16.mxu1 %v10275_v38 }
 0x7a3   :  { %10278 = vmatpush3.bf16.msra.mxu1 %v10275_v38 }
 0x7a6   :  { %9104 = vmatmul.mubr.f32.vlgmr.msra.gmra.mrb[32].mxu1 %v2932_v18  ;;  %v10339_v18 = vpack.c.bf16 %v4075_v16, %v4070_v12 }
 0x7a7   :  { %9106 = vmatprep.mubr.f32.mxu1 %v2933_v24  ;;  %v10343_v24 = vpack.c.bf16 %v4085_v22, %v4080_v21  ;;  %v3866_v22 = vld [vmem:[#allocation15 + $0x8] sm:$0xff] }
 0x7aa   :  { %9107 = vmatmul.mubr.f32.gmra.mrb[34].mxu1 %v2934_v27 }
 0x7ab   :  { %9117 = vmatprep.mubr.msk.f32.mxu1 %vm3287_vm13, %v12216_v58  ;;  %v4055_v58 = vld [vmem:[%s13589_s2 + $0x120] sm:$0xff] }
 0x7ac   :  { %v10331_v4 = vpack.c.bf16 %v4055_v58, %v4050_v57  ;;  %v3440_v57 = vpop.permute.xlu0 %3439  ;;  %v3442_v58 = vpop.permute.xlu1 %3441 }
 0x7ae   :  { %10332 = vmatprep.subr.bf16.mxu0 %v10331_v4 }
 0x7af   :  { %10334 = vmatpush1.bf16.msra.mxu0 %v10333_v28 }
 0x7b0   :  { %10336 = vmatprep.subr.bf16.mxu0 %v10335_v9  ;;  %v3444_v3 = vpop.permute.xlu0 %3443 }
 0x7b3   :  { %10338 = vmatpush1.bf16.msra.mxu0 %v10337_v17 }
 0x7b4   :  { %10340 = vmatprep.subr.bf16.mxu0 %v10339_v18 }
 0x7b7   :  { %10342 = vmatpush1.bf16.msra.mxu0 %v10341_v23  ;;  %v3867_v23 = vld [vmem:[#allocation15 + $0x18] sm:$0xff] }
 0x7b8   :  { %10344 = vmatprep.subr.bf16.mxu0 %v10343_v24  ;;  %v3868_v24 = vld [vmem:[#allocation15 + $0x28] sm:$0xff] }
 0x7bb   :  { %10346 = vmatpush1.bf16.msra.mxu0 %v10345_v41  ;;  %v3871_v41 = vld [vmem:[#allocation15 + $0x58] sm:$0xff] }
 0x859   :  { %v3081_v27 = vpop.f32.mrb[24].mxu1  ;;  %v3170_v29 = vpop.f32.mrb[22].mxu0 }
 0x85a   :  { %v3083_v30 = vpop.f32.mrb[25].mxu1  ;;  %v3172_v31 = vpop.f32.mrb[23].mxu0 }
 0x85d   :  { %v3087_v33 = vpop.f32.mrb[26].mxu1  ;;  %v3176_v34 = vpop.f32.mrb[24].mxu0 }
 0x85e   :  { %v10279_v35 = vpack.c.bf16 %v3087_v33, %v3081_v27  ;;  %v10295_v36 = vpack.c.bf16 %v3176_v34, %v3170_v29  ;;  %v3089_v37 = vpop.f32.mrb[27].mxu1  ;;  %v3178_v38 = vpop.f32.mrb[25].mxu0  ;;  %v3872_v27 = vld [vmem:[#allocation15 + $0x68] sm:$0xff]  ;;  %v3873_v29 = vld [vmem:[#allocation15 + $0x78] sm:$0xff] }
 0x85f   :  { %v10287_v39 = vpack.c.bf16 %v3089_v37, %v3083_v30  ;;  %v12323_v40 = vpack.c.bf16 %v3178_v38, %v3172_v31  ;;  %v4090_v30 = vld [vmem:[%s13589_s2 + $0x238] sm:$0xff]  ;;  %v4095_v31 = vld [vmem:[%s13589_s2 + $0x260] sm:$0xff]  ;;  %v4089_v33 = vld [vmem:[%s13589_s2 + $0x230] sm:$0xff] }
 0x860   :  { %10280 = vmatprep.subr.bf16.mxu1 %v10279_v35  ;;  %v4094_v34 = vld [vmem:[%s13589_s2 + $0x258] sm:$0xff]  ;;  %v4027_v37 = vld [vmem:[%s13589_s2 + $0x40] sm:$0xff] }
 0x861   :  { %v3093_v42 = vpop.f32.mrb[28].mxu1  ;;  %v3182_v45 = vpop.f32.mrb[26].mxu0  ;;  %10282 = vmatpush3.bf16.msra.mxu1 %v10279_v35  ;;  %v10349_v35 = vpack.c.bf16 %v4094_v34, %v4089_v33 }
 0x862   :  { %v3095_v47 = vpop.f32.mrb[29].mxu1  ;;  %v3184_v48 = vpop.f32.mrb[27].mxu0 }
 0x865   :  { %v3099_v51 = vpop.f32.mrb[30].mxu1  ;;  %v3188_v13 = vpop.f32.mrb[28].mxu0 }
 0x866   :  { %v10283_v14 = vpack.c.bf16 %v3099_v51, %v3093_v42  ;;  %v10299_v52 = vpack.c.bf16 %v3188_v13, %v3182_v45  ;;  %v3101_v15 = vpop.f32.mrb[31].mxu1  ;;  %v3190_v53 = vpop.f32.mrb[29].mxu0  ;;  %v12387_v42 = vld [vmem:[%s13590_s27 + $0x30] sm:$0xff]  ;;  %v12390_v45 = vld [vmem:[%s13590_s27 + $0x48] sm:$0xff]  ;;  %v12418_v51 = vld [vmem:[%s13590_s27 + $0xc0] sm:$0xff] }
 0x867   :  { %v10291_v54 = vpack.c.bf16 %v3101_v15, %v3095_v47  ;;  %v10307_v55 = vpack.c.bf16 %v3190_v53, %v3184_v48  ;;  %v12398_v47 = vld [vmem:[%s13590_s27 + $0x60] sm:$0xff]  ;;  %v12401_v48 = vld [vmem:[%s13590_s27 + $0x78] sm:$0xff] }
 0x868   :  { %10284 = vmatprep.subr.bf16.mxu1 %v10283_v14  ;;  %v12421_v13 = vld [vmem:[%s13590_s27 + $0xd8] sm:$0xff]  ;;  %v12438_v15 = vld [vmem:[%s13590_s27 + $0x120] sm:$0xff] }
 0x869   :  { %10286 = vmatpush3.bf16.msra.mxu1 %v10283_v14  ;;  %v12428_v14 = vld [vmem:[%s13590_s27 + $0xf0] sm:$0xff]  ;;  %v12441_v53 = vld [vmem:[%s13590_s27 + $0x138] sm:$0xff] }
 0x86a   :  { %10288 = vmatprep.subr.bf16.mxu1 %v10287_v39 }
 0x86c   :  { %9118 = vmatmul.mubr.msk.f32.vlgmr.msra.gmra.mrb[36].mxu1 %vm3287_vm13, %v12218_v59  ;;  %v3446_v59 = vpop.permute.xlu1 %3445 }
 0x86d   :  { %10290 = vmatpush3.bf16.msra.mxu1 %v10287_v39  ;;  %9120 = vmatprep.mubr.msk.f32.mxu1 %vm3287_vm13, %v12224_v60  ;;  %v3577_v60 = vpop.permute.xlu0 %3576  ;;  %v4431_v39 = vld [vmem:[%s13590_s27] sm:$0xff] }
 0x86e   :  { %10292 = vmatprep.subr.bf16.mxu1 %v10291_v54  ;;  %4662 = vrot.lane.b32.xlu0 %v4431_v39, %s11506_s28 }
 0x870   :  { %9121 = vmatmul.mubr.msk.f32.gmra.mrb[38].mxu1 %vm3287_vm13, %v12226_v61  ;;  %v3579_v6 = vpop.permute.xlu1 %3578 }
 0x871   :  { %10294 = vmatpush3.bf16.msra.mxu1 %v10291_v54  ;;  %9123 = vmatprep.mubr.msk.f32.mxu1 %vm3287_vm13, %v12232_v62  ;;  %v12448_v54 = vld [vmem:[%s13590_s27 + $0x150] sm:$0xff] }
 0x872   :  { %10296 = vmatprep.subr.bf16.mxu1 %v10295_v36  ;;  %4666 = vrot.lane.b32.xlu0 %v12387_v42, %s11506_s28 }
 0x874   :  { %9124 = vmatmul.mubr.msk.f32.gmra.mrb[40].mxu1 %vm3287_vm13, %v12234_v63 }
 0x875   :  { %9126 = vmatprep.mubr.msk.f32.mxu1 %vm3287_vm13, %v12240_v1  ;;  %v3581_v1 = vpop.permute.xlu0 %3580 }
 0x876   :  { %4670 = vrot.lane.b32.xlu0 %v12398_v47, %s11506_s28 }
 0x878   :  { %9127 = vmatmul.mubr.msk.f32.gmra.mrb[42].mxu1 %vm3287_vm13, %v12242_v2  ;;  %v3583_v2 = vpop.permute.xlu1 %3582 }
 0x879   :  { %v9105_v4 = vpop.f32.mrb[32].mxu1  ;;  %9137 = vmatprep.mubr.msk.f32.mxu1 %vm3287_vm13, %v3432_v32  ;;  %v3585_v8 = vpop.permute.xlu0 %3584  ;;  %v10347_v32 = vpack.c.bf16 %v4095_v31, %v4090_v30  ;;  %v4062_v31 = vld [vmem:[%s13589_s2 + $0x158] sm:$0xff] }
 0x87a   :  { %v3259_v61 = vpop.f32.mrb[33].mxu1 }
 0x87b   :  { %v10311_v5 = vpack.c.bf16 %v9105_v4, %v3259_v61  ;;  %10348 = vmatprep.subr.bf16.mxu0 %v10347_v32  ;;  %v4037_v4 = vld [vmem:[%s13589_s2 + $0x90] sm:$0xff]  ;;  %v4067_v32 = vld [vmem:[%s13589_s2 + $0x180] sm:$0xff] }
 0x87c   :  { %9138 = vmatmul.mubr.msk.f32.vlgmr.msra.gmra.mrb[36].mxu1 %vm3287_vm13, %v3434_v49  ;;  %v3587_v28 = vpop.permute.xlu1 %3586  ;;  %10350 = vmatpush1.bf16.msra.mxu0 %v10349_v35  ;;  %v12408_v49 = vld [vmem:[%s13590_s27 + $0x90] sm:$0xff] }
 0x87d   :  { %v9108_v62 = vpop.f32.mrb[34].mxu1  ;;  %10298 = vmatpush3.bf16.msra.mxu1 %v10295_v36  ;;  %9140 = vmatprep.mubr.msk.f32.mxu1 %vm3287_vm13, %v3436_v50  ;;  %v3589_v9 = vpop.permute.xlu0 %3588  ;;  %v4022_v36 = vld [vmem:[%s13589_s2 + $0x18] sm:$0xff]  ;;  %v12411_v50 = vld [vmem:[%s13590_s27 + $0xa8] sm:$0xff] }
 0x87e   :  { %v3269_v63 = vpop.f32.mrb[35].mxu1  ;;  %10300 = vmatprep.subr.bf16.mxu1 %v10299_v52  ;;  %v10351_v38 = vpack.c.bf16 %v4027_v37, %v4022_v36  ;;  %4674 = vrot.lane.b32.xlu0 %v12408_v49, %s11506_s28  ;;  %v10367_v36 = vpack.c.bf16 %v4067_v32, %v4062_v31  ;;  %v4061_v37 = vld [vmem:[%s13589_s2 + $0x150] sm:$0xff] }
 0x87f   :  { %v10315_v7 = vpack.c.bf16 %v9108_v62, %v3269_v63  ;;  %v4053_v32 = vld [vmem:[%s13589_s2 + $0x110] sm:$0xff] }
 0x880   :  { %9141 = vmatmul.mubr.msk.f32.gmra.mrb[38].mxu1 %vm3287_vm13, %v3438_v56  ;;  %v3591_v10 = vpop.permute.xlu1 %3590  ;;  %10352 = vmatprep.subr.bf16.mxu0 %v10351_v38  ;;  %v12457_v56 = vld [vmem:[#allocation16] ss:$0 sm:$0xff] }
 0x881   :  { %10302 = vmatpush3.bf16.msra.mxu1 %v10299_v52  ;;  %9143 = vmatprep.mubr.msk.f32.mxu1 %vm3287_vm13, %v3440_v57  ;;  %v3722_v11 = vpop.permute.xlu0 %3721  ;;  %v12431_v52 = vld [vmem:[%s13590_s27 + $0x108] sm:$0xff]  ;;  %v4066_v38 = vld [vmem:[%s13589_s2 + $0x178] sm:$0xff] }
 0x882   :  { %10304 = vmatprep.subr.bf16.mxu1 %v12323_v40  ;;  %4678 = vrot.lane.b32.xlu0 %v12418_v51, %s11506_s28 }
 0x884   :  { %9144 = vmatmul.mubr.msk.f32.gmra.mrb[40].mxu1 %vm3287_vm13, %v3442_v58  ;;  %v3724_v12 = vpop.permute.xlu1 %3723  ;;  %v4021_v58 = vld [vmem:[%s13589_s2 + $0x10] sm:$0xff] }
 0x885   :  { %9146 = vmatprep.mubr.msk.f32.mxu1 %vm3287_vm13, %v3444_v3  ;;  %v3726_v16 = vpop.permute.xlu0 %3725  ;;  %v4026_v3 = vld [vmem:[%s13589_s2 + $0x38] sm:$0xff] }
 0x886   :  { %4682 = vrot.lane.b32.xlu0 %v12428_v14, %s11506_s28 }
 0x888   :  { %9147 = vmatmul.mubr.msk.f32.gmra.mrb[42].mxu1 %vm3287_vm13, %v3446_v59  ;;  %v3728_v17 = vpop.permute.xlu1 %3727 }
 0x889   :  { %9157 = vmatprep.mubr.msk.f32.mxu1 %vm3287_vm13, %v3577_v60  ;;  %v3730_v18 = vpop.permute.xlu0 %3729  ;;  %v4032_v60 = vld [vmem:[%s13589_s2 + $0x68] sm:$0xff] }
 0x88a   :  { %4686 = vrot.lane.b32.xlu0 %v12438_v15, %s11506_s28 }
 0x88c   :  { %9158 = vmatmul.mubr.msk.f32.vlgmr.msra.gmra.mrb[36].mxu1 %vm3287_vm13, %v3579_v6  ;;  %v3732_v19 = vpop.permute.xlu1 %3731 }
 0x88d   :  { %10306 = vmatpush3.bf16.msra.mxu1 %v12323_v40  ;;  %9160 = vmatprep.mubr.msk.f32.mxu1 %vm3287_vm13, %v3581_v1  ;;  %v3734_v20 = vpop.permute.xlu0 %3733  ;;  %v12381_v40 = vld [vmem:[%s13590_s27 + $0x18] sm:$0xff]  ;;  %v10355_v1 = vpack.c.bf16 %v4037_v4, %v4032_v60  ;;  %v4071_v4 = vld [vmem:[%s13589_s2 + $0x1a0] sm:$0xff] }
 0x88e   :  { %10308 = vmatprep.subr.bf16.mxu1 %v10307_v55  ;;  %4664 = vrot.lane.b32.xlu1 %v12381_v40, %s11506_s28 }
 0x88f   :  { %4690 = vrot.lane.b32.xlu0 %v12448_v54, %s11506_s28 }
 0x890   :  { %9161 = vmatmul.mubr.msk.f32.gmra.mrb[38].mxu1 %vm3287_vm13, %v3583_v2  ;;  %v3736_v21 = vpop.permute.xlu1 %3735  ;;  %v4036_v2 = vld [vmem:[%s13589_s2 + $0x88] sm:$0xff] }
 0x891   :  { %10310 = vmatpush3.bf16.msra.mxu1 %v10307_v55  ;;  %9163 = vmatprep.mubr.msk.f32.mxu1 %vm3287_vm13, %v3585_v8  ;;  %v12451_v55 = vld [vmem:[%s13590_s27 + $0x168] sm:$0xff] }
 0x892   :  { %10312 = vmatprep.subr.bf16.mxu1 %v10311_v5  ;;  %4668 = vrot.lane.b32.xlu1 %v12390_v45, %s11506_s28 }
 0x894   :  { %9164 = vmatmul.mubr.msk.f32.gmra.mrb[40].mxu1 %vm3287_vm13, %v3587_v28  ;;  %v4042_v28 = vld [vmem:[%s13589_s2 + $0xb8] sm:$0xff] }
 0x895   :  { %9166 = vmatprep.mubr.msk.f32.mxu1 %vm3287_vm13, %v3589_v9  ;;  %v4047_v9 = vld [vmem:[%s13589_s2 + $0xe0] sm:$0xff] }
 0x896   :  { %4672 = vrot.lane.b32.xlu1 %v12401_v48, %s11506_s28 }
 0x898   :  { %9167 = vmatmul.mubr.msk.f32.gmra.mrb[42].mxu1 %vm3287_vm13, %v3591_v10 }
 0x899   :  { %9177 = vmatprep.mubr.msk.f32.mxu1 %vm3287_vm13, %v3722_v11 }
 0x89a   :  { %4676 = vrot.lane.b32.xlu1 %v12411_v50, %s11506_s28 }
 0x89c   :  { %9178 = vmatmul.mubr.msk.f32.vlgmr.msra.gmra.mrb[36].mxu1 %vm3287_vm13, %v3724_v12 }
 0x89d   :  { %10314 = vmatpush3.bf16.msra.mxu1 %v10311_v5  ;;  %9180 = vmatprep.mubr.msk.f32.mxu1 %vm3287_vm13, %v3726_v16  ;;  %v10353_v5 = vpack.c.bf16 %v4026_v3, %v4021_v58  ;;  %v10369_v58 = vpack.c.bf16 %v4066_v38, %v4061_v37  ;;  %v4068_v37 = vld [vmem:[%s13589_s2 + $0x188] sm:$0xff] }
 0x89e   :  { %10316 = vmatprep.subr.bf16.mxu1 %v10315_v7  ;;  %4680 = vrot.lane.b32.xlu1 %v12421_v13, %s11506_s28 }
 0x8a0   :  { %9181 = vmatmul.mubr.msk.f32.gmra.mrb[38].mxu1 %vm3287_vm13, %v3728_v17  ;;  %v10359_v17 = vpack.c.bf16 %v4047_v9, %v4042_v28  ;;  %v4086_v28 = vld [vmem:[%s13589_s2 + $0x218] sm:$0xff]  ;;  %v4092_v9 = vld [vmem:[%s13589_s2 + $0x248] sm:$0xff] }
 0x8a1   :  { %10318 = vmatpush3.bf16.msra.mxu1 %v10315_v7  ;;  %9183 = vmatprep.mubr.msk.f32.mxu1 %vm3287_vm13, %v3730_v18  ;;  %v4031_v7 = vld [vmem:[%s13589_s2 + $0x60] sm:$0xff]  ;;  %v4041_v18 = vld [vmem:[%s13589_s2 + $0xb0] sm:$0xff] }
 0x8a2   :  { %4684 = vrot.lane.b32.xlu1 %v12431_v52, %s11506_s28  ;;  %v10357_v10 = vpack.c.bf16 %v4036_v2, %v4031_v7 }
 0x8a4   :  { %9184 = vmatmul.mubr.msk.f32.gmra.mrb[40].mxu1 %vm3287_vm13, %v3732_v19  ;;  %v4046_v19 = vld [vmem:[%s13589_s2 + $0xd8] sm:$0xff] }
 0x8a5   :  { %9186 = vmatprep.mubr.msk.f32.mxu1 %vm3287_vm13, %v3734_v20 }
 0x8a6   :  { %4688 = vrot.lane.b32.xlu1 %v12441_v53, %s11506_s28 }
 0x8a8   :  { %9187 = vmatmul.mubr.msk.f32.gmra.mrb[42].mxu1 %vm3287_vm13, %v3736_v21  ;;  %v4052_v21 = vld [vmem:[%s13589_s2 + $0x108] sm:$0xff] }
 0x8a9   :  { %9197 = vmatprep.mubr.msk.f32.mxu1 %vm3287_vm13, %v3866_v22  ;;  %v4057_v22 = vld [vmem:[%s13589_s2 + $0x130] sm:$0xff] }
 0x8aa   :  { %4692 = vrot.lane.b32.xlu1 %v12451_v55, %s11506_s28 }
 0x8ac   :  { %9198 = vmatmul.mubr.msk.f32.vlgmr.msra.gmra.mrb[36].mxu1 %vm3287_vm13, %v3867_v23  ;;  %v10361_v23 = vpack.c.bf16 %v4046_v19, %v4041_v18  ;;  %v4091_v19 = vld [vmem:[%s13589_s2 + $0x240] sm:$0xff] }
 0x8ad   :  { %9200 = vmatprep.mubr.msk.f32.mxu1 %vm3287_vm13, %v3868_v24 }
 0x8b0   :  { %9201 = vmatmul.mubr.msk.f32.gmra.mrb[38].mxu1 %vm3287_vm13, %v3869_v25 }
 0x8b1   :  { %9203 = vmatprep.mubr.msk.f32.mxu1 %vm3287_vm13, %v3870_v26 }
 0x8b4   :  { %9204 = vmatmul.mubr.msk.f32.gmra.mrb[40].mxu1 %vm3287_vm13, %v3871_v41  ;;  %v10363_v41 = vpack.c.bf16 %v4057_v22, %v4052_v21  ;;  %v4023_v21 = vld [vmem:[%s13589_s2 + $0x20] sm:$0xff]  ;;  %v4028_v22 = vld [vmem:[%s13589_s2 + $0x48] sm:$0xff] }
 0x8b5   :  { %9206 = vmatprep.mubr.msk.f32.mxu1 %vm3287_vm13, %v3872_v27  ;;  %v4051_v27 = vld [vmem:[%s13589_s2 + $0x100] sm:$0xff] }
 0x8b8   :  { %9207 = vmatmul.mubr.msk.f32.gmra.mrb[42].mxu1 %vm3287_vm13, %v3873_v29  ;;  %v4056_v29 = vld [vmem:[%s13589_s2 + $0x128] sm:$0xff] }
 0x8b9   :  { %9269 = vmatprep.mubr.msk.f32.mxu1 %vm488_vm7, %v4431_v39  ;;  %v10365_v33 = vpack.c.bf16 %v4056_v29, %v4051_v27  ;;  %v4072_v39 = vld [vmem:[%s13589_s2 + $0x1a8] sm:$0xff]  ;;  %v4043_v29 = vld [vmem:[%s13589_s2 + $0xc0] sm:$0xff] }
 0x97f   :  { %v9199_v57 = vpop.f32.mrb[36].mxu1 }
 0x980   :  { %v3964_v59 = vpop.f32.mrb[37].mxu1  ;;  %v10792_v6 = vadd.f32 %v9199_v57, %v12457_v56  ;;  %v4077_v57 = vld [vmem:[%s13589_s2 + $0x1d0] sm:$0xff] }
 0x981   :  { %v10793_v61 = vadd.f32 %v12457_v56, %v3964_v59  ;;  %v10371_v60 = vpack.c.bf16 %v4077_v57, %v4072_v39  ;;  %v4073_v39 = vld [vmem:[%s13589_s2 + $0x1b0] sm:$0xff]  ;;  %v4078_v57 = vld [vmem:[%s13589_s2 + $0x1d8] sm:$0xff] }
 0x982   :  { %v12473_v11 = vmax.f32 %v10792_v6, 0.0  ;;  %v4087_v6 = vld [vmem:[%s13589_s2 + $0x220] sm:$0xff] }
 0x983   :  { %v12465_v62 = vmax.f32 %v10793_v61, 0.0  ;;  %v9202_v63 = vpop.f32.mrb[38].mxu1  ;;  %v4076_v61 = vld [vmem:[%s13589_s2 + $0x1c8] sm:$0xff] }
 0x984   :  { %v3974_v8 = vpop.f32.mrb[39].mxu1  ;;  %v10794_v24 = vadd.f32 %v9202_v63, %v12457_v56  ;;  %v10373_v63 = vpack.c.bf16 %v4076_v61, %v4071_v4  ;;  %v4093_v61 = vld [vmem:[%s13589_s2 + $0x250] sm:$0xff] }
 0x985   :  { %4164 = vmatmul.mubr.f32.vlgmr.msra.gmra.mrb[30].mxu0 %v12465_v62  ;;  %v10795_v12 = vadd.f32 %v12457_v56, %v3974_v8  ;;  %v4081_v8 = vld [vmem:[%s13589_s2 + $0x1f0] sm:$0xff] }
 0x986   :  { %10354 = vmatpush1.bf16.msra.mxu0 %v10353_v5  ;;  %4169 = vmatprep.mubr.f32.mxu0 %v11497_v0  ;;  %v12491_v34 = vmax.f32 %v10794_v24, 0.0  ;;  %v4082_v5 = vld [vmem:[%s13589_s2 + $0x1f8] sm:$0xff] }
 0x987   :  { %v9205_v16 = vpop.f32.mrb[40].mxu1  ;;  %10356 = vmatprep.subr.bf16.mxu0 %v10355_v1  ;;  %v12483_v25 = vmax.f32 %v10795_v12, 0.0  ;;  %v10375_v2 = vpack.c.bf16 %v4087_v6, %v4082_v5  ;;  %v10377_v12 = vpack.c.bf16 %v4086_v28, %v4081_v8  ;;  %v4098_v5 = vld [vmem:[%s13589_s2 + $0x278] sm:$0xff]  ;;  %v12615_v8 = vld [vmem:[%s13590_s27 + $0xe0] sm:$0xff] }
 0x988   :  { %v3984_v20 = vpop.f32.mrb[41].mxu1  ;;  %v10796_v3 = vadd.f32 %v9205_v16, %v12457_v56  ;;  %v10411_v6 = vpack.c.bf16 %v4098_v5, %v4093_v61  ;;  %v12620_v28 = vld [vmem:[%s13590_s27 + $0xf8] sm:$0xff] }
 0x989   :  { %4170 = vmatmul.mubr.f32.gmra.mrb[32].mxu0 %v12473_v11  ;;  %v10797_v35 = vadd.f32 %v12457_v56, %v3984_v20  ;;  %v4096_v20 = vld [vmem:[%s13589_s2 + $0x268] sm:$0xff] }
 0x98a   :  { %10358 = vmatpush1.bf16.msra.mxu0 %v10357_v10  ;;  %4175 = vmatprep.mubr.f32.mxu0 %v11497_v0  ;;  %v12509_v1 = vmax.f32 %v10796_v3, 0.0  ;;  %v4097_v10 = vld [vmem:[%s13589_s2 + $0x270] sm:$0xff]  ;;  %v4083_v3 = vld [vmem:[%s13589_s2 + $0x200] sm:$0xff] }
 0x98b   :  { %v9208_v26 = vpop.f32.mrb[42].mxu1  ;;  %10360 = vmatprep.subr.bf16.mxu0 %v10359_v17  ;;  %v12501_v59 = vmax.f32 %v10797_v35, 0.0  ;;  %v10379_v18 = vpack.c.bf16 %v4097_v10, %v4092_v9  ;;  %v12625_v9 = vld [vmem:[%s13590_s27 + $0x110] sm:$0xff]  ;;  %v12630_v10 = vld [vmem:[%s13590_s27 + $0x128] sm:$0xff] }
 0x98c   :  { %v3994_v30 = vpop.f32.mrb[43].mxu1  ;;  %v10798_v16 = vadd.f32 %v9208_v26, %v12457_v56  ;;  %v4033_v26 = vld [vmem:[%s13589_s2 + $0x70] sm:$0xff] }
 0x98d   :  { %4176 = vmatmul.mubr.f32.gmra.mrb[34].mxu0 %v12483_v25  ;;  %v10799_v7 = vadd.f32 %v12457_v56, %v3994_v30  ;;  %v10383_v56 = vpack.c.bf16 %v4028_v22, %v4023_v21  ;;  %v4048_v30 = vld [vmem:[%s13589_s2 + $0xe8] sm:$0xff] }
 0x98e   :  { %10362 = vmatpush1.bf16.msra.mxu0 %v10361_v23  ;;  %4181 = vmatprep.mubr.f32.mxu0 %v11497_v0  ;;  %v10381_v23 = vpack.c.bf16 %v4096_v20, %v4091_v19  ;;  %v12527_v24 = vmax.f32 %v10798_v16, 0.0  ;;  %v10391_v31 = vpack.c.bf16 %v4048_v30, %v4043_v29  ;;  %v12640_v16 = vld [vmem:[%s13590_s27 + $0x158] sm:$0xff] }
 0x98f   :  { %10364 = vmatprep.subr.bf16.mxu0 %v10363_v41  ;;  %v12519_v17 = vmax.f32 %v10799_v7, 0.0  ;;  %v4038_v41 = vld [vmem:[%s13589_s2 + $0x98] sm:$0xff]  ;;  %v12603_v7 = vld [vmem:[%s13590_s27 + $0xb0] sm:$0xff] }
 0x990   :  { %v10387_v27 = vpack.c.bf16 %v4038_v41, %v4033_v26 }
 0x991   :  { %4182 = vmatmul.mubr.f32.gmra.mrb[36].mxu0 %v12491_v34 }
 0x992   :  { %10366 = vmatpush1.bf16.msra.mxu0 %v10365_v33  ;;  %4187 = vmatprep.mubr.f32.mxu0 %v11497_v0  ;;  %v4058_v33 = vld [vmem:[%s13589_s2 + $0x138] sm:$0xff] }
 0x993   :  { %10368 = vmatprep.subr.bf16.mxu0 %v10367_v36  ;;  %v10395_v35 = vpack.c.bf16 %v4058_v33, %v4053_v32  ;;  %v4063_v36 = vld [vmem:[%s13589_s2 + $0x160] sm:$0xff] }
 0x994   :  { %v10399_v38 = vpack.c.bf16 %v4068_v37, %v4063_v36 }
 0x995   :  { %4188 = vmatmul.mubr.f32.gmra.mrb[38].mxu0 %v12501_v59 }
 0x996   :  { %10370 = vmatpush1.bf16.msra.mxu0 %v10369_v58  ;;  %4193 = vmatprep.mubr.f32.mxu0 %v11497_v0  ;;  %v10403_v58 = vpack.c.bf16 %v4078_v57, %v4073_v39 }
 0x997   :  { %10372 = vmatprep.subr.bf16.mxu0 %v10371_v60  ;;  %v4088_v60 = vld [vmem:[%s13589_s2 + $0x228] sm:$0xff] }
 0x998   :  { %v10407_v4 = vpack.c.bf16 %v4088_v60, %v4083_v3 }
 0x999   :  { %4194 = vmatmul.mubr.f32.gmra.mrb[40].mxu0 %v12509_v1 }
 0x99a   :  { %10374 = vmatpush1.bf16.msra.mxu0 %v10373_v63  ;;  %4199 = vmatprep.mubr.f32.mxu0 %v11497_v0  ;;  %v12595_v63 = vld [vmem:[%s13590_s27 + $0x80] sm:$0xff] }
 0x99b   :  { %10376 = vmatprep.subr.bf16.mxu0 %v10375_v2  ;;  %v12610_v2 = vld [vmem:[%s13590_s27 + $0xc8] sm:$0xff] }
 0x99d   :  { %4200 = vmatmul.mubr.f32.gmra.mrb[42].mxu0 %v12519_v17 }
 0x99e   :  { %10378 = vmatpush1.bf16.msra.mxu0 %v10377_v12  ;;  %4205 = vmatprep.mubr.f32.mxu0 %v11497_v0  ;;  %v12635_v12 = vld [vmem:[%s13590_s27 + $0x140] sm:$0xff] }
 0x99f   :  { %10380 = vmatprep.subr.bf16.mxu0 %v10379_v18 }
 0x9a1   :  { %4206 = vmatmul.mubr.f32.gmra.mrb[44].mxu0 %v12527_v24 }
 0x9a2   :  { %10382 = vmatpush1.bf16.msra.mxu0 %v10381_v23  ;;  %4276 = vmatprep.mubr.f32.mxu0 %v11497_v0 }
 0x9a3   :  { %10384 = vmatprep.subr.bf16.mxu0 %v10383_v56 }
 0x9a5   :  { %4277 = vmatmul.mubr.f32.vlgmr.msra.gmra.mrb[46].mxu0 %v12465_v62 }
 0x9a6   :  { %10386 = vmatpush3.bf16.msra.mxu0 %v10383_v56  ;;  %4282 = vmatprep.mubr.f32.mxu0 %v11497_v0 }
 0x9a7   :  { %10388 = vmatprep.subr.bf16.mxu0 %v10387_v27 }
 0x9a9   :  { %4283 = vmatmul.mubr.f32.gmra.mrb[48].mxu0 %v12473_v11 }
 0x9aa   :  { %10390 = vmatpush3.bf16.msra.mxu0 %v10387_v27  ;;  %4288 = vmatprep.mubr.f32.mxu0 %v11497_v0 }
 0x9ab   :  { %10392 = vmatprep.subr.bf16.mxu0 %v10391_v31 }
 0x9ad   :  { %4289 = vmatmul.mubr.f32.gmra.mrb[50].mxu0 %v12483_v25 }
 0x9ae   :  { %10394 = vmatpush3.bf16.msra.mxu0 %v10391_v31  ;;  %4294 = vmatprep.mubr.f32.mxu0 %v11497_v0 }
 0x9af   :  { %10396 = vmatprep.subr.bf16.mxu0 %v10395_v35 }
 0x9b1   :  { %4295 = vmatmul.mubr.f32.gmra.mrb[52].mxu0 %v12491_v34 }
 0x9b2   :  { %10398 = vmatpush3.bf16.msra.mxu0 %v10395_v35  ;;  %4300 = vmatprep.mubr.f32.mxu0 %v11497_v0 }
 0x9b3   :  { %10400 = vmatprep.subr.bf16.mxu0 %v10399_v38 }
 0x9b5   :  { %4301 = vmatmul.mubr.f32.gmra.mrb[54].mxu0 %v12501_v59 }
 0x9b6   :  { %10402 = vmatpush3.bf16.msra.mxu0 %v10399_v38  ;;  %4306 = vmatprep.mubr.f32.mxu0 %v11497_v0 }
 0x9b7   :  { %10404 = vmatprep.subr.bf16.mxu0 %v10403_v58 }
 0x9b9   :  { %4307 = vmatmul.mubr.f32.gmra.mrb[56].mxu0 %v12509_v1 }
 0x9ba   :  { %10406 = vmatpush3.bf16.msra.mxu0 %v10403_v58  ;;  %4312 = vmatprep.mubr.f32.mxu0 %v11497_v0 }
 0x9bb   :  { %10408 = vmatprep.subr.bf16.mxu0 %v10407_v4 }
 0x9bd   :  { %4313 = vmatmul.mubr.f32.gmra.mrb[58].mxu0 %v12519_v17 }
 0x9be   :  { %10410 = vmatpush3.bf16.msra.mxu0 %v10407_v4  ;;  %4318 = vmatprep.mubr.f32.mxu0 %v11497_v0 }
 0x9bf   :  { %10412 = vmatprep.subr.bf16.mxu0 %v10411_v6 }
 0x9c1   :  { %4319 = vmatmul.mubr.f32.gmra.mrb[60].mxu0 %v12527_v24 }
 0x9c2   :  { %10414 = vmatpush3.bf16.msra.mxu0 %v10411_v6  ;;  %9241 = vmatprep.mubr.f32.mxu0 %v12465_v62  ;;  %v12570_v62 = vld [vmem:[%s13590_s27 + $0x8] sm:$0xff] }
 0x9c3   :  { %5112 = vrot.lane.b32.xlu0 %v12570_v62, %s11506_s28 }
 0x9c5   :  { %9242 = vmatmul.mubr.f32.vlgmr.msra.gmra.mrb[62].mxu0 %v12473_v11  ;;  %v12575_v11 = vld [vmem:[%s13590_s27 + $0x20] sm:$0xff] }
 0x9c6   :  { %9244 = vmatprep.mubr.f32.mxu0 %v12483_v25  ;;  %5114 = vrot.lane.b32.xlu1 %v12575_v11, %s11506_s28  ;;  %v12580_v25 = vld [vmem:[%s13590_s27 + $0x38] sm:$0xff] }
 0x9c7   :  { %5116 = vrot.lane.b32.xlu0 %v12580_v25, %s11506_s28 }
 0x9c9   :  { %9245 = vmatmul.mubr.f32.gmra.mrb[64].mxu0 %v12491_v34  ;;  %v12583_v34 = vld [vmem:[%s13590_s27 + $0x50] sm:$0xff] }
 0x9ca   :  { %9247 = vmatprep.mubr.f32.mxu0 %v12501_v59  ;;  %5118 = vrot.lane.b32.xlu1 %v12583_v34, %s11506_s28  ;;  %v12590_v59 = vld [vmem:[%s13590_s27 + $0x68] sm:$0xff] }
 0x9cb   :  { %5120 = vrot.lane.b32.xlu0 %v12590_v59, %s11506_s28 }
 0x9cd   :  { %9248 = vmatmul.mubr.f32.gmra.mrb[66].mxu0 %v12509_v1  ;;  %v12600_v1 = vld [vmem:[%s13590_s27 + $0x98] sm:$0xff] }
 0x9ce   :  { %9250 = vmatprep.mubr.f32.mxu0 %v12519_v17  ;;  %5122 = vrot.lane.b32.xlu1 %v12595_v63, %s11506_s28  ;;  %v12645_v17 = vld [vmem:[%s13590_s27 + $0x170] sm:$0xff] }
 0x9cf   :  { %5124 = vrot.lane.b32.xlu0 %v12600_v1, %s11506_s28 }
 0x9d1   :  { %9251 = vmatmul.mubr.f32.gmra.mrb[68].mxu0 %v12527_v24 }
 0x9d2   :  { %5883 = vmatprep.mubr.f32.mxu0 %v11497_v0  ;;  %5126 = vrot.lane.b32.xlu1 %v12603_v7, %s11506_s28 }
 0x9d3   :  { %5128 = vrot.lane.b32.xlu0 %v12610_v2, %s11506_s28 }
 0x9d6   :  { %5130 = vrot.lane.b32.xlu1 %v12615_v8, %s11506_s28 }
 0x9d7   :  { %5132 = vrot.lane.b32.xlu0 %v12620_v28, %s11506_s28 }
 0x9da   :  { %5134 = vrot.lane.b32.xlu1 %v12625_v9, %s11506_s28 }
 0x9db   :  { %5136 = vrot.lane.b32.xlu0 %v12630_v10, %s11506_s28 }
 0x9de   :  { %5138 = vrot.lane.b32.xlu1 %v12635_v12, %s11506_s28 }
 0x9df   :  { %5140 = vrot.lane.b32.xlu0 %v12640_v16, %s11506_s28 }
 0x9e2   :  { %5142 = vrot.lane.b32.xlu1 %v12645_v17, %s11506_s28 }
 0xa58   :  { %v4165_v18 = vpop.f32.mrb[30].mxu0 }
 0xa59   :  { %v4167_v19 = vpop.f32.mrb[31].mxu0 }
 0xa5c   :  { %v4171_v20 = vpop.f32.mrb[32].mxu0 }
 0xa5d   :  { %v10415_v21 = vpack.c.bf16 %v4171_v20, %v4165_v18  ;;  %v4173_v22 = vpop.f32.mrb[33].mxu0 }
 0xa5e   :  { %v10431_v23 = vpack.c.bf16 %v4173_v22, %v4167_v19 }
 0xa5f   :  { %10416 = vmatprep.subr.bf16.mxu1 %v10415_v21 }
 0xa60   :  { %v4177_v24 = vpop.f32.mrb[34].mxu0  ;;  %10418 = vmatpush3.bf16.msra.mxu1 %v10415_v21 }
 0xa61   :  { %v4179_v56 = vpop.f32.mrb[35].mxu0 }
 0xa64   :  { %v4183_v26 = vpop.f32.mrb[36].mxu0 }
 0xa65   :  { %v10419_v41 = vpack.c.bf16 %v4183_v26, %v4177_v24  ;;  %v4185_v27 = vpop.f32.mrb[37].mxu0 }
 0xa66   :  { %v10435_v29 = vpack.c.bf16 %v4185_v27, %v4179_v56 }
 0xa67   :  { %10420 = vmatprep.subr.bf16.mxu1 %v10419_v41 }
 0xa68   :  { %v4189_v30 = vpop.f32.mrb[38].mxu0  ;;  %10422 = vmatpush3.bf16.msra.mxu1 %v10419_v41 }
 0xa69   :  { %v4191_v31 = vpop.f32.mrb[39].mxu0 }
 0xa6c   :  { %v4195_v32 = vpop.f32.mrb[40].mxu0 }
 0xa6d   :  { %v10423_v33 = vpack.c.bf16 %v4195_v32, %v4189_v30  ;;  %v4197_v35 = vpop.f32.mrb[41].mxu0  ;;  %v5586_v32 = vld [vmem:[%s13591_s4 + $0x40] sm:$0xff] }
 0xa6e   :  { %v10439_v36 = vpack.c.bf16 %v4197_v35, %v4191_v31  ;;  %v5581_v31 = vld [vmem:[%s13591_s4 + $0x18] sm:$0xff] }
 0xa6f   :  { %10424 = vmatprep.subr.bf16.mxu1 %v10423_v33 }
 0xa70   :  { %v4201_v37 = vpop.f32.mrb[42].mxu0  ;;  %10426 = vmatpush3.bf16.msra.mxu1 %v10423_v33 }
 0xa71   :  { %v4203_v38 = vpop.f32.mrb[43].mxu0 }
 0xa74   :  { %v4207_v39 = vpop.f32.mrb[44].mxu0 }
 0xa75   :  { %v10427_v57 = vpack.c.bf16 %v4207_v39, %v4201_v37  ;;  %v4209_v58 = vpop.f32.mrb[45].mxu0  ;;  %v5585_v37 = vld [vmem:[%s13591_s4 + $0x38] sm:$0xff] }
 0xa76   :  { %v10443_v3 = vpack.c.bf16 %v4209_v58, %v4203_v38  ;;  %v5596_v58 = vld [vmem:[%s13591_s4 + $0x90] sm:$0xff] }
 0xa77   :  { %10428 = vmatprep.subr.bf16.mxu1 %v10427_v57 }
 0xa78   :  { %v4278_v60 = vpop.f32.mrb[46].mxu0  ;;  %10430 = vmatpush3.bf16.msra.mxu1 %v10427_v57  ;;  %v5591_v57 = vld [vmem:[%s13591_s4 + $0x68] sm:$0xff] }
 0xa79   :  { %v4280_v4 = vpop.f32.mrb[47].mxu0  ;;  %10432 = vmatprep.subr.bf16.mxu1 %v10431_v23 }
 0xa7b   :  { %9270 = vmatmul.mubr.msk.f32.vlgmr.msra.gmra.mrb[44].mxu1 %vm488_vm7, %v12381_v40 }
 0xa7c   :  { %v4284_v61 = vpop.f32.mrb[48].mxu0  ;;  %10434 = vmatpush3.bf16.msra.mxu1 %v10431_v23  ;;  %9272 = vmatprep.mubr.msk.f32.mxu1 %vm488_vm7, %v12387_v42  ;;  %v4665_v23 = vpop.permute.xlu1 %4664 }
 0xa7d   :  { %v12653_v5 = vpack.c.bf16 %v4284_v61, %v4278_v60  ;;  %v4286_v6 = vpop.f32.mrb[49].mxu0  ;;  %10436 = vmatprep.subr.bf16.mxu1 %v10435_v29  ;;  %v5595_v61 = vld [vmem:[%s13591_s4 + $0x88] sm:$0xff] }
 0xa7e   :  { %v12655_v18 = vpack.c.bf16 %v4286_v6, %v4280_v4 }
 0xa7f   :  { %9273 = vmatmul.mubr.msk.f32.gmra.mrb[46].mxu1 %vm488_vm7, %v12390_v45 }
 0xa80   :  { %v4290_v19 = vpop.f32.mrb[50].mxu0  ;;  %10438 = vmatpush3.bf16.msra.mxu1 %v10435_v29  ;;  %9275 = vmatprep.mubr.msk.f32.mxu1 %vm488_vm7, %v12398_v47  ;;  %v4663_v47 = vpop.permute.xlu0 %4662 }
 0xa81   :  { %v4292_v40 = vpop.f32.mrb[51].mxu0  ;;  %10440 = vmatprep.subr.bf16.mxu1 %v10439_v36 }
 0xa83   :  { %9276 = vmatmul.mubr.msk.f32.gmra.mrb[48].mxu1 %vm488_vm7, %v12401_v48 }
 0xa84   :  { %v4296_v42 = vpop.f32.mrb[52].mxu0  ;;  %10442 = vmatpush3.bf16.msra.mxu1 %v10439_v36  ;;  %9278 = vmatprep.mubr.msk.f32.mxu1 %vm488_vm7, %v12408_v49  ;;  %v4667_v56 = vpop.permute.xlu0 %4666  ;;  %v5580_v36 = vld [vmem:[%s13591_s4 + $0x10] sm:$0xff] }
 0xa85   :  { %v12665_v20 = vpack.c.bf16 %v4296_v42, %v4290_v19  ;;  %v4298_v21 = vpop.f32.mrb[53].mxu0  ;;  %10444 = vmatprep.subr.bf16.mxu1 %v10443_v3  ;;  %v10529_v39 = vpack.c.bf16 %v5585_v37, %v5580_v36  ;;  %v5606_v42 = vld [vmem:[%s13591_s4 + $0xe0] sm:$0xff]  ;;  %v5620_v37 = vld [vmem:[%s13591_s4 + $0x150] sm:$0xff] }
 0xa86   :  { %v12667_v45 = vpack.c.bf16 %v4298_v21, %v4292_v40  ;;  %v5601_v40 = vld [vmem:[%s13591_s4 + $0xb8] sm:$0xff] }
 0xa87   :  { %9279 = vmatmul.mubr.msk.f32.gmra.mrb[50].mxu1 %vm488_vm7, %v12411_v50 }
 0xa88   :  { %v4302_v22 = vpop.f32.mrb[54].mxu0  ;;  %10446 = vmatpush3.bf16.msra.mxu1 %v10443_v3  ;;  %9281 = vmatprep.mubr.msk.f32.mxu1 %vm488_vm7, %v12418_v51  ;;  %v5590_v3 = vld [vmem:[%s13591_s4 + $0x60] sm:$0xff] }
 0xa89   :  { %v4304_v48 = vpop.f32.mrb[55].mxu0  ;;  %10448 = vmatprep.subr.bf16.mxu1 %v12653_v5  ;;  %v10533_v19 = vpack.c.bf16 %v5595_v61, %v5590_v3  ;;  %v5630_v3 = vld [vmem:[%s13591_s4 + $0x1a0] sm:$0xff]  ;;  %v5641_v61 = vld [vmem:[%s13591_s4 + $0x1f8] sm:$0xff] }
 0xa8b   :  { %9282 = vmatmul.mubr.msk.f32.gmra.mrb[52].mxu1 %vm488_vm7, %v12421_v13  ;;  %v4669_v13 = vpop.permute.xlu1 %4668 }
 0xa8c   :  { %v4308_v49 = vpop.f32.mrb[56].mxu0  ;;  %9284 = vmatprep.mubr.msk.f32.mxu1 %vm488_vm7, %v12428_v14  ;;  %v4671_v14 = vpop.permute.xlu0 %4670 }
 0xa8d   :  { %v12678_v24 = vpack.c.bf16 %v4308_v49, %v4302_v22  ;;  %v4310_v50 = vpop.f32.mrb[57].mxu0  ;;  %v5600_v22 = vld [vmem:[%s13591_s4 + $0xb0] sm:$0xff] }
 0xa8e   :  { %v12680_v26 = vpack.c.bf16 %v4310_v50, %v4304_v48  ;;  %v5616_v50 = vld [vmem:[%s13591_s4 + $0x130] sm:$0xff] }
 0xa8f   :  { %9285 = vmatmul.mubr.msk.f32.gmra.mrb[54].mxu1 %vm488_vm7, %v12431_v52 }
 0xa90   :  { %v4314_v51 = vpop.f32.mrb[58].mxu0  ;;  %9287 = vmatprep.mubr.msk.f32.mxu1 %vm488_vm7, %v12438_v15  ;;  %v4673_v15 = vpop.permute.xlu1 %4672 }
 0xa91   :  { %v4316_v41 = vpop.f32.mrb[59].mxu0  ;;  %v4675_v35 = vpop.permute.xlu0 %4674 }
 0xa93   :  { %9288 = vmatmul.mubr.msk.f32.gmra.mrb[56].mxu1 %vm488_vm7, %v12441_v53 }
 0xa94   :  { %v4320_v27 = vpop.f32.mrb[60].mxu0  ;;  %9290 = vmatprep.mubr.msk.f32.mxu1 %vm488_vm7, %v12448_v54  ;;  %v10527_v54 = vpack.c.bf16 %v5586_v32, %v5581_v31  ;;  %v4677_v4 = vpop.permute.xlu1 %4676  ;;  %v5615_v31 = vld [vmem:[%s13591_s4 + $0x128] sm:$0xff] }
 0xa95   :  { %v12690_v29 = vpack.c.bf16 %v4320_v27, %v4314_v51  ;;  %v4322_v52 = vpop.f32.mrb[61].mxu0  ;;  %v4679_v48 = vpop.permute.xlu0 %4678 }
 0xa96   :  { %v12692_v30 = vpack.c.bf16 %v4322_v52, %v4316_v41  ;;  %10528 = vmatprep.subr.bf16.mxu0 %v10527_v54  ;;  %v5610_v52 = vld [vmem:[%s13591_s4 + $0x100] sm:$0xff] }
 0xa97   :  { %9291 = vmatmul.mubr.msk.f32.gmra.mrb[58].mxu1 %vm488_vm7, %v12451_v55  ;;  %v10531_v55 = vpack.c.bf16 %v5596_v58, %v5591_v57  ;;  %10530 = vmatpush1.bf16.msra.mxu0 %v10529_v39  ;;  %v10541_v54 = vpack.c.bf16 %v5615_v31, %v5610_v52  ;;  %v5625_v39 = vld [vmem:[%s13591_s4 + $0x178] sm:$0xff]  ;;  %v5599_v52 = vld [vmem:[%s13591_s4 + $0xa8] sm:$0xff]  ;;  %v5604_v31 = vld [vmem:[%s13591_s4 + $0xd0] sm:$0xff] }
 0xa98   :  { %v9243_v53 = vpop.f32.mrb[62].mxu0  ;;  %9309 = vmatprep.mubr.msk.f32.mxu1 %vm488_vm7, %v4663_v47  ;;  %v10535_v47 = vpack.c.bf16 %v5606_v42, %v5601_v40  ;;  %v4681_v27 = vpop.permute.xlu1 %4680  ;;  %v10545_v58 = vpack.c.bf16 %v5625_v39, %v5620_v37  ;;  %v5640_v42 = vld [vmem:[%s13591_s4 + $0x1f0] sm:$0xff]  ;;  %v5342_v37 = vld [vmem:[%s13590_s27 + $0x88] sm:$0xff] }
 0xa99   :  { %v4391_v33 = vpop.f32.mrb[63].mxu0  ;;  %10532 = vmatprep.subr.bf16.mxu0 %v10531_v55 }
 0xa9a   :  { %v12701_v38 = vpack.c.bf16 %v9243_v53, %v4391_v33  ;;  %v4683_v33 = vpop.permute.xlu0 %4682 }
 0xa9b   :  { %9310 = vmatmul.mubr.msk.f32.vlgmr.msra.gmra.mrb[44].mxu1 %vm488_vm7, %v4665_v23  ;;  %v5611_v23 = vld [vmem:[%s13591_s4 + $0x108] sm:$0xff]  ;;  %10534 = vmatpush1.bf16.msra.mxu0 %v10533_v19 }
 0xa9c   :  { %10450 = vmatpush3.bf16.msra.mxu1 %v12653_v5  ;;  %v9246_v60 = vpop.f32.mrb[64].mxu0  ;;  %9312 = vmatprep.mubr.msk.f32.mxu1 %vm488_vm7, %v4667_v56  ;;  %v5605_v5 = vld [vmem:[%s13591_s4 + $0xd8] sm:$0xff]  ;;  %v4685_v57 = vpop.permute.xlu1 %4684 }
 0xa9d   :  { %10452 = vmatprep.subr.bf16.mxu1 %v12665_v20  ;;  %v4401_v6 = vpop.f32.mrb[65].mxu0  ;;  %v10537_v51 = vpack.c.bf16 %v5605_v5, %v5600_v22  ;;  %10536 = vmatprep.subr.bf16.mxu0 %v10535_v47  ;;  %v5645_v47 = vld [vmem:[%s13591_s4 + $0x218] sm:$0xff] }
 0xa9e   :  { %v12713_v21 = vpack.c.bf16 %v9246_v60, %v4401_v6  ;;  %v5635_v60 = vld [vmem:[%s13591_s4 + $0x1c8] sm:$0xff]  ;;  %v5646_v6 = vld [vmem:[%s13591_s4 + $0x220] sm:$0xff]  ;;  %v10553_v5 = vpack.c.bf16 %v5645_v47, %v5640_v42 }
 0xa9f   :  { %9313 = vmatmul.mubr.msk.f32.gmra.mrb[46].mxu1 %vm488_vm7, %v4669_v13  ;;  %v10539_v13 = vpack.c.bf16 %v5616_v50, %v5611_v23  ;;  %10538 = vmatpush1.bf16.msra.mxu0 %v10537_v51  ;;  %v10551_v40 = vpack.c.bf16 %v5646_v6, %v5641_v61  ;;  %v5589_v23 = vld [vmem:[%s13591_s4 + $0x58] sm:$0xff]  ;;  %v5338_v50 = vld [vmem:[%s13590_s27 + $0x28] sm:$0xff]  ;;  %v5339_v51 = vld [vmem:[%s13590_s27 + $0x40] sm:$0xff] }
 0xaa0   :  { %10454 = vmatpush3.bf16.msra.mxu1 %v12665_v20  ;;  %v9249_v49 = vpop.f32.mrb[66].mxu0  ;;  %9315 = vmatprep.mubr.msk.f32.mxu1 %vm488_vm7, %v4671_v14  ;;  %v5621_v20 = vld [vmem:[%s13591_s4 + $0x158] sm:$0xff]  ;;  %v5626_v14 = vld [vmem:[%s13591_s4 + $0x180] sm:$0xff]  ;;  %v4689_v19 = vpop.permute.xlu1 %4688  ;;  %v5345_v61 = vld [vmem:[%s13590_s27 + $0xd0] sm:$0xff] }
 0xaa1   :  { %10456 = vmatprep.subr.bf16.mxu1 %v12678_v24  ;;  %v4411_v56 = vpop.f32.mrb[67].mxu0  ;;  %10540 = vmatprep.subr.bf16.mxu0 %v10539_v13  ;;  %v5593_v13 = vld [vmem:[%s13591_s4 + $0x78] sm:$0xff]  ;;  %v5634_v42 = vld [vmem:[%s13591_s4 + $0x1c0] sm:$0xff]  ;;  %v5346_v47 = vld [vmem:[%s13590_s27 + $0xe8] sm:$0xff] }
 0xaa2   :  { %v12723_v41 = vpack.c.bf16 %v9249_v49, %v4411_v56  ;;  %v5594_v49 = vld [vmem:[%s13591_s4 + $0x80] sm:$0xff] }
 0xaa3   :  { %9316 = vmatmul.mubr.msk.f32.gmra.mrb[48].mxu1 %vm488_vm7, %v4673_v15  ;;  %v10543_v15 = vpack.c.bf16 %v5626_v14, %v5621_v20  ;;  %10542 = vmatpush1.bf16.msra.mxu0 %v10541_v54  ;;  %v5340_v20 = vld [vmem:[%s13590_s27 + $0x58] sm:$0xff]  ;;  %v5603_v54 = vld [vmem:[%s13591_s4 + $0xc8] sm:$0xff] }
 0xaa4   :  { %10458 = vmatpush3.bf16.msra.mxu1 %v12678_v24  ;;  %v9252_v53 = vpop.f32.mrb[68].mxu0  ;;  %9318 = vmatprep.mubr.msk.f32.mxu1 %vm488_vm7, %v4675_v35  ;;  %v5631_v24 = vld [vmem:[%s13591_s4 + $0x1a8] sm:$0xff]  ;;  %v5636_v35 = vld [vmem:[%s13591_s4 + $0x1d0] sm:$0xff] }
 0xaa5   :  { %10460 = vmatprep.subr.bf16.mxu1 %v12690_v29  ;;  %v4421_v32 = vpop.f32.mrb[69].mxu0  ;;  %10544 = vmatprep.subr.bf16.mxu0 %v10543_v15  ;;  %v10547_v55 = vpack.c.bf16 %v5636_v35, %v5631_v24  ;;  %v5614_v15 = vld [vmem:[%s13591_s4 + $0x120] sm:$0xff] }
 0xaa6   :  { %v12733_v36 = vpack.c.bf16 %v9252_v53, %v4421_v32  ;;  %v5341_v53 = vld [vmem:[%s13590_s27 + $0x70] sm:$0xff]  ;;  %v10503_v32 = vpack.c.bf16 %v5604_v31, %v5599_v52  ;;  %v5343_v24 = vld [vmem:[%s13590_s27 + $0xa0] sm:$0xff] }
 0xaa7   :  { %9319 = vmatmul.mubr.msk.f32.gmra.mrb[50].mxu1 %vm488_vm7, %v4677_v4  ;;  %v4687_v4 = vpop.permute.xlu0 %4686  ;;  %10546 = vmatpush1.bf16.msra.mxu0 %v10545_v58  ;;  %v5613_v58 = vld [vmem:[%s13591_s4 + $0x118] sm:$0xff] }
 0xaa8   :  { %10462 = vmatpush3.bf16.msra.mxu1 %v12690_v29  ;;  %9321 = vmatprep.mubr.msk.f32.mxu1 %vm488_vm7, %v4679_v48  ;;  %v10549_v29 = vpack.c.bf16 %v5635_v60, %v5630_v3  ;;  %v4693_v48 = vpop.permute.xlu1 %4692  ;;  %v5624_v3 = vld [vmem:[%s13591_s4 + $0x170] sm:$0xff]  ;;  %v5344_v60 = vld [vmem:[%s13590_s27 + $0xb8] sm:$0xff] }
 0xaa9   :  { %10464 = vmatprep.subr.bf16.mxu1 %v12655_v18  ;;  %10548 = vmatprep.subr.bf16.mxu0 %v10547_v55  ;;  %v5619_v55 = vld [vmem:[%s13591_s4 + $0x148] sm:$0xff] }
 0xaaa   :  { %v10511_v6 = vpack.c.bf16 %v5624_v3, %v5619_v55  ;;  %v5612_v3 = vld [vmem:[%s13591_s4 + $0x110] sm:$0xff] }
 0xaab   :  { %9322 = vmatmul.mubr.msk.f32.gmra.mrb[52].mxu1 %vm488_vm7, %v4681_v27  ;;  %v4691_v22 = vpop.permute.xlu0 %4690  ;;  %10550 = vmatpush1.bf16.msra.mxu0 %v10549_v29  ;;  %v5588_v27 = vld [vmem:[%s13591_s4 + $0x50] sm:$0xff]  ;;  %v5618_v29 = vld [vmem:[%s13591_s4 + $0x140] sm:$0xff] }
 0xaac   :  { %9324 = vmatprep.mubr.msk.f32.mxu1 %vm488_vm7, %v4683_v33  ;;  %10552 = vmatprep.subr.bf16.mxu0 %v10551_v40  ;;  %v10501_v14 = vpack.c.bf16 %v5593_v13, %v5588_v27  ;;  %v5598_v33 = vld [vmem:[%s13591_s4 + $0xa0] sm:$0xff]  ;;  %v5629_v40 = vld [vmem:[%s13591_s4 + $0x198] sm:$0xff] }
 0xaad   :  { %v10505_v39 = vpack.c.bf16 %v5603_v54, %v5598_v33  ;;  %v12890_v13 = vld [vmem:[#allocation18] ss:$0 sm:$0xff] }
 0xaaf   :  { %9325 = vmatmul.mubr.msk.f32.gmra.mrb[54].mxu1 %vm488_vm7, %v4685_v57  ;;  %10554 = vmatpush1.bf16.msra.mxu0 %v10553_v5  ;;  %v5608_v57 = vld [vmem:[%s13591_s4 + $0xf0] sm:$0xff]  ;;  %v5347_v5 = vld [vmem:[%s13590_s27 + $0x100] sm:$0xff] }
 0xab0   :  { %9327 = vmatprep.mubr.msk.f32.mxu1 %vm488_vm7, %v4687_v4  ;;  %v10509_v4 = vpack.c.bf16 %v5613_v58, %v5608_v57 }
 0xab3   :  { %9328 = vmatmul.mubr.msk.f32.gmra.mrb[56].mxu1 %vm488_vm7, %v4689_v19  ;;  %v5623_v19 = vld [vmem:[%s13591_s4 + $0x168] sm:$0xff] }
 0xab4   :  { %9330 = vmatprep.mubr.msk.f32.mxu1 %vm488_vm7, %v4691_v22  ;;  %v10513_v22 = vpack.c.bf16 %v5623_v19, %v5618_v29 }
 0xab7   :  { %9331 = vmatmul.mubr.msk.f32.gmra.mrb[58].mxu1 %vm488_vm7, %v4693_v48  ;;  %v10515_v48 = vpack.c.bf16 %v5634_v42, %v5629_v40  ;;  %v5622_v40 = vld [vmem:[%s13591_s4 + $0x160] sm:$0xff]  ;;  %v5627_v42 = vld [vmem:[%s13591_s4 + $0x188] sm:$0xff] }
 0xab8   :  { %9349 = vmatprep.mubr.msk.f32.mxu1 %vm488_vm7, %v12570_v62  ;;  %v5113_v62 = vpop.permute.xlu0 %5112 }
 0xabb   :  { %9350 = vmatmul.mubr.msk.f32.vlgmr.msra.gmra.mrb[44].mxu1 %vm488_vm7, %v12575_v11  ;;  %v5115_v11 = vpop.permute.xlu1 %5114 }
 0xabc   :  { %10466 = vmatpush3.bf16.msra.mxu1 %v12655_v18  ;;  %9352 = vmatprep.mubr.msk.f32.mxu1 %vm488_vm7, %v12580_v25  ;;  %v5117_v25 = vpop.permute.xlu0 %5116 }
 0xabd   :  { %10468 = vmatprep.subr.bf16.mxu1 %v12667_v45 }
 0xabf   :  { %9353 = vmatmul.mubr.msk.f32.gmra.mrb[46].mxu1 %vm488_vm7, %v12583_v34  ;;  %v5119_v34 = vpop.permute.xlu1 %5118 }
 0xac0   :  { %10470 = vmatpush3.bf16.msra.mxu1 %v12667_v45  ;;  %9355 = vmatprep.mubr.msk.f32.mxu1 %vm488_vm7, %v12590_v59  ;;  %v5121_v59 = vpop.permute.xlu0 %5120 }
 0xac1   :  { %10472 = vmatprep.subr.bf16.mxu1 %v12680_v26 }
 0xac3   :  { %9356 = vmatmul.mubr.msk.f32.gmra.mrb[48].mxu1 %vm488_vm7, %v12595_v63  ;;  %v5123_v63 = vpop.permute.xlu1 %5122 }
 0xac4   :  { %10474 = vmatpush3.bf16.msra.mxu1 %v12680_v26  ;;  %9358 = vmatprep.mubr.msk.f32.mxu1 %vm488_vm7, %v12600_v1  ;;  %v5125_v1 = vpop.permute.xlu0 %5124 }
 0xac5   :  { %10476 = vmatprep.subr.bf16.mxu1 %v12692_v30 }
 0xac7   :  { %9359 = vmatmul.mubr.msk.f32.gmra.mrb[50].mxu1 %vm488_vm7, %v12603_v7  ;;  %v5127_v7 = vpop.permute.xlu1 %5126 }
 0xac8   :  { %10478 = vmatpush3.bf16.msra.mxu1 %v12692_v30  ;;  %9361 = vmatprep.mubr.msk.f32.mxu1 %vm488_vm7, %v12610_v2  ;;  %v5129_v2 = vpop.permute.xlu0 %5128  ;;  %v5337_v30 = vld [vmem:[%s13590_s27 + $0x10] sm:$0xff] }
 0xac9   :  { %10480 = vmatprep.subr.bf16.mxu1 %v12701_v38 }
 0xacb   :  { %9362 = vmatmul.mubr.msk.f32.gmra.mrb[52].mxu1 %vm488_vm7, %v12615_v8  ;;  %v5131_v8 = vpop.permute.xlu1 %5130 }
 0xacc   :  { %9364 = vmatprep.mubr.msk.f32.mxu1 %vm488_vm7, %v12620_v28  ;;  %v5579_v28 = vld [vmem:[%s13591_s4 + $0x8] sm:$0xff] }
 0xacf   :  { %9365 = vmatmul.mubr.msk.f32.gmra.mrb[54].mxu1 %vm488_vm7, %v12625_v9  ;;  %v5584_v9 = vld [vmem:[%s13591_s4 + $0x30] sm:$0xff] }
 0xad0   :  { %9367 = vmatprep.mubr.msk.f32.mxu1 %vm488_vm7, %v12630_v10  ;;  %v5133_v10 = vpop.permute.xlu0 %5132 }
 0xad3   :  { %9368 = vmatmul.mubr.msk.f32.gmra.mrb[56].mxu1 %vm488_vm7, %v12635_v12  ;;  %v10495_v12 = vpack.c.bf16 %v5584_v9, %v5579_v28  ;;  %v5350_v28 = vld [vmem:[%s13590_s27 + $0x148] sm:$0xff] }
 0xad4   :  { %9370 = vmatprep.mubr.msk.f32.mxu1 %vm488_vm7, %v12640_v16  ;;  %v5135_v16 = vpop.permute.xlu1 %5134 }
 0xad7   :  { %9371 = vmatmul.mubr.msk.f32.gmra.mrb[58].mxu1 %vm488_vm7, %v12645_v17  ;;  %v5137_v17 = vpop.permute.xlu0 %5136 }
 0xad8   :  { %9389 = vmatprep.mubr.msk.f32.mxu1 %vm488_vm7, %v5113_v62  ;;  %v5139_v18 = vpop.permute.xlu1 %5138  ;;  %v5628_v62 = vld [vmem:[%s13591_s4 + $0x190] sm:$0xff] }
 0xadb   :  { %9390 = vmatmul.mubr.msk.f32.vlgmr.msra.gmra.mrb[44].mxu1 %vm488_vm7, %v5115_v11  ;;  %v5141_v45 = vpop.permute.xlu0 %5140  ;;  %v5633_v11 = vld [vmem:[%s13591_s4 + $0x1b8] sm:$0xff] }
 0xadc   :  { %10482 = vmatpush3.bf16.msra.mxu1 %v12701_v38  ;;  %9392 = vmatprep.mubr.msk.f32.mxu1 %vm488_vm7, %v5117_v25  ;;  %v5143_v26 = vpop.permute.xlu1 %5142  ;;  %v5578_v38 = vld [vmem:[%s13591_s4] sm:$0xff]  ;;  %v5639_v25 = vld [vmem:[%s13591_s4 + $0x1e8] sm:$0xff] }
 0xadd   :  { %10484 = vmatprep.subr.bf16.mxu1 %v12713_v21 }
 0xadf   :  { %9393 = vmatmul.mubr.msk.f32.gmra.mrb[46].mxu1 %vm488_vm7, %v5119_v34  ;;  %v5644_v34 = vld [vmem:[%s13591_s4 + $0x210] sm:$0xff] }
 0xae0   :  { %10486 = vmatpush3.bf16.msra.mxu1 %v12713_v21  ;;  %9395 = vmatprep.mubr.msk.f32.mxu1 %vm488_vm7, %v5121_v59  ;;  %v5583_v21 = vld [vmem:[%s13591_s4 + $0x28] sm:$0xff]  ;;  %v5348_v59 = vld [vmem:[%s13590_s27 + $0x118] sm:$0xff] }
 0xae1   :  { %10488 = vmatprep.subr.bf16.mxu1 %v12723_v41  ;;  %v10497_v56 = vpack.c.bf16 %v5583_v21, %v5578_v38  ;;  %v5653_v38 = vld [vmem:[%s13591_s4 + $0x258] sm:$0xff] }
 0xae3   :  { %9396 = vmatmul.mubr.msk.f32.gmra.mrb[48].mxu1 %vm488_vm7, %v5123_v63  ;;  %v10517_v63 = vpack.c.bf16 %v5633_v11, %v5628_v62  ;;  %v10575_v62 = vpack.c.bf16 %v5627_v42, %v5622_v40  ;;  %v5632_v11 = vld [vmem:[%s13591_s4 + $0x1b0] sm:$0xff] }
 0xae4   :  { %10490 = vmatpush3.bf16.msra.mxu1 %v12723_v41  ;;  %9398 = vmatprep.mubr.msk.f32.mxu1 %vm488_vm7, %v5125_v1  ;;  %v10499_v41 = vpack.c.bf16 %v5594_v49, %v5589_v23  ;;  %v5349_v1 = vld [vmem:[%s13590_s27 + $0x130] sm:$0xff]  ;;  %v5650_v49 = vld [vmem:[%s13591_s4 + $0x240] sm:$0xff] }
 0xae5   :  { %10492 = vmatprep.subr.bf16.mxu1 %v12733_v36 }
 0xae7   :  { %9399 = vmatmul.mubr.msk.f32.gmra.mrb[50].mxu1 %vm488_vm7, %v5127_v7  ;;  %v10519_v7 = vpack.c.bf16 %v5644_v34, %v5639_v25  ;;  %v5637_v25 = vld [vmem:[%s13591_s4 + $0x1d8] sm:$0xff] }
 0xae8   :  { %10494 = vmatpush3.bf16.msra.mxu1 %v12733_v36  ;;  %9401 = vmatprep.mubr.msk.f32.mxu1 %vm488_vm7, %v5129_v2  ;;  %v5609_v36 = vld [vmem:[%s13591_s4 + $0xf8] sm:$0xff]  ;;  %v5638_v2 = vld [vmem:[%s13591_s4 + $0x1e0] sm:$0xff] }
 0xae9   :  { %10496 = vmatprep.subr.bf16.mxu1 %v10495_v12  ;;  %v10507_v35 = vpack.c.bf16 %v5614_v15, %v5609_v36  ;;  %v5352_v12 = vld [vmem:[%s13590_s27 + $0x178] sm:$0xff] }
 0xaeb   :  { %9402 = vmatmul.mubr.msk.f32.gmra.mrb[52].mxu1 %vm488_vm7, %v5131_v8  ;;  %v5643_v8 = vld [vmem:[%s13591_s4 + $0x208] sm:$0xff] }
 0xaec   :  { %9404 = vmatprep.mubr.msk.f32.mxu1 %vm488_vm7, %v5133_v10  ;;  %v10521_v9 = vpack.c.bf16 %v5643_v8, %v5638_v2  ;;  %v5351_v10 = vld [vmem:[%s13590_s27 + $0x160] sm:$0xff]  ;;  %v5647_v8 = vld [vmem:[%s13591_s4 + $0x228] sm:$0xff] }
 0xaed   :  { %v5642_v2 = vld [vmem:[%s13591_s4 + $0x200] sm:$0xff] }
 0xaef   :  { %9405 = vmatmul.mubr.msk.f32.gmra.mrb[54].mxu1 %vm488_vm7, %v5135_v16  ;;  %v5649_v16 = vld [vmem:[%s13591_s4 + $0x238] sm:$0xff] }
 0xaf0   :  { %9407 = vmatprep.mubr.msk.f32.mxu1 %vm488_vm7, %v5137_v17  ;;  %v5654_v17 = vld [vmem:[%s13591_s4 + $0x260] sm:$0xff] }
 0xaf3   :  { %9408 = vmatmul.mubr.msk.f32.gmra.mrb[56].mxu1 %vm488_vm7, %v5139_v18  ;;  %v5651_v18 = vld [vmem:[%s13591_s4 + $0x248] sm:$0xff] }
 0xaf4   :  { %9410 = vmatprep.mubr.msk.f32.mxu1 %vm488_vm7, %v5141_v45  ;;  %v10523_v45 = vpack.c.bf16 %v5654_v17, %v5649_v16  ;;  %v10583_v16 = vpack.c.bf16 %v5647_v8, %v5642_v2  ;;  %v5652_v17 = vld [vmem:[%s13591_s4 + $0x250] sm:$0xff] }
 0xaf7   :  { %9411 = vmatmul.mubr.msk.f32.gmra.mrb[58].mxu1 %vm488_vm7, %v5143_v26  ;;  %v5656_v26 = vld [vmem:[%s13591_s4 + $0x270] sm:$0xff] }
 0xaf8   :  { %9429 = vmatprep.mubr.msk.f32.mxu1 %vm488_vm7, %v5337_v30  ;;  %v5648_v30 = vld [vmem:[%s13591_s4 + $0x230] sm:$0xff]  ;;  %v10555_v21 = vpack.c.bf16 %v5656_v26, %v5651_v18  ;;  %v5657_v18 = vld [vmem:[%s13591_s4 + $0x278] sm:$0xff] }
 0xaf9   :  { %v10525_v23 = vpack.c.bf16 %v5653_v38, %v5648_v30 }
 0xafa   :  { %10556 = vmatprep.subr.bf16.mxu0 %v10555_v21  ;;  %v10587_v21 = vpack.c.bf16 %v5657_v18, %v5652_v17 }
 0xafb   :  { %9430 = vmatmul.mubr.msk.f32.vlgmr.msra.gmra.mrb[44].mxu1 %vm488_vm7, %v5338_v50  ;;  %v5655_v50 = vld [vmem:[%s13591_s4 + $0x268] sm:$0xff] }
 0xafc   :  { %9432 = vmatprep.mubr.msk.f32.mxu1 %vm488_vm7, %v5339_v51  ;;  %10498 = vmatpush1.bf16.msra.mxu1 %v10497_v56  ;;  %v10557_v56 = vpack.c.bf16 %v5655_v50, %v5650_v49  ;;  %v5582_v51 = vld [vmem:[%s13591_s4 + $0x20] sm:$0xff] }
 0xafd   :  { %10500 = vmatprep.subr.bf16.mxu1 %v10499_v41  ;;  %v5587_v41 = vld [vmem:[%s13591_s4 + $0x48] sm:$0xff] }
 0xafe   :  { %10558 = vmatpush1.bf16.msra.mxu0 %v10557_v56  ;;  %v10559_v27 = vpack.c.bf16 %v5587_v41, %v5582_v51 }
 0xaff   :  { %9433 = vmatmul.mubr.msk.f32.gmra.mrb[46].mxu1 %vm488_vm7, %v5340_v20 }
 0xb00   :  { %9435 = vmatprep.mubr.msk.f32.mxu1 %vm488_vm7, %v5341_v53  ;;  %10502 = vmatpush1.bf16.msra.mxu1 %v10501_v14  ;;  %v5592_v14 = vld [vmem:[%s13591_s4 + $0x70] sm:$0xff]  ;;  %v5597_v53 = vld [vmem:[%s13591_s4 + $0x98] sm:$0xff] }
 0xb01   :  { %10504 = vmatprep.subr.bf16.mxu1 %v10503_v32  ;;  %v10563_v15 = vpack.c.bf16 %v5597_v53, %v5592_v14 }
 0xb03   :  { %9436 = vmatmul.mubr.msk.f32.gmra.mrb[48].mxu1 %vm488_vm7, %v5342_v37  ;;  %v5602_v37 = vld [vmem:[%s13591_s4 + $0xc0] sm:$0xff] }
 0xb04   :  { %9438 = vmatprep.mubr.msk.f32.mxu1 %vm488_vm7, %v5343_v24  ;;  %10506 = vmatpush1.bf16.msra.mxu1 %v10505_v39  ;;  %v5607_v39 = vld [vmem:[%s13591_s4 + $0xe8] sm:$0xff] }
 0xb05   :  { %10508 = vmatprep.subr.bf16.mxu1 %v10507_v35  ;;  %v10567_v55 = vpack.c.bf16 %v5607_v39, %v5602_v37 }
 0xb07   :  { %9439 = vmatmul.mubr.msk.f32.gmra.mrb[50].mxu1 %vm488_vm7, %v5344_v60  ;;  %v5617_v60 = vld [vmem:[%s13591_s4 + $0x138] sm:$0xff] }
 0xb08   :  { %9441 = vmatprep.mubr.msk.f32.mxu1 %vm488_vm7, %v5345_v61  ;;  %10510 = vmatpush1.bf16.msra.mxu1 %v10509_v4  ;;  %v10571_v19 = vpack.c.bf16 %v5617_v60, %v5612_v3 }
 0xb09   :  { %10512 = vmatprep.subr.bf16.mxu1 %v10511_v6 }
 0xb0b   :  { %9442 = vmatmul.mubr.msk.f32.gmra.mrb[52].mxu1 %vm488_vm7, %v5346_v47 }
 0xb0c   :  { %9444 = vmatprep.mubr.msk.f32.mxu1 %vm488_vm7, %v5347_v5  ;;  %10514 = vmatpush1.bf16.msra.mxu1 %v10513_v22 }
 0xb0d   :  { %10516 = vmatprep.subr.bf16.mxu1 %v10515_v48 }
 0xb0f   :  { %9445 = vmatmul.mubr.msk.f32.gmra.mrb[54].mxu1 %vm488_vm7, %v5348_v59 }
 0xb10   :  { %9447 = vmatprep.mubr.msk.f32.mxu1 %vm488_vm7, %v5349_v1  ;;  %10518 = vmatpush1.bf16.msra.mxu1 %v10517_v63 }
 0xb11   :  { %10520 = vmatprep.subr.bf16.mxu1 %v10519_v7  ;;  %v10579_v7 = vpack.c.bf16 %v5637_v25, %v5632_v11 }
 0xb13   :  { %9448 = vmatmul.mubr.msk.f32.gmra.mrb[56].mxu1 %vm488_vm7, %v5350_v28 }
 0xb14   :  { %9450 = vmatprep.mubr.msk.f32.mxu1 %vm488_vm7, %v5351_v10  ;;  %10522 = vmatpush1.bf16.msra.mxu1 %v10521_v9 }
 0xb15   :  { %10524 = vmatprep.subr.bf16.mxu1 %v10523_v45 }
 0xb17   :  { %9451 = vmatmul.mubr.msk.f32.gmra.mrb[58].mxu1 %vm488_vm7, %v5352_v12 }
 0xb18   :  { %5722 = vmatprep.mubr.f32.mxu1 %v11497_v0  ;;  %10526 = vmatpush1.bf16.msra.mxu1 %v10525_v23 }
 0xb19   :  { %10560 = vmatprep.subr.bf16.mxu1 %v10559_v27 }
 0xbce   :  { %v9431_v52 = vpop.f32.mrb[44].mxu1 }
 0xbcf   :  { %v5467_v31 = vpop.f32.mrb[45].mxu1  ;;  %v10800_v32 = vadd.f32 %v9431_v52, %v12890_v13 }
 0xbd0   :  { %v10801_v20 = vadd.f32 %v12890_v13, %v5467_v31 }
 0xbd1   :  { %v12904_v24 = vmax.f32 %v10800_v32, 0.0 }
 0xbd2   :  { %v12896_v33 = vmax.f32 %v10801_v20, 0.0  ;;  %v9434_v54 = vpop.f32.mrb[46].mxu1 }
 0xbd3   :  { %v5477_v36 = vpop.f32.mrb[47].mxu1  ;;  %v10802_v4 = vadd.f32 %v9434_v54, %v12890_v13 }
 0xbd4   :  { %5723 = vmatmul.mubr.f32.vlgmr.msra.gmra.mrb[60].mxu1 %v12896_v33  ;;  %5884 = vmatmul.mubr.f32.vlgmr.msra.gmra.mrb[70].mxu0 %v12896_v33  ;;  %v10803_v35 = vadd.f32 %v12890_v13, %v5477_v36 }
 0xbd5   :  { %5728 = vmatprep.mubr.f32.mxu1 %v11497_v0  ;;  %5889 = vmatprep.mubr.f32.mxu0 %v11497_v0  ;;  %v12922_v47 = vmax.f32 %v10802_v4, 0.0 }
 0xbd6   :  { %v9437_v57 = vpop.f32.mrb[48].mxu1  ;;  %10562 = vmatpush3.bf16.msra.mxu1 %v10559_v27  ;;  %v12914_v61 = vmax.f32 %v10803_v35, 0.0 }
 0xbd7   :  { %v5487_v58 = vpop.f32.mrb[49].mxu1  ;;  %10564 = vmatprep.subr.bf16.mxu1 %v10563_v15  ;;  %v10804_v34 = vadd.f32 %v9437_v57, %v12890_v13 }
 0xbd8   :  { %5729 = vmatmul.mubr.f32.gmra.mrb[62].mxu1 %v12904_v24  ;;  %5890 = vmatmul.mubr.f32.gmra.mrb[72].mxu0 %v12904_v24  ;;  %v10805_v22 = vadd.f32 %v12890_v13, %v5487_v58 }
 0xbd9   :  { %5734 = vmatprep.mubr.f32.mxu1 %v11497_v0  ;;  %5895 = vmatprep.mubr.f32.mxu0 %v11497_v0  ;;  %v12940_v28 = vmax.f32 %v10804_v34, 0.0 }
 0xbda   :  { %v9440_v6 = vpop.f32.mrb[50].mxu1  ;;  %10566 = vmatpush3.bf16.msra.mxu1 %v10563_v15  ;;  %v12932_v59 = vmax.f32 %v10805_v22, 0.0 }
 0xbdb   :  { %v5497_v29 = vpop.f32.mrb[51].mxu1  ;;  %10568 = vmatprep.subr.bf16.mxu1 %v10567_v55  ;;  %v10806_v45 = vadd.f32 %v9440_v6, %v12890_v13 }
 0xbdc   :  { %5735 = vmatmul.mubr.f32.gmra.mrb[64].mxu1 %v12914_v61  ;;  %5896 = vmatmul.mubr.f32.gmra.mrb[74].mxu0 %v12914_v61  ;;  %v10807_v9 = vadd.f32 %v12890_v13, %v5497_v29 }
 0xbdd   :  { %5740 = vmatprep.mubr.f32.mxu1 %v11497_v0  ;;  %5901 = vmatprep.mubr.f32.mxu0 %v11497_v0  ;;  %v5569_v23 = vmax.f32 %v10806_v45, 0.0 }
 0xbde   :  { %v9443_v5 = vpop.f32.mrb[52].mxu1  ;;  %10570 = vmatpush3.bf16.msra.mxu1 %v10567_v55  ;;  %v12950_v26 = vmax.f32 %v10807_v9, 0.0 }
 0xbdf   :  { %v5507_v48 = vpop.f32.mrb[53].mxu1  ;;  %10572 = vmatprep.subr.bf16.mxu1 %v10571_v19  ;;  %v10808_v50 = vadd.f32 %v9443_v5, %v12890_v13 }
 0xbe0   :  { %5741 = vmatmul.mubr.f32.gmra.mrb[66].mxu1 %v12922_v47  ;;  %5902 = vmatmul.mubr.f32.gmra.mrb[76].mxu0 %v12922_v47  ;;  %v10809_v49 = vadd.f32 %v12890_v13, %v5507_v48 }
 0xbe1   :  { %5746 = vmatprep.mubr.f32.mxu1 %v11497_v0  ;;  %5907 = vmatprep.mubr.f32.mxu0 %v11497_v0  ;;  %v5571_v51 = vmax.f32 %v10808_v50, 0.0 }
 0xbe2   :  { %v9446_v63 = vpop.f32.mrb[54].mxu1  ;;  %10574 = vmatpush3.bf16.msra.mxu1 %v10571_v19  ;;  %v5570_v56 = vmax.f32 %v10809_v49, 0.0 }
 0xbe3   :  { %v5517_v1 = vpop.f32.mrb[55].mxu1  ;;  %10576 = vmatprep.subr.bf16.mxu1 %v10575_v62  ;;  %v10810_v27 = vadd.f32 %v9446_v63, %v12890_v13 }
 0xbe4   :  { %5747 = vmatmul.mubr.f32.gmra.mrb[68].mxu1 %v12932_v59  ;;  %5908 = vmatmul.mubr.f32.gmra.mrb[78].mxu0 %v12932_v59  ;;  %v10811_v41 = vadd.f32 %v12890_v13, %v5517_v1 }
 0xbe5   :  { %5752 = vmatprep.mubr.f32.mxu1 %v11497_v0  ;;  %5913 = vmatprep.mubr.f32.mxu0 %v11497_v0  ;;  %v5573_v31 = vmax.f32 %v10810_v27, 0.0 }
 0xbe6   :  { %v9449_v10 = vpop.f32.mrb[56].mxu1  ;;  %10578 = vmatpush3.bf16.msra.mxu1 %v10575_v62  ;;  %v5572_v52 = vmax.f32 %v10811_v41, 0.0 }
 0xbe7   :  { %v5527_v12 = vpop.f32.mrb[57].mxu1  ;;  %10580 = vmatprep.subr.bf16.mxu1 %v10579_v7  ;;  %v10812_v14 = vadd.f32 %v9449_v10, %v12890_v13 }
 0xbe8   :  { %5753 = vmatmul.mubr.f32.gmra.mrb[70].mxu1 %v12940_v28  ;;  %5914 = vmatmul.mubr.f32.gmra.mrb[80].mxu0 %v12940_v28  ;;  %v10813_v20 = vadd.f32 %v12890_v13, %v5527_v12 }
 0xbe9   :  { %5758 = vmatprep.mubr.f32.mxu1 %v11497_v0  ;;  %5919 = vmatprep.mubr.f32.mxu0 %v11497_v0  ;;  %v5575_v32 = vmax.f32 %v10812_v14, 0.0 }
 0xbea   :  { %v9452_v30 = vpop.f32.mrb[58].mxu1  ;;  %10582 = vmatpush3.bf16.msra.mxu1 %v10579_v7  ;;  %v5574_v53 = vmax.f32 %v10813_v20, 0.0 }
 0xbeb   :  { %v5537_v38 = vpop.f32.mrb[59].mxu1  ;;  %10584 = vmatprep.subr.bf16.mxu1 %v10583_v16  ;;  %v10814_v36 = vadd.f32 %v9452_v30, %v12890_v13 }
 0xbec   :  { %5759 = vmatmul.mubr.f32.gmra.mrb[72].mxu1 %v12950_v26  ;;  %5920 = vmatmul.mubr.f32.gmra.mrb[82].mxu0 %v12950_v26  ;;  %v10815_v54 = vadd.f32 %v12890_v13, %v5537_v38  ;;  %v6126_v13 = vld [vmem:[%s13592_s13] sm:$0xff] }
 0xbed   :  { %5764 = vmatprep.mubr.f32.mxu1 %v11497_v0  ;;  %5925 = vmatprep.mubr.f32.mxu0 %v11497_v0  ;;  %v5577_v37 = vmax.f32 %v10814_v36, 0.0 }
 0xbee   :  { %10586 = vmatpush3.bf16.msra.mxu1 %v10583_v16  ;;  %v5576_v15 = vmax.f32 %v10815_v54, 0.0 }
 0xbef   :  { %10588 = vmatprep.subr.bf16.mxu1 %v10587_v21 }
 0xbf0   :  { %5765 = vmatmul.mubr.f32.gmra.mrb[74].mxu1 %v5569_v23  ;;  %5926 = vmatmul.mubr.f32.gmra.mrb[84].mxu0 %v5569_v23 }
 0xbf1   :  { %5770 = vmatprep.mubr.f32.mxu1 %v11497_v0  ;;  %5931 = vmatprep.mubr.f32.mxu0 %v11497_v0 }
 0xbf2   :  { %10590 = vmatpush3.bf16.msra.mxu1 %v10587_v21 }
 0xbf4   :  { %5771 = vmatmul.mubr.f32.gmra.mrb[76].mxu1 %v5570_v56  ;;  %5932 = vmatmul.mubr.f32.gmra.mrb[86].mxu0 %v5570_v56 }
 0xbf5   :  { %5776 = vmatprep.mubr.f32.mxu1 %v11497_v0  ;;  %5937 = vmatprep.mubr.f32.mxu0 %v11497_v0 }
 0xbf8   :  { %5777 = vmatmul.mubr.f32.gmra.mrb[78].mxu1 %v5571_v51  ;;  %5938 = vmatmul.mubr.f32.gmra.mrb[88].mxu0 %v5571_v51 }
 0xbf9   :  { %5782 = vmatprep.mubr.f32.mxu1 %v11497_v0  ;;  %5943 = vmatprep.mubr.f32.mxu0 %v11497_v0 }
 0xbfc   :  { %5783 = vmatmul.mubr.f32.gmra.mrb[80].mxu1 %v5572_v52  ;;  %5944 = vmatmul.mubr.f32.gmra.mrb[90].mxu0 %v5572_v52 }
 0xbfd   :  { %5788 = vmatprep.mubr.f32.mxu1 %v11497_v0  ;;  %5949 = vmatprep.mubr.f32.mxu0 %v11497_v0 }
 0xc00   :  { %5789 = vmatmul.mubr.f32.gmra.mrb[82].mxu1 %v5573_v31  ;;  %5950 = vmatmul.mubr.f32.gmra.mrb[92].mxu0 %v5573_v31 }
 0xc01   :  { %5794 = vmatprep.mubr.f32.mxu1 %v11497_v0  ;;  %5955 = vmatprep.mubr.f32.mxu0 %v11497_v0 }
 0xc04   :  { %5795 = vmatmul.mubr.f32.gmra.mrb[84].mxu1 %v5574_v53  ;;  %5956 = vmatmul.mubr.f32.gmra.mrb[94].mxu0 %v5574_v53 }
 0xc05   :  { %5800 = vmatprep.mubr.f32.mxu1 %v11497_v0  ;;  %5961 = vmatprep.mubr.f32.mxu0 %v11497_v0 }
 0xc08   :  { %5801 = vmatmul.mubr.f32.gmra.mrb[86].mxu1 %v5575_v32  ;;  %5962 = vmatmul.mubr.f32.gmra.mrb[96].mxu0 %v5575_v32 }
 0xc09   :  { %5806 = vmatprep.mubr.f32.mxu1 %v11497_v0  ;;  %5967 = vmatprep.mubr.f32.mxu0 %v11497_v0 }
 0xc0c   :  { %5807 = vmatmul.mubr.f32.gmra.mrb[88].mxu1 %v5576_v15  ;;  %5968 = vmatmul.mubr.f32.gmra.mrb[98].mxu0 %v5576_v15 }
 0xc0d   :  { %5812 = vmatprep.mubr.f32.mxu1 %v11497_v0  ;;  %5973 = vmatprep.mubr.f32.mxu0 %v11497_v0 }
 0xc10   :  { %5813 = vmatmul.mubr.f32.gmra.mrb[90].mxu1 %v5577_v37  ;;  %5974 = vmatmul.mubr.f32.gmra.mrb[100].mxu0 %v5577_v37 }
 0xc11   :  { %9485 = vmatprep.mubr.f32.mxu1 %v12896_v33  ;;  %9541 = vmatprep.mubr.f32.mxu0 %v6126_v13 }
 0xc14   :  { %9486 = vmatmul.mubr.f32.vlgmr.msra.gmra.mrb[92].mxu1 %v12904_v24 }
 0xc15   :  { %9488 = vmatprep.mubr.f32.mxu1 %v12914_v61 }
 0xc18   :  { %9489 = vmatmul.mubr.f32.gmra.mrb[94].mxu1 %v12922_v47 }
 0xc19   :  { %9491 = vmatprep.mubr.f32.mxu1 %v12932_v59 }
 0xc1c   :  { %9492 = vmatmul.mubr.f32.gmra.mrb[96].mxu1 %v12940_v28 }
 0xc1d   :  { %9494 = vmatprep.mubr.f32.mxu1 %v12950_v26 }
 0xc20   :  { %9495 = vmatmul.mubr.f32.gmra.mrb[98].mxu1 %v5569_v23 }
 0xc21   :  { %9497 = vmatprep.mubr.f32.mxu1 %v5570_v56 }
 0xc24   :  { %9498 = vmatmul.mubr.f32.gmra.mrb[100].mxu1 %v5571_v51 }
 0xc25   :  { %9500 = vmatprep.mubr.f32.mxu1 %v5572_v52 }
 0xc28   :  { %9501 = vmatmul.mubr.f32.gmra.mrb[102].mxu1 %v5573_v31 }
 0xc29   :  { %9503 = vmatprep.mubr.f32.mxu1 %v5574_v53 }
 0xc2c   :  { %9504 = vmatmul.mubr.f32.gmra.mrb[104].mxu1 %v5575_v32 }
 0xc2d   :  { %9506 = vmatprep.mubr.f32.mxu1 %v5576_v15 }
 0xc30   :  { %9507 = vmatmul.mubr.f32.gmra.mrb[106].mxu1 %v5577_v37 }
 0xc31   :  { %7717 = vmatprep.mubr.f32.mxu1 %v11497_v0 }
 0xca7   :  { %v5724_v33 = vpop.f32.mrb[60].mxu1  ;;  %v5885_v39 = vpop.f32.mrb[70].mxu0 }
 0xca8   :  { %v5726_v24 = vpop.f32.mrb[61].mxu1  ;;  %v5887_v35 = vpop.f32.mrb[71].mxu0 }
 0xcab   :  { %v5730_v57 = vpop.f32.mrb[62].mxu1  ;;  %v5891_v58 = vpop.f32.mrb[72].mxu0 }
 0xcac   :  { %v10591_v55 = vpack.c.bf16 %v5730_v57, %v5724_v33  ;;  %v12989_v3 = vpack.c.bf16 %v5891_v58, %v5885_v39  ;;  %v5732_v60 = vpop.f32.mrb[63].mxu1  ;;  %v5893_v4 = vpop.f32.mrb[73].mxu0 }
 0xcad   :  { %v12991_v61 = vpack.c.bf16 %v5732_v60, %v5726_v24  ;;  %v12993_v6 = vpack.c.bf16 %v5893_v4, %v5887_v35 }
 0xcae   :  { %10592 = vmatprep.subr.bf16.mxu0 %v10591_v55 }
 0xcaf   :  { %v5736_v29 = vpop.f32.mrb[64].mxu1  ;;  %v5897_v19 = vpop.f32.mrb[74].mxu0  ;;  %10594 = vmatpush3.bf16.msra.mxu0 %v10591_v55 }
 0xcb0   :  { %v5738_v40 = vpop.f32.mrb[65].mxu1  ;;  %v5899_v42 = vpop.f32.mrb[75].mxu0 }
 0xcb3   :  { %v5742_v47 = vpop.f32.mrb[66].mxu1  ;;  %v5903_v22 = vpop.f32.mrb[76].mxu0 }
 0xcb4   :  { %v10595_v5 = vpack.c.bf16 %v5742_v47, %v5736_v29  ;;  %v12995_v48 = vpack.c.bf16 %v5903_v22, %v5897_v19  ;;  %v5744_v62 = vpop.f32.mrb[67].mxu1  ;;  %v5905_v11 = vpop.f32.mrb[77].mxu0 }
 0xcb5   :  { %v12997_v25 = vpack.c.bf16 %v5744_v62, %v5738_v40  ;;  %v12999_v34 = vpack.c.bf16 %v5905_v11, %v5899_v42 }
 0xcb6   :  { %10596 = vmatprep.subr.bf16.mxu0 %v10595_v5 }
 0xcb7   :  { %v5748_v59 = vpop.f32.mrb[68].mxu1  ;;  %v5909_v63 = vpop.f32.mrb[78].mxu0  ;;  %10598 = vmatpush3.bf16.msra.mxu0 %v10595_v5 }
 0xcb8   :  { %v5750_v1 = vpop.f32.mrb[69].mxu1  ;;  %v5911_v7 = vpop.f32.mrb[79].mxu0 }
 0xcbb   :  { %v5754_v2 = vpop.f32.mrb[70].mxu1  ;;  %v5915_v8 = vpop.f32.mrb[80].mxu0 }
 0xcbc   :  { %v10599_v28 = vpack.c.bf16 %v5754_v2, %v5748_v59  ;;  %v13001_v9 = vpack.c.bf16 %v5915_v8, %v5909_v63  ;;  %v5756_v10 = vpop.f32.mrb[71].mxu1  ;;  %v5917_v12 = vpop.f32.mrb[81].mxu0 }
 0xcbd   :  { %v13003_v16 = vpack.c.bf16 %v5756_v10, %v5750_v1  ;;  %v13005_v17 = vpack.c.bf16 %v5917_v12, %v5911_v7 }
 0xcbe   :  { %10600 = vmatprep.subr.bf16.mxu0 %v10599_v28 }
 0xcbf   :  { %v5760_v18 = vpop.f32.mrb[72].mxu1  ;;  %v5921_v45 = vpop.f32.mrb[82].mxu0  ;;  %10602 = vmatpush3.bf16.msra.mxu0 %v10599_v28 }
 0xcc0   :  { %v5762_v26 = vpop.f32.mrb[73].mxu1  ;;  %v5923_v30 = vpop.f32.mrb[83].mxu0 }
 0xcc3   :  { %v5766_v38 = vpop.f32.mrb[74].mxu1  ;;  %v5927_v21 = vpop.f32.mrb[84].mxu0 }
 0xcc4   :  { %v10603_v23 = vpack.c.bf16 %v5766_v38, %v5760_v18  ;;  %v13007_v49 = vpack.c.bf16 %v5927_v21, %v5921_v45  ;;  %v5768_v50 = vpop.f32.mrb[75].mxu1  ;;  %v5929_v56 = vpop.f32.mrb[85].mxu0 }
 0xcc5   :  { %v13009_v51 = vpack.c.bf16 %v5768_v50, %v5762_v26  ;;  %v13011_v41 = vpack.c.bf16 %v5929_v56, %v5923_v30 }
 0xcc6   :  { %10604 = vmatprep.subr.bf16.mxu0 %v10603_v23 }
 0xcc7   :  { %v5772_v27 = vpop.f32.mrb[76].mxu1  ;;  %v5933_v52 = vpop.f32.mrb[86].mxu0  ;;  %10606 = vmatpush3.bf16.msra.mxu0 %v10603_v23 }
 0xcc8   :  { %v5774_v31 = vpop.f32.mrb[77].mxu1  ;;  %v5935_v20 = vpop.f32.mrb[87].mxu0 }
 0xccb   :  { %v5778_v14 = vpop.f32.mrb[78].mxu1  ;;  %v5939_v53 = vpop.f32.mrb[88].mxu0 }
 0xccc   :  { %v10607_v32 = vpack.c.bf16 %v5778_v14, %v5772_v27  ;;  %v13013_v54 = vpack.c.bf16 %v5939_v53, %v5933_v52  ;;  %v5780_v36 = vpop.f32.mrb[79].mxu1  ;;  %v5941_v15 = vpop.f32.mrb[89].mxu0  ;;  %v6127_v52 = vld [vmem:[%s13592_s13 + $0x28] sm:$0xff] }
 0xccd   :  { %v13015_v37 = vpack.c.bf16 %v5780_v36, %v5774_v31  ;;  %v13017_v13 = vpack.c.bf16 %v5941_v15, %v5935_v20  ;;  %v6128_v20 = vld [vmem:[%s13592_s13 + $0x50] sm:$0xff]  ;;  %v6130_v15 = vld [vmem:[%s13592_s13 + $0xa0] sm:$0xff] }
 0xcce   :  { %10608 = vmatprep.subr.bf16.mxu0 %v10607_v32 }
 0xccf   :  { %v5784_v33 = vpop.f32.mrb[80].mxu1  ;;  %v5945_v39 = vpop.f32.mrb[90].mxu0  ;;  %10610 = vmatpush3.bf16.msra.mxu0 %v10607_v32  ;;  %v6129_v32 = vld [vmem:[%s13592_s13 + $0x78] sm:$0xff] }
 0xcd0   :  { %v5786_v24 = vpop.f32.mrb[81].mxu1  ;;  %v5947_v35 = vpop.f32.mrb[91].mxu0 }
 0xcd3   :  { %v5790_v57 = vpop.f32.mrb[82].mxu1  ;;  %v5951_v58 = vpop.f32.mrb[92].mxu0 }
 0xcd4   :  { %v10611_v55 = vpack.c.bf16 %v5790_v57, %v5784_v33  ;;  %v13019_v60 = vpack.c.bf16 %v5951_v58, %v5945_v39  ;;  %v5792_v4 = vpop.f32.mrb[83].mxu1  ;;  %v5953_v29 = vpop.f32.mrb[93].mxu0 }
 0xcd5   :  { %v13021_v19 = vpack.c.bf16 %v5792_v4, %v5786_v24  ;;  %v13023_v40 = vpack.c.bf16 %v5953_v29, %v5947_v35  ;;  %v6131_v24 = vld [vmem:[%s13592_s13 + $0xc8] sm:$0xff] }
 0xcd6   :  { %10612 = vmatprep.subr.bf16.mxu0 %v10611_v55 }
 0xcd7   :  { %v5796_v42 = vpop.f32.mrb[84].mxu1  ;;  %v5957_v47 = vpop.f32.mrb[94].mxu0  ;;  %10614 = vmatpush3.bf16.msra.mxu0 %v10611_v55  ;;  %v6133_v55 = vld [vmem:[%s13592_s13 + $0x118] sm:$0xff] }
 0xcd8   :  { %v5798_v22 = vpop.f32.mrb[85].mxu1  ;;  %v5959_v5 = vpop.f32.mrb[95].mxu0 }
 0xcdb   :  { %v5802_v62 = vpop.f32.mrb[86].mxu1  ;;  %v5963_v11 = vpop.f32.mrb[96].mxu0 }
 0xcdc   :  { %v10615_v59 = vpack.c.bf16 %v5802_v62, %v5796_v42  ;;  %v13025_v63 = vpack.c.bf16 %v5963_v11, %v5957_v47  ;;  %v5804_v1 = vpop.f32.mrb[87].mxu1  ;;  %v5965_v7 = vpop.f32.mrb[97].mxu0  ;;  %v6135_v47 = vld [vmem:[%s13592_s13 + $0x168] sm:$0xff]  ;;  %v6137_v11 = vld [vmem:[%s13592_s13 + $0x1b8] sm:$0xff] }
 0xcdd   :  { %v13027_v2 = vpack.c.bf16 %v5804_v1, %v5798_v22  ;;  %v13029_v8 = vpack.c.bf16 %v5965_v7, %v5959_v5 }
 0xcde   :  { %10616 = vmatprep.subr.bf16.mxu0 %v10615_v59 }
 0xcdf   :  { %v5808_v28 = vpop.f32.mrb[88].mxu1  ;;  %v5969_v10 = vpop.f32.mrb[98].mxu0  ;;  %10618 = vmatpush3.bf16.msra.mxu0 %v10615_v59 }
 0xce0   :  { %v5810_v12 = vpop.f32.mrb[89].mxu1  ;;  %v5971_v18 = vpop.f32.mrb[99].mxu0 }
 0xce3   :  { %v5814_v45 = vpop.f32.mrb[90].mxu1  ;;  %v5975_v26 = vpop.f32.mrb[100].mxu0 }
 0xce4   :  { %v10619_v30 = vpack.c.bf16 %v5814_v45, %v5808_v28  ;;  %v13031_v38 = vpack.c.bf16 %v5975_v26, %v5969_v10  ;;  %v5816_v21 = vpop.f32.mrb[91].mxu1  ;;  %v5977_v23 = vpop.f32.mrb[101].mxu0  ;;  %v6139_v28 = vld [vmem:[%s13592_s13 + $0x208] sm:$0xff]  ;;  %v6141_v45 = vld [vmem:[%s13592_s13 + $0x258] sm:$0xff] }
 0xce5   :  { %v13033_v50 = vpack.c.bf16 %v5816_v21, %v5810_v12  ;;  %v13035_v56 = vpack.c.bf16 %v5977_v23, %v5971_v18  ;;  %v6143_v21 = vld [vmem:[%s13592_s13 + $0x2a8] sm:$0xff]  ;;  %v6145_v23 = vld [vmem:[%s13592_s13 + $0x2f8] sm:$0xff] }
 0xce6   :  { %10620 = vmatprep.subr.bf16.mxu0 %v10619_v30 }
 0xce7   :  { %v9487_v27 = vpop.f32.mrb[92].mxu1  ;;  %10622 = vmatpush3.bf16.msra.mxu0 %v10619_v30 }
 0xce8   :  { %v6046_v31 = vpop.f32.mrb[93].mxu1  ;;  %10624 = vmatprep.subr.bf16.mxu0 %v12991_v61 }
 0xce9   :  { %v13040_v14 = vpack.c.bf16 %v9487_v27, %v6046_v31  ;;  %v6146_v27 = vld [vmem:[%s13592_s13 + $0x320] sm:$0xff]  ;;  %v6148_v31 = vld [vmem:[%s13592_s13 + $0x370] sm:$0xff] }
 0xcea   :  { %9542 = vmatmul.mubr.f32.vlgmr.msra.gmra.mrb[102].mxu0 %v6127_v52  ;;  %v6147_v52 = vld [vmem:[%s13592_s13 + $0x348] sm:$0xff] }
 0xceb   :  { %v9490_v53 = vpop.f32.mrb[94].mxu1  ;;  %10626 = vmatpush3.bf16.msra.mxu0 %v12991_v61  ;;  %9544 = vmatprep.mubr.f32.mxu0 %v6128_v20  ;;  %v6132_v61 = vld [vmem:[%s13592_s13 + $0xf0] sm:$0xff]  ;;  %v6150_v20 = vld [vmem:[%s13592_s13 + $0x3c0] sm:$0xff] }
 0xcec   :  { %v6056_v36 = vpop.f32.mrb[95].mxu1  ;;  %10628 = vmatprep.subr.bf16.mxu0 %v12997_v25 }
 0xced   :  { %v13046_v33 = vpack.c.bf16 %v9490_v53, %v6056_v36  ;;  %v6151_v53 = vld [vmem:[%s13592_s13 + $0x3e8] sm:$0xff]  ;;  %v6153_v36 = vld [vmem:[%s13592_s13 + $0x438] sm:$0xff] }
 0xcee   :  { %9545 = vmatmul.mubr.f32.gmra.mrb[104].mxu0 %v6129_v32  ;;  %v6152_v32 = vld [vmem:[%s13592_s13 + $0x410] sm:$0xff] }
 0xcef   :  { %v9493_v39 = vpop.f32.mrb[96].mxu1  ;;  %10630 = vmatpush3.bf16.msra.mxu0 %v12997_v25  ;;  %9547 = vmatprep.mubr.f32.mxu0 %v6130_v15  ;;  %v6134_v25 = vld [vmem:[%s13592_s13 + $0x140] sm:$0xff] }
 0xcf0   :  { %v6066_v35 = vpop.f32.mrb[97].mxu1  ;;  %10632 = vmatprep.subr.bf16.mxu0 %v13003_v16  ;;  %v6154_v15 = vld [vmem:[%s13592_s13 + $0x460] sm:$0xff] }
 0xcf1   :  { %v13052_v57 = vpack.c.bf16 %v9493_v39, %v6066_v35  ;;  %v6155_v39 = vld [vmem:[%s13592_s13 + $0x488] sm:$0xff]  ;;  %v6157_v35 = vld [vmem:[%s13592_s13 + $0x4d8] sm:$0xff] }
 0xcf2   :  { %9548 = vmatmul.mubr.f32.gmra.mrb[106].mxu0 %v6131_v24  ;;  %v6156_v24 = vld [vmem:[%s13592_s13 + $0x4b0] sm:$0xff] }
 0xcf3   :  { %v9496_v58 = vpop.f32.mrb[98].mxu1  ;;  %10634 = vmatpush3.bf16.msra.mxu0 %v13003_v16  ;;  %9550 = vmatprep.mubr.f32.mxu0 %v6132_v61  ;;  %v6136_v16 = vld [vmem:[%s13592_s13 + $0x190] sm:$0xff]  ;;  %v6421_v61 = vld [vmem:[%s13592_s13 + $0x8] sm:$0xff] }
 0xcf4   :  { %v6076_v4 = vpop.f32.mrb[99].mxu1  ;;  %10636 = vmatprep.subr.bf16.mxu0 %v13009_v51 }
 0xcf5   :  { %v13058_v29 = vpack.c.bf16 %v9496_v58, %v6076_v4  ;;  %v6422_v58 = vld [vmem:[%s13592_s13 + $0x30] sm:$0xff]  ;;  %v6424_v4 = vld [vmem:[%s13592_s13 + $0x80] sm:$0xff] }
 0xcf6   :  { %9551 = vmatmul.mubr.f32.gmra.mrb[108].mxu0 %v6133_v55  ;;  %v6423_v55 = vld [vmem:[%s13592_s13 + $0x58] sm:$0xff] }
 0xcf7   :  { %v9499_v42 = vpop.f32.mrb[100].mxu1  ;;  %10638 = vmatpush3.bf16.msra.mxu0 %v13009_v51  ;;  %9553 = vmatprep.mubr.f32.mxu0 %v6134_v25  ;;  %v6138_v51 = vld [vmem:[%s13592_s13 + $0x1e0] sm:$0xff]  ;;  %v6425_v25 = vld [vmem:[%s13592_s13 + $0xa8] sm:$0xff] }
 0xcf8   :  { %v6086_v22 = vpop.f32.mrb[101].mxu1  ;;  %10640 = vmatprep.subr.bf16.mxu0 %v13015_v37 }
 0xcf9   :  { %v13064_v5 = vpack.c.bf16 %v9499_v42, %v6086_v22  ;;  %v6426_v42 = vld [vmem:[%s13592_s13 + $0xd0] sm:$0xff]  ;;  %v6429_v22 = vld [vmem:[%s13592_s13 + $0x148] sm:$0xff] }
 0xcfa   :  { %9554 = vmatmul.mubr.f32.gmra.mrb[110].mxu0 %v6135_v47  ;;  %v6427_v47 = vld [vmem:[%s13592_s13 + $0xf8] sm:$0xff] }
 0xcfb   :  { %v9502_v62 = vpop.f32.mrb[102].mxu1  ;;  %10642 = vmatpush3.bf16.msra.mxu0 %v13015_v37  ;;  %9556 = vmatprep.mubr.f32.mxu0 %v6136_v16  ;;  %v6140_v37 = vld [vmem:[%s13592_s13 + $0x230] sm:$0xff]  ;;  %v6431_v16 = vld [vmem:[%s13592_s13 + $0x198] sm:$0xff] }
 0xcfc   :  { %v6096_v59 = vpop.f32.mrb[103].mxu1  ;;  %10644 = vmatprep.subr.bf16.mxu0 %v13021_v19 }
 0xcfd   :  { %v13070_v1 = vpack.c.bf16 %v9502_v62, %v6096_v59  ;;  %v6433_v62 = vld [vmem:[%s13592_s13 + $0x1e8] sm:$0xff] }
 0xcfe   :  { %9557 = vmatmul.mubr.f32.gmra.mrb[112].mxu0 %v6137_v11  ;;  %v6435_v11 = vld [vmem:[%s13592_s13 + $0x238] sm:$0xff]  ;;  %v6437_v59 = vld [vmem:[%s13592_s13 + $0x288] sm:$0xff] }
 0xcff   :  { %v9505_v7 = vpop.f32.mrb[104].mxu1  ;;  %10646 = vmatpush3.bf16.msra.mxu0 %v13021_v19  ;;  %9559 = vmatprep.mubr.f32.mxu0 %v6138_v51  ;;  %v6142_v19 = vld [vmem:[%s13592_s13 + $0x280] sm:$0xff]  ;;  %v6439_v51 = vld [vmem:[%s13592_s13 + $0x2d8] sm:$0xff] }
 0xd00   :  { %v6106_v10 = vpop.f32.mrb[105].mxu1  ;;  %10648 = vmatprep.subr.bf16.mxu0 %v13027_v2 }
 0xd01   :  { %v13076_v12 = vpack.c.bf16 %v9505_v7, %v6106_v10  ;;  %v6441_v7 = vld [vmem:[%s13592_s13 + $0x328] sm:$0xff]  ;;  %v6443_v10 = vld [vmem:[%s13592_s13 + $0x378] sm:$0xff] }
 0xd02   :  { %9560 = vmatmul.mubr.f32.gmra.mrb[114].mxu0 %v6139_v28  ;;  %v6442_v28 = vld [vmem:[%s13592_s13 + $0x350] sm:$0xff] }
 0xd03   :  { %v9508_v18 = vpop.f32.mrb[106].mxu1  ;;  %10650 = vmatpush3.bf16.msra.mxu0 %v13027_v2  ;;  %9562 = vmatprep.mubr.f32.mxu0 %v6140_v37  ;;  %v6144_v2 = vld [vmem:[%s13592_s13 + $0x2d0] sm:$0xff]  ;;  %v6445_v37 = vld [vmem:[%s13592_s13 + $0x3c8] sm:$0xff] }
 0xd04   :  { %v6116_v26 = vpop.f32.mrb[107].mxu1  ;;  %10652 = vmatprep.subr.bf16.mxu0 %v13033_v50 }
 0xd05   :  { %v13082_v30 = vpack.c.bf16 %v9508_v18, %v6116_v26  ;;  %v6446_v18 = vld [vmem:[%s13592_s13 + $0x3f0] sm:$0xff]  ;;  %v6448_v26 = vld [vmem:[%s13592_s13 + $0x440] sm:$0xff] }
 0xd06   :  { %9563 = vmatmul.mubr.f32.gmra.mrb[116].mxu0 %v6141_v45  ;;  %v6447_v45 = vld [vmem:[%s13592_s13 + $0x418] sm:$0xff] }
 0xd07   :  { %10654 = vmatpush3.bf16.msra.mxu0 %v13033_v50  ;;  %9565 = vmatprep.mubr.f32.mxu0 %v6142_v19  ;;  %v6149_v50 = vld [vmem:[%s13592_s13 + $0x398] sm:$0xff]  ;;  %v6449_v19 = vld [vmem:[%s13592_s13 + $0x468] sm:$0xff] }
 0xd08   :  { %10656 = vmatprep.subr.bf16.mxu0 %v12989_v3 }
 0xd0a   :  { %9566 = vmatmul.mubr.f32.gmra.mrb[118].mxu0 %v6143_v21  ;;  %v6450_v21 = vld [vmem:[%s13592_s13 + $0x490] sm:$0xff] }
 0xd0b   :  { %9568 = vmatprep.mubr.f32.mxu0 %v6144_v2  ;;  %v6451_v2 = vld [vmem:[%s13592_s13 + $0x4b8] sm:$0xff] }
 0xd0e   :  { %9569 = vmatmul.mubr.f32.gmra.mrb[120].mxu0 %v6145_v23  ;;  %v6452_v23 = vld [vmem:[%s13592_s13 + $0x4e0] sm:$0xff] }
 0xd0f   :  { %9571 = vmatprep.mubr.f32.mxu0 %v6146_v27  ;;  %v6710_v27 = vld [vmem:[%s13592_s13 + $0x10] sm:$0xff] }
 0xd12   :  { %9572 = vmatmul.mubr.f32.gmra.mrb[122].mxu0 %v6147_v52  ;;  %v6711_v52 = vld [vmem:[%s13592_s13 + $0x38] sm:$0xff] }
 0xd13   :  { %9574 = vmatprep.mubr.f32.mxu0 %v6148_v31  ;;  %v6712_v31 = vld [vmem:[%s13592_s13 + $0x60] sm:$0xff] }
 0xd16   :  { %9575 = vmatmul.mubr.f32.gmra.mrb[124].mxu0 %v6149_v50  ;;  %v6713_v50 = vld [vmem:[%s13592_s13 + $0x88] sm:$0xff] }
 0xd17   :  { %9577 = vmatprep.mubr.f32.mxu0 %v6150_v20  ;;  %v6714_v20 = vld [vmem:[%s13592_s13 + $0xb0] sm:$0xff] }
 0xd1a   :  { %9578 = vmatmul.mubr.f32.gmra.mrb[126].mxu0 %v6151_v53  ;;  %v6715_v53 = vld [vmem:[%s13592_s13 + $0xd8] sm:$0xff] }
 0xd1b   :  { %9580 = vmatprep.mubr.f32.mxu0 %v6152_v32  ;;  %v6716_v32 = vld [vmem:[%s13592_s13 + $0x100] sm:$0xff] }
 0xd1e   :  { %9581 = vmatmul.mubr.f32.gmra.mrb[128].mxu0 %v6153_v36  ;;  %v6718_v36 = vld [vmem:[%s13592_s13 + $0x150] sm:$0xff] }
 0xd1f   :  { %9583 = vmatprep.mubr.f32.mxu0 %v6154_v15  ;;  %v6720_v15 = vld [vmem:[%s13592_s13 + $0x1a0] sm:$0xff] }
 0xd22   :  { %9584 = vmatmul.mubr.f32.gmra.mrb[130].mxu0 %v6155_v39  ;;  %v6722_v39 = vld [vmem:[%s13592_s13 + $0x1f0] sm:$0xff] }
 0xd23   :  { %9586 = vmatprep.mubr.f32.mxu0 %v6156_v24  ;;  %v6724_v24 = vld [vmem:[%s13592_s13 + $0x240] sm:$0xff] }
 0xd26   :  { %9587 = vmatmul.mubr.f32.gmra.mrb[132].mxu0 %v6157_v35  ;;  %v6726_v35 = vld [vmem:[%s13592_s13 + $0x290] sm:$0xff] }
 0xd27   :  { %9621 = vmatprep.mubr.f32.mxu0 %v6421_v61  ;;  %v6728_v61 = vld [vmem:[%s13592_s13 + $0x2e0] sm:$0xff] }
 0xd2a   :  { %9622 = vmatmul.mubr.f32.vlgmr.msra.gmra.mrb[102].mxu0 %v6422_v58  ;;  %v6730_v58 = vld [vmem:[%s13592_s13 + $0x330] sm:$0xff] }
 0xd2b   :  { %10658 = vmatpush3.bf16.msra.mxu0 %v12989_v3  ;;  %9624 = vmatprep.mubr.f32.mxu0 %v6423_v55  ;;  %v6428_v3 = vld [vmem:[%s13592_s13 + $0x120] sm:$0xff]  ;;  %v6731_v55 = vld [vmem:[%s13592_s13 + $0x358] sm:$0xff] }
 0xd2c   :  { %10660 = vmatprep.subr.bf16.mxu0 %v12995_v48 }
 0xd2e   :  { %9625 = vmatmul.mubr.f32.gmra.mrb[104].mxu0 %v6424_v4  ;;  %v6732_v4 = vld [vmem:[%s13592_s13 + $0x380] sm:$0xff] }
 0xd2f   :  { %10662 = vmatpush3.bf16.msra.mxu0 %v12995_v48  ;;  %9627 = vmatprep.mubr.f32.mxu0 %v6425_v25  ;;  %v6430_v48 = vld [vmem:[%s13592_s13 + $0x170] sm:$0xff] }
 0xd30   :  { %10664 = vmatprep.subr.bf16.mxu0 %v13001_v9  ;;  %v6734_v25 = vld [vmem:[%s13592_s13 + $0x3d0] sm:$0xff] }
 0xd32   :  { %9628 = vmatmul.mubr.f32.gmra.mrb[106].mxu0 %v6426_v42  ;;  %v6735_v42 = vld [vmem:[%s13592_s13 + $0x3f8] sm:$0xff] }
 0xd33   :  { %10666 = vmatpush3.bf16.msra.mxu0 %v13001_v9  ;;  %9630 = vmatprep.mubr.f32.mxu0 %v6427_v47  ;;  %v6432_v9 = vld [vmem:[%s13592_s13 + $0x1c0] sm:$0xff] }
 0xd34   :  { %10668 = vmatprep.subr.bf16.mxu0 %v13007_v49  ;;  %v6736_v47 = vld [vmem:[%s13592_s13 + $0x420] sm:$0xff] }
 0xd36   :  { %9631 = vmatmul.mubr.f32.gmra.mrb[108].mxu0 %v6428_v3  ;;  %v6737_v3 = vld [vmem:[%s13592_s13 + $0x448] sm:$0xff] }
 0xd37   :  { %10670 = vmatpush3.bf16.msra.mxu0 %v13007_v49  ;;  %9633 = vmatprep.mubr.f32.mxu0 %v6429_v22  ;;  %v6434_v49 = vld [vmem:[%s13592_s13 + $0x210] sm:$0xff] }
 0xd38   :  { %10672 = vmatprep.subr.bf16.mxu0 %v13013_v54  ;;  %v6738_v22 = vld [vmem:[%s13592_s13 + $0x470] sm:$0xff] }
 0xd3a   :  { %9634 = vmatmul.mubr.f32.gmra.mrb[110].mxu0 %v6430_v48  ;;  %v6739_v48 = vld [vmem:[%s13592_s13 + $0x498] sm:$0xff] }
 0xd3b   :  { %10674 = vmatpush3.bf16.msra.mxu0 %v13013_v54  ;;  %9636 = vmatprep.mubr.f32.mxu0 %v6431_v16  ;;  %v6436_v54 = vld [vmem:[%s13592_s13 + $0x260] sm:$0xff] }
 0xd3c   :  { %10676 = vmatprep.subr.bf16.mxu0 %v13019_v60  ;;  %v6740_v16 = vld [vmem:[%s13592_s13 + $0x4c0] sm:$0xff] }
 0xd3e   :  { %9637 = vmatmul.mubr.f32.gmra.mrb[112].mxu0 %v6432_v9  ;;  %v6741_v9 = vld [vmem:[%s13592_s13 + $0x4e8] sm:$0xff] }
 0xd3f   :  { %10678 = vmatpush3.bf16.msra.mxu0 %v13019_v60  ;;  %9639 = vmatprep.mubr.f32.mxu0 %v6433_v62  ;;  %v6438_v60 = vld [vmem:[%s13592_s13 + $0x2b0] sm:$0xff]  ;;  %v6999_v62 = vld [vmem:[%s13592_s13 + $0x18] sm:$0xff] }
 0xd40   :  { %10680 = vmatprep.subr.bf16.mxu0 %v13025_v63 }
 0xd42   :  { %9640 = vmatmul.mubr.f32.gmra.mrb[114].mxu0 %v6434_v49  ;;  %v7000_v49 = vld [vmem:[%s13592_s13 + $0x40] sm:$0xff] }
 0xd43   :  { %10682 = vmatpush3.bf16.msra.mxu0 %v13025_v63  ;;  %9642 = vmatprep.mubr.f32.mxu0 %v6435_v11  ;;  %v6440_v63 = vld [vmem:[%s13592_s13 + $0x300] sm:$0xff]  ;;  %v7610_v11 = vld [vmem:[%s11651_s3 + $0x8] sm:$0xff] }
 0xd44   :  { %10684 = vmatprep.subr.bf16.mxu0 %v13031_v38 }
 0xd46   :  { %9643 = vmatmul.mubr.f32.gmra.mrb[116].mxu0 %v6436_v54  ;;  %v7612_v54 = vld [vmem:[%s11651_s3 + $0x18] sm:$0xff] }
 0xd47   :  { %10686 = vmatpush3.bf16.msra.mxu0 %v13031_v38  ;;  %9645 = vmatprep.mubr.f32.mxu0 %v6437_v59  ;;  %v6444_v38 = vld [vmem:[%s13592_s13 + $0x3a0] sm:$0xff] }
 0xd48   :  { %10688 = vmatprep.subr.bf16.mxu0 %v12993_v6  ;;  %v7609_v59 = vld [vmem:[%s11651_s3] sm:$0xff] }
 0xd4a   :  { %9646 = vmatmul.mubr.f32.gmra.mrb[118].mxu0 %v6438_v60  ;;  %v10751_v60 = vpack.c.bf16 %v7612_v54, %v7610_v11  ;;  %v7017_v11 = vld [vmem:[%s13592_s13 + $0x2e8] sm:$0xff]  ;;  %v7019_v54 = vld [vmem:[%s13592_s13 + $0x338] sm:$0xff] }
 0xd4b   :  { %9648 = vmatprep.mubr.f32.mxu0 %v6439_v51  ;;  %v7611_v51 = vld [vmem:[%s11651_s3 + $0x10] sm:$0xff] }
 0xd4c   :  { %10752 = vmatprep.subr.bf16.mxu1 %v10751_v60  ;;  %v7021_v60 = vld [vmem:[%s13592_s13 + $0x388] sm:$0xff] }
 0xd4e   :  { %9649 = vmatmul.mubr.f32.gmra.mrb[120].mxu0 %v6440_v63  ;;  %v7614_v63 = vld [vmem:[%s11651_s3 + $0x28] sm:$0xff] }
 0xd4f   :  { %9651 = vmatprep.mubr.f32.mxu0 %v6441_v7  ;;  %v7616_v7 = vld [vmem:[%s11651_s3 + $0x38] sm:$0xff] }
 0xd52   :  { %9652 = vmatmul.mubr.f32.gmra.mrb[122].mxu0 %v6442_v28  ;;  %v7001_v28 = vld [vmem:[%s13592_s13 + $0x68] sm:$0xff] }
 0xd53   :  { %9654 = vmatprep.mubr.f32.mxu0 %v6443_v10  ;;  %v10753_v10 = vpack.c.bf16 %v7611_v51, %v7609_v59  ;;  %v7020_v59 = vld [vmem:[%s13592_s13 + $0x360] sm:$0xff]  ;;  %v7023_v51 = vld [vmem:[%s13592_s13 + $0x3d8] sm:$0xff] }
 0xd55   :  { %10754 = vmatpush1.bf16.msra.mxu1 %v10753_v10  ;;  %v7027_v10 = vld [vmem:[%s13592_s13 + $0x478] sm:$0xff] }
 0xd56   :  { %9655 = vmatmul.mubr.f32.gmra.mrb[124].mxu0 %v6444_v38  ;;  %v10755_v38 = vpack.c.bf16 %v7616_v7, %v7614_v63  ;;  %v7024_v63 = vld [vmem:[%s13592_s13 + $0x400] sm:$0xff]  ;;  %v7025_v7 = vld [vmem:[%s13592_s13 + $0x428] sm:$0xff] }
 0xd57   :  { %9657 = vmatprep.mubr.f32.mxu0 %v6445_v37  ;;  %v7613_v37 = vld [vmem:[%s11651_s3 + $0x20] sm:$0xff] }
 0xd58   :  { %10756 = vmatprep.subr.bf16.mxu1 %v10755_v38  ;;  %v7028_v38 = vld [vmem:[%s13592_s13 + $0x4a0] sm:$0xff] }
 0xd5a   :  { %9658 = vmatmul.mubr.f32.gmra.mrb[126].mxu0 %v6446_v18  ;;  %v7615_v18 = vld [vmem:[%s11651_s3 + $0x30] sm:$0xff] }
 0xd5b   :  { %9660 = vmatprep.mubr.f32.mxu0 %v6447_v45  ;;  %v7618_v45 = vld [vmem:[%s11651_s3 + $0x48] sm:$0xff] }
 0xd5e   :  { %9661 = vmatmul.mubr.f32.gmra.mrb[128].mxu0 %v6448_v26  ;;  %v7620_v26 = vld [vmem:[%s11651_s3 + $0x58] sm:$0xff] }
 0xd5f   :  { %9663 = vmatprep.mubr.f32.mxu0 %v6449_v19  ;;  %v10757_v19 = vpack.c.bf16 %v7615_v18, %v7613_v37  ;;  %v7029_v37 = vld [vmem:[%s13592_s13 + $0x4c8] sm:$0xff]  ;;  %v7030_v18 = vld [vmem:[%s13592_s13 + $0x4f0] sm:$0xff] }
 0xd61   :  { %10758 = vmatpush1.bf16.msra.mxu1 %v10757_v19  ;;  %v7290_v19 = vld [vmem:[%s13592_s13 + $0x70] sm:$0xff] }
 0xd62   :  { %9664 = vmatmul.mubr.f32.gmra.mrb[130].mxu0 %v6450_v21  ;;  %v7002_v21 = vld [vmem:[%s13592_s13 + $0x90] sm:$0xff] }
 0xd63   :  { %9666 = vmatprep.mubr.f32.mxu0 %v6451_v2  ;;  %v7617_v2 = vld [vmem:[%s11651_s3 + $0x40] sm:$0xff] }
 0xd66   :  { %9667 = vmatmul.mubr.f32.gmra.mrb[132].mxu0 %v6452_v23  ;;  %v7619_v23 = vld [vmem:[%s11651_s3 + $0x50] sm:$0xff] }
 0xd67   :  { %9701 = vmatprep.mubr.f32.mxu0 %v6710_v27  ;;  %v7003_v27 = vld [vmem:[%s13592_s13 + $0xb8] sm:$0xff] }
 0xd6a   :  { %9702 = vmatmul.mubr.f32.vlgmr.msra.gmra.mrb[102].mxu0 %v6711_v52  ;;  %v10759_v52 = vpack.c.bf16 %v7620_v26, %v7618_v45  ;;  %v7288_v45 = vld [vmem:[%s13592_s13 + $0x20] sm:$0xff]  ;;  %v7289_v26 = vld [vmem:[%s13592_s13 + $0x48] sm:$0xff] }
 0xd6b   :  { %10690 = vmatpush3.bf16.msra.mxu0 %v12993_v6  ;;  %9704 = vmatprep.mubr.f32.mxu0 %v6712_v31  ;;  %v6717_v6 = vld [vmem:[%s13592_s13 + $0x128] sm:$0xff] }
 0xd6c   :  { %10692 = vmatprep.subr.bf16.mxu0 %v12999_v34  ;;  %v7622_v31 = vld [vmem:[%s11651_s3 + $0x68] sm:$0xff]  ;;  %10760 = vmatprep.subr.bf16.mxu1 %v10759_v52  ;;  %v7295_v52 = vld [vmem:[%s13592_s13 + $0x138] sm:$0xff] }
 0xd6e   :  { %9705 = vmatmul.mubr.f32.gmra.mrb[104].mxu0 %v6713_v50  ;;  %v7624_v50 = vld [vmem:[%s11651_s3 + $0x78] sm:$0xff] }
 0xd6f   :  { %10694 = vmatpush3.bf16.msra.mxu0 %v12999_v34  ;;  %9707 = vmatprep.mubr.f32.mxu0 %v6714_v20  ;;  %v6719_v34 = vld [vmem:[%s13592_s13 + $0x178] sm:$0xff]  ;;  %v7004_v20 = vld [vmem:[%s13592_s13 + $0xe0] sm:$0xff] }
 0xd70   :  { %10696 = vmatprep.subr.bf16.mxu0 %v13005_v17 }
 0xd72   :  { %9708 = vmatmul.mubr.f32.gmra.mrb[106].mxu0 %v6715_v53  ;;  %v7621_v53 = vld [vmem:[%s11651_s3 + $0x60] sm:$0xff] }
 0xd73   :  { %10698 = vmatpush3.bf16.msra.mxu0 %v13005_v17  ;;  %9710 = vmatprep.mubr.f32.mxu0 %v6716_v32  ;;  %v6721_v17 = vld [vmem:[%s13592_s13 + $0x1c8] sm:$0xff]  ;;  %v7623_v32 = vld [vmem:[%s11651_s3 + $0x70] sm:$0xff] }
 0xd74   :  { %10700 = vmatprep.subr.bf16.mxu0 %v13011_v41 }
 0xd76   :  { %9711 = vmatmul.mubr.f32.gmra.mrb[108].mxu0 %v6717_v6  ;;  %v7005_v6 = vld [vmem:[%s13592_s13 + $0x108] sm:$0xff] }
 0xd77   :  { %10702 = vmatpush3.bf16.msra.mxu0 %v13011_v41  ;;  %9713 = vmatprep.mubr.f32.mxu0 %v6718_v36  ;;  %v6723_v41 = vld [vmem:[%s13592_s13 + $0x218] sm:$0xff]  ;;  %v10763_v36 = vpack.c.bf16 %v7624_v50, %v7622_v31  ;;  %v7296_v31 = vld [vmem:[%s13592_s13 + $0x160] sm:$0xff]  ;;  %v7297_v50 = vld [vmem:[%s13592_s13 + $0x188] sm:$0xff] }
 0xd78   :  { %10704 = vmatprep.subr.bf16.mxu0 %v13017_v13 }
 0xd7a   :  { %9714 = vmatmul.mubr.f32.gmra.mrb[110].mxu0 %v6719_v34  ;;  %v7626_v34 = vld [vmem:[%s11651_s3 + $0x88] sm:$0xff] }
 0xd7b   :  { %10706 = vmatpush3.bf16.msra.mxu0 %v13017_v13  ;;  %9716 = vmatprep.mubr.f32.mxu0 %v6720_v15  ;;  %v6725_v13 = vld [vmem:[%s13592_s13 + $0x268] sm:$0xff]  ;;  %v7628_v15 = vld [vmem:[%s11651_s3 + $0x98] sm:$0xff] }
 0xd7c   :  { %10708 = vmatprep.subr.bf16.mxu0 %v13023_v40 }
 0xd7e   :  { %9717 = vmatmul.mubr.f32.gmra.mrb[112].mxu0 %v6721_v17  ;;  %v7006_v17 = vld [vmem:[%s13592_s13 + $0x130] sm:$0xff] }
 0xd7f   :  { %10710 = vmatpush3.bf16.msra.mxu0 %v13023_v40  ;;  %9719 = vmatprep.mubr.f32.mxu0 %v6722_v39  ;;  %v6727_v40 = vld [vmem:[%s13592_s13 + $0x2b8] sm:$0xff]  ;;  %v7625_v39 = vld [vmem:[%s11651_s3 + $0x80] sm:$0xff] }
 0xd80   :  { %10712 = vmatprep.subr.bf16.mxu0 %v13029_v8 }
 0xd82   :  { %9720 = vmatmul.mubr.f32.gmra.mrb[114].mxu0 %v6723_v41  ;;  %v7627_v41 = vld [vmem:[%s11651_s3 + $0x90] sm:$0xff] }
 0xd83   :  { %10714 = vmatpush3.bf16.msra.mxu0 %v13029_v8  ;;  %9722 = vmatprep.mubr.f32.mxu0 %v6724_v24  ;;  %v6729_v8 = vld [vmem:[%s13592_s13 + $0x308] sm:$0xff]  ;;  %v7007_v24 = vld [vmem:[%s13592_s13 + $0x158] sm:$0xff] }
 0xd84   :  { %10716 = vmatprep.subr.bf16.mxu0 %v13035_v56 }
 0xd86   :  { %9723 = vmatmul.mubr.f32.gmra.mrb[116].mxu0 %v6725_v13  ;;  %v10767_v13 = vpack.c.bf16 %v7628_v15, %v7626_v34  ;;  %v7304_v34 = vld [vmem:[%s13592_s13 + $0x2a0] sm:$0xff]  ;;  %v7305_v15 = vld [vmem:[%s13592_s13 + $0x2c8] sm:$0xff] }
 0xd87   :  { %10718 = vmatpush3.bf16.msra.mxu0 %v13035_v56  ;;  %9725 = vmatprep.mubr.f32.mxu0 %v6726_v35  ;;  %v6733_v56 = vld [vmem:[%s13592_s13 + $0x3a8] sm:$0xff] }
 0xd88   :  { %10720 = vmatprep.subr.bf16.mxu0 %v13040_v14  ;;  %v7630_v35 = vld [vmem:[%s11651_s3 + $0xa8] sm:$0xff] }
 0xd8a   :  { %9726 = vmatmul.mubr.f32.gmra.mrb[118].mxu0 %v6727_v40  ;;  %v7632_v40 = vld [vmem:[%s11651_s3 + $0xb8] sm:$0xff] }
 0xd8b   :  { %9728 = vmatprep.mubr.f32.mxu0 %v6728_v61  ;;  %v7008_v61 = vld [vmem:[%s13592_s13 + $0x180] sm:$0xff] }
 0xd8e   :  { %9729 = vmatmul.mubr.f32.gmra.mrb[120].mxu0 %v6729_v8  ;;  %v7629_v8 = vld [vmem:[%s11651_s3 + $0xa0] sm:$0xff] }
 0xd8f   :  { %9731 = vmatprep.mubr.f32.mxu0 %v6730_v58  ;;  %v7631_v58 = vld [vmem:[%s11651_s3 + $0xb0] sm:$0xff] }
 0xd92   :  { %9732 = vmatmul.mubr.f32.gmra.mrb[122].mxu0 %v6731_v55  ;;  %v7009_v55 = vld [vmem:[%s13592_s13 + $0x1a8] sm:$0xff] }
 0xd93   :  { %9734 = vmatprep.mubr.f32.mxu0 %v6732_v4  ;;  %v10771_v4 = vpack.c.bf16 %v7632_v40, %v7630_v35  ;;  %v7312_v35 = vld [vmem:[%s13592_s13 + $0x3e0] sm:$0xff]  ;;  %v7313_v40 = vld [vmem:[%s13592_s13 + $0x408] sm:$0xff] }
 0xd96   :  { %9735 = vmatmul.mubr.f32.gmra.mrb[124].mxu0 %v6733_v56  ;;  %v7634_v56 = vld [vmem:[%s11651_s3 + $0xc8] sm:$0xff] }
 0xd97   :  { %9737 = vmatprep.mubr.f32.mxu0 %v6734_v25  ;;  %v7636_v25 = vld [vmem:[%s11651_s3 + $0xd8] sm:$0xff] }
 0xd9a   :  { %9738 = vmatmul.mubr.f32.gmra.mrb[126].mxu0 %v6735_v42  ;;  %v10773_v42 = vpack.c.bf16 %v7631_v58, %v7629_v8  ;;  %v7316_v8 = vld [vmem:[%s13592_s13 + $0x480] sm:$0xff]  ;;  %v7317_v58 = vld [vmem:[%s13592_s13 + $0x4a8] sm:$0xff] }
 0xd9b   :  { %9740 = vmatprep.mubr.f32.mxu0 %v6736_v47  ;;  %v7633_v47 = vld [vmem:[%s11651_s3 + $0xc0] sm:$0xff] }
 0xd9e   :  { %9741 = vmatmul.mubr.f32.gmra.mrb[128].mxu0 %v6737_v3  ;;  %v7635_v3 = vld [vmem:[%s11651_s3 + $0xd0] sm:$0xff] }
 0xd9f   :  { %9743 = vmatprep.mubr.f32.mxu0 %v6738_v22  ;;  %v7011_v22 = vld [vmem:[%s13592_s13 + $0x1f8] sm:$0xff] }
 0xda2   :  { %9744 = vmatmul.mubr.f32.gmra.mrb[130].mxu0 %v6739_v48  ;;  %v10775_v48 = vpack.c.bf16 %v7636_v25, %v7634_v56  ;;  %v7638_v56 = vld [vmem:[%s11651_s3 + $0xe8] sm:$0xff]  ;;  %v7640_v25 = vld [vmem:[%s11651_s3 + $0xf8] sm:$0xff] }
 0xda3   :  { %9746 = vmatprep.mubr.f32.mxu0 %v6740_v16  ;;  %v10777_v16 = vpack.c.bf16 %v7635_v3, %v7633_v47  ;;  %v7639_v47 = vld [vmem:[%s11651_s3 + $0xf0] sm:$0xff] }
 0xda6   :  { %9747 = vmatmul.mubr.f32.gmra.mrb[132].mxu0 %v6741_v9  ;;  %v7013_v9 = vld [vmem:[%s13592_s13 + $0x248] sm:$0xff] }
 0xda7   :  { %9781 = vmatprep.mubr.f32.mxu0 %v6999_v62  ;;  %v7014_v62 = vld [vmem:[%s13592_s13 + $0x270] sm:$0xff] }
 0xdaa   :  { %9782 = vmatmul.mubr.f32.vlgmr.msra.gmra.mrb[102].mxu0 %v7000_v49  ;;  %v7016_v49 = vld [vmem:[%s13592_s13 + $0x2c0] sm:$0xff] }
 0xdab   :  { %10722 = vmatpush3.bf16.msra.mxu0 %v13040_v14  ;;  %9784 = vmatprep.mubr.f32.mxu0 %v7001_v28  ;;  %v10761_v14 = vpack.c.bf16 %v7619_v23, %v7617_v2  ;;  %v7026_v28 = vld [vmem:[%s13592_s13 + $0x450] sm:$0xff]  ;;  %v7292_v2 = vld [vmem:[%s13592_s13 + $0xc0] sm:$0xff]  ;;  %v7293_v23 = vld [vmem:[%s13592_s13 + $0xe8] sm:$0xff] }
 0xdac   :  { %10724 = vmatprep.subr.bf16.mxu0 %v13046_v33 }
 0xdad   :  { %10762 = vmatpush1.bf16.msra.mxu1 %v10761_v14  ;;  %v7298_v14 = vld [vmem:[%s13592_s13 + $0x1b0] sm:$0xff] }
 0xdae   :  { %9785 = vmatmul.mubr.f32.gmra.mrb[104].mxu0 %v7002_v21  ;;  %10764 = vmatprep.subr.bf16.mxu1 %v10763_v36  ;;  %v7291_v21 = vld [vmem:[%s13592_s13 + $0x98] sm:$0xff] }
 0xdaf   :  { %10726 = vmatpush3.bf16.msra.mxu0 %v13046_v33  ;;  %9787 = vmatprep.mubr.f32.mxu0 %v7003_v27  ;;  %v10765_v33 = vpack.c.bf16 %v7623_v32, %v7621_v53  ;;  %v7294_v27 = vld [vmem:[%s13592_s13 + $0x110] sm:$0xff]  ;;  %v7300_v53 = vld [vmem:[%s13592_s13 + $0x200] sm:$0xff]  ;;  %v7301_v32 = vld [vmem:[%s13592_s13 + $0x228] sm:$0xff] }
 0xdb0   :  { %10728 = vmatprep.subr.bf16.mxu0 %v13052_v57  ;;  %v7303_v36 = vld [vmem:[%s13592_s13 + $0x278] sm:$0xff] }
 0xdb1   :  { %10766 = vmatpush1.bf16.msra.mxu1 %v10765_v33  ;;  %v7306_v33 = vld [vmem:[%s13592_s13 + $0x2f0] sm:$0xff] }
 0xdb2   :  { %9788 = vmatmul.mubr.f32.gmra.mrb[106].mxu0 %v7004_v20  ;;  %10768 = vmatprep.subr.bf16.mxu1 %v10767_v13  ;;  %v7299_v20 = vld [vmem:[%s13592_s13 + $0x1d8] sm:$0xff] }
 0xdb3   :  { %10730 = vmatpush3.bf16.msra.mxu0 %v13052_v57  ;;  %9790 = vmatprep.mubr.f32.mxu0 %v7005_v6  ;;  %v10769_v57 = vpack.c.bf16 %v7627_v41, %v7625_v39  ;;  %v7302_v6 = vld [vmem:[%s13592_s13 + $0x250] sm:$0xff]  ;;  %v7308_v39 = vld [vmem:[%s13592_s13 + $0x340] sm:$0xff]  ;;  %v7309_v41 = vld [vmem:[%s13592_s13 + $0x368] sm:$0xff] }
 0xdb4   :  { %10732 = vmatprep.subr.bf16.mxu0 %v13058_v29  ;;  %v7311_v13 = vld [vmem:[%s13592_s13 + $0x3b8] sm:$0xff] }
 0xdb5   :  { %10770 = vmatpush1.bf16.msra.mxu1 %v10769_v57  ;;  %v7314_v57 = vld [vmem:[%s13592_s13 + $0x430] sm:$0xff] }
 0xdb6   :  { %9791 = vmatmul.mubr.f32.gmra.mrb[108].mxu0 %v7006_v17  ;;  %10772 = vmatprep.subr.bf16.mxu1 %v10771_v4  ;;  %v7307_v17 = vld [vmem:[%s13592_s13 + $0x318] sm:$0xff] }
 0xdb7   :  { %10734 = vmatpush3.bf16.msra.mxu0 %v13058_v29  ;;  %9793 = vmatprep.mubr.f32.mxu0 %v7007_v24  ;;  %v7010_v29 = vld [vmem:[%s13592_s13 + $0x1d0] sm:$0xff]  ;;  %v7319_v4 = vld [vmem:[%s13592_s13 + $0x4f8] sm:$0xff] }
 0xdb8   :  { %10736 = vmatprep.subr.bf16.mxu0 %v13064_v5  ;;  %v7310_v24 = vld [vmem:[%s13592_s13 + $0x390] sm:$0xff] }
 0xdb9   :  { %10774 = vmatpush1.bf16.msra.mxu1 %v10773_v42  ;;  %v10779_v42 = vpack.c.bf16 %v7640_v25, %v7638_v56 }
 0xdba   :  { %9794 = vmatmul.mubr.f32.gmra.mrb[110].mxu0 %v7008_v61  ;;  %10776 = vmatprep.subr.bf16.mxu1 %v10775_v48  ;;  %v7315_v61 = vld [vmem:[%s13592_s13 + $0x458] sm:$0xff] }
 0xdbb   :  { %10738 = vmatpush3.bf16.msra.mxu0 %v13064_v5  ;;  %9796 = vmatprep.mubr.f32.mxu0 %v7009_v55  ;;  %v7012_v5 = vld [vmem:[%s13592_s13 + $0x220] sm:$0xff]  ;;  %v7318_v55 = vld [vmem:[%s13592_s13 + $0x4d0] sm:$0xff] }
 0xdbc   :  { %10740 = vmatprep.subr.bf16.mxu0 %v13070_v1 }
 0xdbd   :  { %10778 = vmatpush1.bf16.msra.mxu1 %v10777_v16 }
 0xdbe   :  { %9797 = vmatmul.mubr.f32.gmra.mrb[112].mxu0 %v7010_v29  ;;  %v7637_v29 = vld [vmem:[%s11651_s3 + $0xe0] sm:$0xff]  ;;  %10780 = vmatprep.subr.bf16.mxu1 %v10779_v42 }
 0xdbf   :  { %10742 = vmatpush3.bf16.msra.mxu0 %v13070_v1  ;;  %9799 = vmatprep.mubr.f32.mxu0 %v7011_v22  ;;  %v7015_v1 = vld [vmem:[%s13592_s13 + $0x298] sm:$0xff]  ;;  %v10781_v3 = vpack.c.bf16 %v7639_v47, %v7637_v29  ;;  %v13308_v22 = vld [vmem:[#allocation19] ss:$0 sm:$0xff] }
 0xdc0   :  { %10744 = vmatprep.subr.bf16.mxu0 %v13076_v12 }
 0xdc1   :  { %10782 = vmatpush1.bf16.msra.mxu1 %v10781_v3 }
 0xdc2   :  { %9800 = vmatmul.mubr.f32.gmra.mrb[114].mxu0 %v7012_v5 }
 0xdc3   :  { %10746 = vmatpush3.bf16.msra.mxu0 %v13076_v12  ;;  %9802 = vmatprep.mubr.f32.mxu0 %v7013_v9  ;;  %v7018_v12 = vld [vmem:[%s13592_s13 + $0x310] sm:$0xff] }
 0xdc4   :  { %10748 = vmatprep.subr.bf16.mxu0 %v13082_v30 }
 0xdc6   :  { %9803 = vmatmul.mubr.f32.gmra.mrb[116].mxu0 %v7014_v62 }
 0xdc7   :  { %10750 = vmatpush3.bf16.msra.mxu0 %v13082_v30  ;;  %9805 = vmatprep.mubr.f32.mxu0 %v7015_v1  ;;  %v7022_v30 = vld [vmem:[%s13592_s13 + $0x3b0] sm:$0xff] }
 0xdca   :  { %9806 = vmatmul.mubr.f32.gmra.mrb[118].mxu0 %v7016_v49 }
 0xdcb   :  { %9808 = vmatprep.mubr.f32.mxu0 %v7017_v11 }
 0xdce   :  { %9809 = vmatmul.mubr.f32.gmra.mrb[120].mxu0 %v7018_v12 }
 0xdcf   :  { %9811 = vmatprep.mubr.f32.mxu0 %v7019_v54 }
 0xdd2   :  { %9812 = vmatmul.mubr.f32.gmra.mrb[122].mxu0 %v7020_v59 }
 0xdd3   :  { %9814 = vmatprep.mubr.f32.mxu0 %v7021_v60 }
 0xdd6   :  { %9815 = vmatmul.mubr.f32.gmra.mrb[124].mxu0 %v7022_v30 }
 0xdd7   :  { %9817 = vmatprep.mubr.f32.mxu0 %v7023_v51 }
 0xdda   :  { %9818 = vmatmul.mubr.f32.gmra.mrb[126].mxu0 %v7024_v63 }
 0xddb   :  { %9820 = vmatprep.mubr.f32.mxu0 %v7025_v7 }
 0xdde   :  { %9821 = vmatmul.mubr.f32.gmra.mrb[128].mxu0 %v7026_v28 }
 0xddf   :  { %9823 = vmatprep.mubr.f32.mxu0 %v7027_v10 }
 0xde2   :  { %9824 = vmatmul.mubr.f32.gmra.mrb[130].mxu0 %v7028_v38 }
 0xde3   :  { %9826 = vmatprep.mubr.f32.mxu0 %v7029_v37 }
 0xde6   :  { %9827 = vmatmul.mubr.f32.gmra.mrb[132].mxu0 %v7030_v18 }
 0xde7   :  { %9861 = vmatprep.mubr.f32.mxu0 %v7288_v45 }
 0xdea   :  { %9862 = vmatmul.mubr.f32.vlgmr.msra.gmra.mrb[102].mxu0 %v7289_v26 }
 0xdeb   :  { %9864 = vmatprep.mubr.f32.mxu0 %v7290_v19 }
 0xdee   :  { %9865 = vmatmul.mubr.f32.gmra.mrb[104].mxu0 %v7291_v21 }
 0xdef   :  { %9867 = vmatprep.mubr.f32.mxu0 %v7292_v2 }
 0xdf2   :  { %9868 = vmatmul.mubr.f32.gmra.mrb[106].mxu0 %v7293_v23 }
 0xdf3   :  { %9870 = vmatprep.mubr.f32.mxu0 %v7294_v27 }
 0xdf6   :  { %9871 = vmatmul.mubr.f32.gmra.mrb[108].mxu0 %v7295_v52 }
 0xdf7   :  { %9873 = vmatprep.mubr.f32.mxu0 %v7296_v31 }
 0xdfa   :  { %9874 = vmatmul.mubr.f32.gmra.mrb[110].mxu0 %v7297_v50 }
 0xdfb   :  { %9876 = vmatprep.mubr.f32.mxu0 %v7298_v14 }
 0xdfe   :  { %9877 = vmatmul.mubr.f32.gmra.mrb[112].mxu0 %v7299_v20 }
 0xdff   :  { %9879 = vmatprep.mubr.f32.mxu0 %v7300_v53 }
 0xe02   :  { %9880 = vmatmul.mubr.f32.gmra.mrb[114].mxu0 %v7301_v32 }
 0xe03   :  { %9882 = vmatprep.mubr.f32.mxu0 %v7302_v6 }
 0xe06   :  { %9883 = vmatmul.mubr.f32.gmra.mrb[116].mxu0 %v7303_v36 }
 0xe07   :  { %9885 = vmatprep.mubr.f32.mxu0 %v7304_v34 }
 0xe0a   :  { %9886 = vmatmul.mubr.f32.gmra.mrb[118].mxu0 %v7305_v15 }
 0xe0b   :  { %9888 = vmatprep.mubr.f32.mxu0 %v7306_v33 }
 0xe0e   :  { %9889 = vmatmul.mubr.f32.gmra.mrb[120].mxu0 %v7307_v17 }
 0xe0f   :  { %9891 = vmatprep.mubr.f32.mxu0 %v7308_v39 }
 0xe12   :  { %9892 = vmatmul.mubr.f32.gmra.mrb[122].mxu0 %v7309_v41 }
 0xe13   :  { %9894 = vmatprep.mubr.f32.mxu0 %v7310_v24 }
 0xe16   :  { %9895 = vmatmul.mubr.f32.gmra.mrb[124].mxu0 %v7311_v13 }
 0xe17   :  { %9897 = vmatprep.mubr.f32.mxu0 %v7312_v35 }
 0xe1a   :  { %9898 = vmatmul.mubr.f32.gmra.mrb[126].mxu0 %v7313_v40 }
 0xe1b   :  { %9900 = vmatprep.mubr.f32.mxu0 %v7314_v57 }
 0xe1e   :  { %9901 = vmatmul.mubr.f32.gmra.mrb[128].mxu0 %v7315_v61 }
 0xe1f   :  { %9903 = vmatprep.mubr.f32.mxu0 %v7316_v8 }
 0xe22   :  { %9904 = vmatmul.mubr.f32.gmra.mrb[130].mxu0 %v7317_v58 }
 0xe23   :  { %9906 = vmatprep.mubr.f32.mxu0 %v7318_v55 }
 0xe26   :  { %9907 = vmatmul.mubr.f32.gmra.mrb[132].mxu0 %v7319_v4 }
 0xebd   :  { %v9863_v48 = vpop.f32.mrb[102].mxu0 }
 0xebe   :  { %v7386_v16 = vpop.f32.mrb[103].mxu0  ;;  %v10816_v9 = vadd.f32 %v9863_v48, %v13308_v22 }
 0xebf   :  { %v10817_v5 = vadd.f32 %v13308_v22, %v7386_v16 }
 0xec0   :  { %v7578_v11 = vmax.f32 %v10816_v9, 0.0 }
 0xec1   :  { %v7577_v62 = vmax.f32 %v10817_v5, 0.0  ;;  %v9866_v1 = vpop.f32.mrb[104].mxu0 }
 0xec2   :  { %v7396_v49 = vpop.f32.mrb[105].mxu0  ;;  %v10818_v60 = vadd.f32 %v9866_v1, %v13308_v22 }
 0xec3   :  { %7718 = vmatmul.mubr.f32.vlgmr.msra.gmra.mrb[108].mxu1 %v7577_v62  ;;  %v10819_v12 = vadd.f32 %v13308_v22, %v7396_v49 }
 0xec4   :  { %7723 = vmatprep.mubr.f32.mxu1 %v11497_v0  ;;  %v7580_v7 = vmax.f32 %v10818_v60, 0.0 }
 0xec5   :  { %v9869_v54 = vpop.f32.mrb[106].mxu0  ;;  %v7579_v30 = vmax.f32 %v10819_v12, 0.0 }
 0xec6   :  { %v7406_v59 = vpop.f32.mrb[107].mxu0  ;;  %v10820_v37 = vadd.f32 %v9869_v54, %v13308_v22 }
 0xec7   :  { %7724 = vmatmul.mubr.f32.gmra.mrb[110].mxu1 %v7578_v11  ;;  %v10821_v28 = vadd.f32 %v13308_v22, %v7406_v59 }
 0xec8   :  { %7729 = vmatprep.mubr.f32.mxu1 %v11497_v0  ;;  %v7582_v19 = vmax.f32 %v10820_v37, 0.0 }
 0xec9   :  { %v9872_v51 = vpop.f32.mrb[108].mxu0  ;;  %v7581_v18 = vmax.f32 %v10821_v28, 0.0 }
 0xeca   :  { %v7416_v63 = vpop.f32.mrb[109].mxu0  ;;  %v10822_v27 = vadd.f32 %v9872_v51, %v13308_v22 }
 0xecb   :  { %7730 = vmatmul.mubr.f32.gmra.mrb[112].mxu1 %v7579_v30  ;;  %v10823_v21 = vadd.f32 %v13308_v22, %v7416_v63 }
 0xecc   :  { %7735 = vmatprep.mubr.f32.mxu1 %v11497_v0  ;;  %v7584_v14 = vmax.f32 %v10822_v27, 0.0 }
 0xecd   :  { %v9875_v10 = vpop.f32.mrb[110].mxu0  ;;  %v7583_v52 = vmax.f32 %v10823_v21, 0.0 }
 0xece   :  { %v7426_v38 = vpop.f32.mrb[111].mxu0  ;;  %v10824_v34 = vadd.f32 %v9875_v10, %v13308_v22 }
 0xecf   :  { %7736 = vmatmul.mubr.f32.gmra.mrb[114].mxu1 %v7580_v7  ;;  %v10825_v20 = vadd.f32 %v13308_v22, %v7426_v38 }
 0xed0   :  { %7741 = vmatprep.mubr.f32.mxu1 %v11497_v0  ;;  %v7586_v24 = vmax.f32 %v10824_v34, 0.0 }
 0xed1   :  { %v9878_v45 = vpop.f32.mrb[112].mxu0  ;;  %v7585_v15 = vmax.f32 %v10825_v20, 0.0 }
 0xed2   :  { %v7436_v26 = vpop.f32.mrb[113].mxu0  ;;  %v10826_v8 = vadd.f32 %v9878_v45, %v13308_v22 }
 0xed3   :  { %7742 = vmatmul.mubr.f32.gmra.mrb[116].mxu1 %v7581_v18  ;;  %v10827_v13 = vadd.f32 %v13308_v22, %v7436_v26 }
 0xed4   :  { %7747 = vmatprep.mubr.f32.mxu1 %v11497_v0  ;;  %v7588_v42 = vmax.f32 %v10826_v8, 0.0 }
 0xed5   :  { %v9881_v2 = vpop.f32.mrb[114].mxu0  ;;  %v7587_v58 = vmax.f32 %v10827_v13, 0.0 }
 0xed6   :  { %v7446_v23 = vpop.f32.mrb[115].mxu0  ;;  %v10828_v5 = vadd.f32 %v9881_v2, %v13308_v22 }
 0xed7   :  { %7748 = vmatmul.mubr.f32.gmra.mrb[118].mxu1 %v7582_v19  ;;  %v10829_v29 = vadd.f32 %v13308_v22, %v7446_v23 }
 0xed8   :  { %7753 = vmatprep.mubr.f32.mxu1 %v11497_v0  ;;  %v7590_v12 = vmax.f32 %v10828_v5, 0.0 }
 0xed9   :  { %v9884_v31 = vpop.f32.mrb[116].mxu0  ;;  %v7589_v9 = vmax.f32 %v10829_v29, 0.0 }
 0xeda   :  { %v7456_v50 = vpop.f32.mrb[117].mxu0  ;;  %v10830_v63 = vadd.f32 %v9884_v31, %v13308_v22 }
 0xedb   :  { %7754 = vmatmul.mubr.f32.gmra.mrb[120].mxu1 %v7583_v52  ;;  %v10831_v54 = vadd.f32 %v13308_v22, %v7456_v50 }
 0xedc   :  { %7759 = vmatprep.mubr.f32.mxu1 %v11497_v0  ;;  %v7592_v18 = vmax.f32 %v10830_v63, 0.0 }
 0xedd   :  { %v9887_v53 = vpop.f32.mrb[118].mxu0  ;;  %v7591_v7 = vmax.f32 %v10831_v54, 0.0 }
 0xede   :  { %v13327_v32 = vadd.f32 %v9887_v53, %v13308_v22  ;;  %v7466_v6 = vpop.f32.mrb[119].mxu0 }
 0xedf   :  { %v13330_v36 = vadd.f32 %v13308_v22, %v7466_v6  ;;  %7760 = vmatmul.mubr.f32.gmra.mrb[122].mxu1 %v7584_v14 }
 0xee0   :  { %7765 = vmatprep.mubr.f32.mxu1 %v11497_v0  ;;  %v7594_v26 = vmax.f32 %v13327_v32, 0.0 }
 0xee1   :  { %v9890_v33 = vpop.f32.mrb[120].mxu0  ;;  %v7593_v45 = vmax.f32 %v13330_v36, 0.0  ;;  %v7641_v36 = vld [vmem:[%s11656_s17] sm:$0x3] }
 0xee2   :  { %v13335_v17 = vadd.f32 %v9890_v33, %v13308_v22  ;;  %v7476_v39 = vpop.f32.mrb[121].mxu0  ;;  %v13388_v34 = vrot.slane %v7641_v36, %v480_v44 }
 0xee3   :  { %v10835_v41 = vadd.f32 %v13308_v22, %v7476_v39  ;;  %7766 = vmatmul.mubr.f32.gmra.mrb[124].mxu1 %v7585_v15  ;;  %v13392_v15 = vrot.slane %v7641_v36, %v484_v46 }
 0xee4   :  { %7771 = vmatprep.mubr.f32.mxu1 %v11497_v0 }
 0xee5   :  { %v9893_v35 = vpop.f32.mrb[122].mxu0  ;;  %v7595_v19 = vmax.f32 %v10835_v41, 0.0 }
 0xee6   :  { %v13341_v40 = vadd.f32 %v9893_v35, %v13308_v22  ;;  %v7486_v57 = vpop.f32.mrb[123].mxu0 }
 0xee7   :  { %v10837_v61 = vadd.f32 %v13308_v22, %v7486_v57  ;;  %7772 = vmatmul.mubr.f32.gmra.mrb[126].mxu1 %v7586_v24 }
 0xee8   :  { %7777 = vmatprep.mubr.f32.mxu1 %v11497_v0  ;;  %v7598_v2 = vmax.f32 %v13341_v40, 0.0 }
 0xee9   :  { %v9896_v55 = vpop.f32.mrb[124].mxu0  ;;  %v7597_v21 = vmax.f32 %v10837_v61, 0.0 }
 0xeea   :  { %v10838_v4 = vadd.f32 %v9896_v55, %v13308_v22  ;;  %v7496_v56 = vpop.f32.mrb[125].mxu0 }
 0xeeb   :  { %v10839_v25 = vadd.f32 %v13308_v22, %v7496_v56  ;;  %7778 = vmatmul.mubr.f32.gmra.mrb[128].mxu1 %v7587_v58 }
 0xeec   :  { %7783 = vmatprep.mubr.f32.mxu1 %v11497_v0  ;;  %v7600_v27 = vmax.f32 %v10838_v4, 0.0 }
 0xeed   :  { %v9899_v47 = vpop.f32.mrb[126].mxu0  ;;  %v7599_v23 = vmax.f32 %v10839_v25, 0.0 }
 0xeee   :  { %v10840_v3 = vadd.f32 %v9899_v47, %v13308_v22  ;;  %v7506_v48 = vpop.f32.mrb[127].mxu0 }
 0xeef   :  { %v10841_v16 = vadd.f32 %v13308_v22, %v7506_v48  ;;  %7784 = vmatmul.mubr.f32.gmra.mrb[130].mxu1 %v7588_v42 }
 0xef0   :  { %7789 = vmatprep.mubr.f32.mxu1 %v11497_v0  ;;  %v7602_v31 = vmax.f32 %v10840_v3, 0.0 }
 0xef1   :  { %v9902_v62 = vpop.f32.mrb[128].mxu0  ;;  %v7601_v52 = vmax.f32 %v10841_v16, 0.0 }
 0xef2   :  { %v10842_v1 = vadd.f32 %v9902_v62, %v13308_v22  ;;  %v7516_v49 = vpop.f32.mrb[129].mxu0 }
 0xef3   :  { %v10843_v11 = vadd.f32 %v13308_v22, %v7516_v49  ;;  %7790 = vmatmul.mubr.f32.gmra.mrb[132].mxu1 %v7589_v9 }
 0xef4   :  { %7795 = vmatprep.mubr.f32.mxu1 %v11497_v0  ;;  %v7604_v14 = vmax.f32 %v10842_v1, 0.0 }
 0xef5   :  { %v9905_v59 = vpop.f32.mrb[130].mxu0  ;;  %v7603_v50 = vmax.f32 %v10843_v11, 0.0 }
 0xef6   :  { %v10844_v60 = vadd.f32 %v9905_v59, %v13308_v22  ;;  %v7526_v30 = vpop.f32.mrb[131].mxu0 }
 0xef7   :  { %v10845_v51 = vadd.f32 %v13308_v22, %v7526_v30  ;;  %7796 = vmatmul.mubr.f32.gmra.mrb[134].mxu1 %v7590_v12 }
 0xef8   :  { %7801 = vmatprep.mubr.f32.mxu1 %v11497_v0  ;;  %v7606_v53 = vmax.f32 %v10844_v60, 0.0 }
 0xef9   :  { %v9908_v28 = vpop.f32.mrb[132].mxu0  ;;  %v7605_v20 = vmax.f32 %v10845_v51, 0.0 }
 0xefa   :  { %v10846_v10 = vadd.f32 %v9908_v28, %v13308_v22  ;;  %v7536_v38 = vpop.f32.mrb[133].mxu0 }
 0xefb   :  { %v10847_v37 = vadd.f32 %v13308_v22, %v7536_v38  ;;  %7802 = vmatmul.mubr.f32.gmra.mrb[136].mxu1 %v7591_v7  ;;  %v7596_v22 = vmax.f32 %v13335_v17, 0.0 }
 0xefc   :  { %7807 = vmatprep.mubr.f32.mxu1 %v11497_v0  ;;  %v7608_v6 = vmax.f32 %v10846_v10, 0.0 }
 0xefd   :  { %v7607_v32 = vmax.f32 %v10847_v37, 0.0 }
 0xeff   :  { %7808 = vmatmul.mubr.f32.gmra.mrb[138].mxu1 %v7592_v18 }
 0xf00   :  { %7813 = vmatprep.mubr.f32.mxu1 %v11497_v0 }
 0xf03   :  { %7814 = vmatmul.mubr.f32.gmra.mrb[140].mxu1 %v7593_v45 }
 0xf04   :  { %7819 = vmatprep.mubr.f32.mxu1 %v11497_v0 }
 0xf07   :  { %7820 = vmatmul.mubr.f32.gmra.mrb[142].mxu1 %v7594_v26 }
 0xf08   :  { %7825 = vmatprep.mubr.f32.mxu1 %v11497_v0 }
 0xf0b   :  { %7826 = vmatmul.mubr.f32.gmra.mrb[144].mxu1 %v7595_v19 }
 0xf0c   :  { %7831 = vmatprep.mubr.f32.mxu1 %v11497_v0 }
 0xf0f   :  { %7832 = vmatmul.mubr.f32.gmra.mrb[146].mxu1 %v7596_v22 }
 0xf10   :  { %7837 = vmatprep.mubr.f32.mxu1 %v11497_v0 }
 0xf13   :  { %7838 = vmatmul.mubr.f32.gmra.mrb[148].mxu1 %v7597_v21 }
 0xf14   :  { %7843 = vmatprep.mubr.f32.mxu1 %v11497_v0 }
 0xf17   :  { %7844 = vmatmul.mubr.f32.gmra.mrb[150].mxu1 %v7598_v2 }
 0xf18   :  { %7849 = vmatprep.mubr.f32.mxu1 %v11497_v0 }
 0xf1b   :  { %7850 = vmatmul.mubr.f32.gmra.mrb[152].mxu1 %v7599_v23 }
 0xf1c   :  { %7855 = vmatprep.mubr.f32.mxu1 %v11497_v0 }
 0xf1f   :  { %7856 = vmatmul.mubr.f32.gmra.mrb[154].mxu1 %v7600_v27 }
 0xf20   :  { %7861 = vmatprep.mubr.f32.mxu1 %v11497_v0 }
 0xf23   :  { %7862 = vmatmul.mubr.f32.gmra.mrb[156].mxu1 %v7601_v52 }
 0xf24   :  { %7867 = vmatprep.mubr.f32.mxu1 %v11497_v0 }
 0xf27   :  { %7868 = vmatmul.mubr.f32.gmra.mrb[158].mxu1 %v7602_v31 }
 0xf28   :  { %7873 = vmatprep.mubr.f32.mxu1 %v11497_v0 }
 0xf2b   :  { %7874 = vmatmul.mubr.f32.gmra.mrb[160].mxu1 %v7603_v50 }
 0xf2c   :  { %7879 = vmatprep.mubr.f32.mxu1 %v11497_v0 }
 0xf2f   :  { %7880 = vmatmul.mubr.f32.gmra.mrb[162].mxu1 %v7604_v14 }
 0xf30   :  { %7885 = vmatprep.mubr.f32.mxu1 %v11497_v0 }
 0xf33   :  { %7886 = vmatmul.mubr.f32.gmra.mrb[164].mxu1 %v7605_v20 }
 0xf34   :  { %7891 = vmatprep.mubr.f32.mxu1 %v11497_v0 }
 0xf37   :  { %7892 = vmatmul.mubr.f32.gmra.mrb[166].mxu1 %v7606_v53 }
 0xf38   :  { %7897 = vmatprep.mubr.f32.mxu1 %v11497_v0 }
 0xf3b   :  { %7898 = vmatmul.mubr.f32.gmra.mrb[168].mxu1 %v7607_v32 }
 0xf3c   :  { %7903 = vmatprep.mubr.f32.mxu1 %v11497_v0 }
 0xf3f   :  { %7904 = vmatmul.mubr.f32.gmra.mrb[170].mxu1 %v7608_v6 }
 0xf96   :  { %v7719_v33 = vpop.f32.mrb[108].mxu1 }
 0xf97   :  { %v7720_v17 = vadd.f32 %v7719_v33, %v13388_v34  ;;  %v7721_v39 = vpop.f32.mrb[109].mxu1 }
 0xf98   :  { %v7722_v0 = vadd.f32 %v7721_v39, %v13392_v15 }
 0xf99   :  { %7910 = vst [vmem:[%s11661_s19] sm:$0xff] %v7720_v17 }
 0xf9a   :  { %7911 = vst.msk [vmem:[%s11661_s19 + $0x8] sm:$0xff] %vm488_vm7, %v7722_v0  ;;  %v7725_v41 = vpop.f32.mrb[110].mxu1 }
 0xf9b   :  { %v7726_v44 = vadd.f32 %v7725_v41, %v13388_v34  ;;  %v7727_v24 = vpop.f32.mrb[111].mxu1 }
 0xf9c   :  { %v7728_v43 = vadd.f32 %v7727_v24, %v13392_v15 }
 0xf9d   :  { %7912 = vst [vmem:[%s11661_s19 + $0x10] sm:$0xff] %v7726_v44 }
 0xf9e   :  { %7913 = vst.msk [vmem:[%s11661_s19 + $0x18] sm:$0xff] %vm488_vm7, %v7728_v43  ;;  %v7731_v46 = vpop.f32.mrb[112].mxu1 }
 0xf9f   :  { %v7732_v13 = vadd.f32 %v7731_v46, %v13388_v34  ;;  %v7733_v35 = vpop.f32.mrb[113].mxu1 }
 0xfa0   :  { %v7734_v40 = vadd.f32 %v7733_v35, %v13392_v15 }
 0xfa1   :  { %7914 = vst [vmem:[%s11661_s19 + $0x20] sm:$0xff] %v7732_v13 }
 0xfa2   :  { %7915 = vst.msk [vmem:[%s11661_s19 + $0x28] sm:$0xff] %vm488_vm7, %v7734_v40  ;;  %v7737_v57 = vpop.f32.mrb[114].mxu1 }
 0xfa3   :  { %v7738_v61 = vadd.f32 %v7737_v57, %v13388_v34  ;;  %v7739_v8 = vpop.f32.mrb[115].mxu1 }
 0xfa4   :  { %v7740_v58 = vadd.f32 %v7739_v8, %v13392_v15 }
 0xfa5   :  { %7916 = vst [vmem:[%s11661_s19 + $0x30] sm:$0xff] %v7738_v61 }
 0xfa6   :  { %7917 = vst.msk [vmem:[%s11661_s19 + $0x38] sm:$0xff] %vm488_vm7, %v7740_v58  ;;  %v7743_v55 = vpop.f32.mrb[116].mxu1 }
 0xfa7   :  { %v7744_v4 = vadd.f32 %v7743_v55, %v13388_v34  ;;  %v7745_v56 = vpop.f32.mrb[117].mxu1 }
 0xfa8   :  { %v7746_v25 = vadd.f32 %v7745_v56, %v13392_v15 }
 0xfa9   :  { %7918 = vst [vmem:[%s11661_s19 + $0x40] sm:$0xff] %v7744_v4 }
 0xfaa   :  { %7919 = vst.msk [vmem:[%s11661_s19 + $0x48] sm:$0xff] %vm488_vm7, %v7746_v25  ;;  %v7749_v42 = vpop.f32.mrb[118].mxu1 }
 0xfab   :  { %v7750_v29 = vadd.f32 %v7749_v42, %v13388_v34  ;;  %v7751_v47 = vpop.f32.mrb[119].mxu1 }
 0xfac   :  { %v7752_v3 = vadd.f32 %v7751_v47, %v13392_v15 }
 0xfad   :  { %7920 = vst [vmem:[%s11661_s19 + $0x50] sm:$0xff] %v7750_v29 }
 0xfae   :  { %7921 = vst.msk [vmem:[%s11661_s19 + $0x58] sm:$0xff] %vm488_vm7, %v7752_v3  ;;  %v7755_v48 = vpop.f32.mrb[120].mxu1 }
 0xfaf   :  { %v7756_v16 = vadd.f32 %v7755_v48, %v13388_v34  ;;  %v7757_v5 = vpop.f32.mrb[121].mxu1 }
 0xfb0   :  { %v7758_v9 = vadd.f32 %v7757_v5, %v13392_v15 }
 0xfb1   :  { %7922 = vst [vmem:[%s11661_s19 + $0x60] sm:$0xff] %v7756_v16 }
 0xfb2   :  { %7923 = vst.msk [vmem:[%s11661_s19 + $0x68] sm:$0xff] %vm488_vm7, %v7758_v9  ;;  %v7761_v62 = vpop.f32.mrb[122].mxu1 }
 0xfb3   :  { %v7762_v1 = vadd.f32 %v7761_v62, %v13388_v34  ;;  %v7763_v49 = vpop.f32.mrb[123].mxu1 }
 0xfb4   :  { %v7764_v11 = vadd.f32 %v7763_v49, %v13392_v15 }
 0xfb5   :  { %7924 = vst [vmem:[%s11661_s19 + $0x70] sm:$0xff] %v7762_v1 }
 0xfb6   :  { %7925 = vst.msk [vmem:[%s11661_s19 + $0x78] sm:$0xff] %vm488_vm7, %v7764_v11  ;;  %v7767_v12 = vpop.f32.mrb[124].mxu1 }
 0xfb7   :  { %v7768_v54 = vadd.f32 %v7767_v12, %v13388_v34  ;;  %v7769_v59 = vpop.f32.mrb[125].mxu1 }
 0xfb8   :  { %v7770_v60 = vadd.f32 %v7769_v59, %v13392_v15 }
 0xfb9   :  { %7926 = vst [vmem:[%s11661_s19 + $0x80] sm:$0xff] %v7768_v54 }
 0xfba   :  { %7927 = vst.msk [vmem:[%s11661_s19 + $0x88] sm:$0xff] %vm488_vm7, %v7770_v60  ;;  %v7773_v30 = vpop.f32.mrb[126].mxu1 }
 0xfbb   :  { %v7774_v51 = vadd.f32 %v7773_v30, %v13388_v34  ;;  %v7775_v63 = vpop.f32.mrb[127].mxu1 }
 0xfbc   :  { %v7776_v7 = vadd.f32 %v7775_v63, %v13392_v15 }
 0xfbd   :  { %7928 = vst [vmem:[%s11661_s19 + $0x90] sm:$0xff] %v7774_v51 }
 0xfbe   :  { %7929 = vst.msk [vmem:[%s11661_s19 + $0x98] sm:$0xff] %vm488_vm7, %v7776_v7  ;;  %v7779_v28 = vpop.f32.mrb[128].mxu1 }
 0xfbf   :  { %v7780_v10 = vadd.f32 %v7779_v28, %v13388_v34  ;;  %v7781_v38 = vpop.f32.mrb[129].mxu1 }
 0xfc0   :  { %v7782_v37 = vadd.f32 %v7781_v38, %v13392_v15 }
 0xfc1   :  { %7930 = vst [vmem:[%s11661_s19 + $0xa0] sm:$0xff] %v7780_v10 }
 0xfc2   :  { %7931 = vst.msk [vmem:[%s11661_s19 + $0xa8] sm:$0xff] %vm488_vm7, %v7782_v37  ;;  %v7785_v18 = vpop.f32.mrb[130].mxu1 }
 0xfc3   :  { %v7786_v45 = vadd.f32 %v7785_v18, %v13388_v34  ;;  %v7787_v26 = vpop.f32.mrb[131].mxu1 }
 0xfc4   :  { %v7788_v19 = vadd.f32 %v7787_v26, %v13392_v15 }
 0xfc5   :  { %7932 = vst [vmem:[%s11661_s19 + $0xb0] sm:$0xff] %v7786_v45 }
 0xfc6   :  { %7933 = vst.msk [vmem:[%s11661_s19 + $0xb8] sm:$0xff] %vm488_vm7, %v7788_v19  ;;  %v7791_v22 = vpop.f32.mrb[132].mxu1 }
 0xfc7   :  { %v7792_v21 = vadd.f32 %v7791_v22, %v13388_v34  ;;  %v7793_v2 = vpop.f32.mrb[133].mxu1 }
 0xfc8   :  { %v7794_v23 = vadd.f32 %v7793_v2, %v13392_v15 }
 0xfc9   :  { %7934 = vst [vmem:[%s11661_s19 + $0xc0] sm:$0xff] %v7792_v21 }
 0xfca   :  { %7935 = vst.msk [vmem:[%s11661_s19 + $0xc8] sm:$0xff] %vm488_vm7, %v7794_v23  ;;  %v7797_v27 = vpop.f32.mrb[134].mxu1 }
 0xfcb   :  { %v7798_v52 = vadd.f32 %v7797_v27, %v13388_v34  ;;  %v7799_v31 = vpop.f32.mrb[135].mxu1 }
 0xfcc   :  { %v7800_v50 = vadd.f32 %v7799_v31, %v13392_v15 }
 0xfcd   :  { %7936 = vst [vmem:[%s11661_s19 + $0xd0] sm:$0xff] %v7798_v52 }
 0xfce   :  { %7937 = vst.msk [vmem:[%s11661_s19 + $0xd8] sm:$0xff] %vm488_vm7, %v7800_v50  ;;  %v7803_v14 = vpop.f32.mrb[136].mxu1 }
 0xfcf   :  { %v7804_v20 = vadd.f32 %v7803_v14, %v13388_v34  ;;  %v7805_v53 = vpop.f32.mrb[137].mxu1 }
 0xfd0   :  { %v7806_v32 = vadd.f32 %v7805_v53, %v13392_v15 }
 0xfd1   :  { %7938 = vst [vmem:[%s11661_s19 + $0xe0] sm:$0xff] %v7804_v20 }
 0xfd2   :  { %7939 = vst.msk [vmem:[%s11661_s19 + $0xe8] sm:$0xff] %vm488_vm7, %v7806_v32  ;;  %v7809_v6 = vpop.f32.mrb[138].mxu1 }
 0xfd3   :  { %v7810_v36 = vadd.f32 %v7809_v6, %v13388_v34  ;;  %v7811_v33 = vpop.f32.mrb[139].mxu1 }
 0xfd4   :  { %v7812_v17 = vadd.f32 %v7811_v33, %v13392_v15 }
 0xfd5   :  { %7940 = vst [vmem:[%s11661_s19 + $0xf0] sm:$0xff] %v7810_v36 }
 0xfd6   :  { %7941 = vst.msk [vmem:[%s11661_s19 + $0xf8] sm:$0xff] %vm488_vm7, %v7812_v17  ;;  %v7815_v39 = vpop.f32.mrb[140].mxu1 }
 0xfd7   :  { %v7816_v0 = vadd.f32 %v7815_v39, %v13388_v34  ;;  %v7817_v41 = vpop.f32.mrb[141].mxu1 }
 0xfd8   :  { %v7818_v44 = vadd.f32 %v7817_v41, %v13392_v15 }
 0xfd9   :  { %7942 = vst [vmem:[%s11661_s19 + $0x100] sm:$0xff] %v7816_v0 }
 0xfda   :  { %7943 = vst.msk [vmem:[%s11661_s19 + $0x108] sm:$0xff] %vm488_vm7, %v7818_v44  ;;  %v7821_v24 = vpop.f32.mrb[142].mxu1 }
 0xfdb   :  { %v7822_v43 = vadd.f32 %v7821_v24, %v13388_v34  ;;  %v7823_v46 = vpop.f32.mrb[143].mxu1 }
 0xfdc   :  { %v7824_v13 = vadd.f32 %v7823_v46, %v13392_v15 }
 0xfdd   :  { %7944 = vst [vmem:[%s11661_s19 + $0x110] sm:$0xff] %v7822_v43 }
 0xfde   :  { %7945 = vst.msk [vmem:[%s11661_s19 + $0x118] sm:$0xff] %vm488_vm7, %v7824_v13  ;;  %v7827_v35 = vpop.f32.mrb[144].mxu1 }
 0xfdf   :  { %v7828_v40 = vadd.f32 %v7827_v35, %v13388_v34  ;;  %v7829_v57 = vpop.f32.mrb[145].mxu1 }
 0xfe0   :  { %v7830_v61 = vadd.f32 %v7829_v57, %v13392_v15 }
 0xfe1   :  { %7946 = vst [vmem:[%s11661_s19 + $0x120] sm:$0xff] %v7828_v40 }
 0xfe2   :  { %7947 = vst.msk [vmem:[%s11661_s19 + $0x128] sm:$0xff] %vm488_vm7, %v7830_v61  ;;  %v7833_v8 = vpop.f32.mrb[146].mxu1 }
 0xfe3   :  { %v7834_v58 = vadd.f32 %v7833_v8, %v13388_v34  ;;  %v7835_v55 = vpop.f32.mrb[147].mxu1 }
 0xfe4   :  { %v7836_v4 = vadd.f32 %v7835_v55, %v13392_v15 }
 0xfe5   :  { %7948 = vst [vmem:[%s11661_s19 + $0x130] sm:$0xff] %v7834_v58 }
 0xfe6   :  { %7949 = vst.msk [vmem:[%s11661_s19 + $0x138] sm:$0xff] %vm488_vm7, %v7836_v4  ;;  %v7839_v56 = vpop.f32.mrb[148].mxu1 }
 0xfe7   :  { %v7840_v25 = vadd.f32 %v7839_v56, %v13388_v34  ;;  %v7841_v42 = vpop.f32.mrb[149].mxu1 }
 0xfe8   :  { %v7842_v29 = vadd.f32 %v7841_v42, %v13392_v15 }
 0xfe9   :  { %7950 = vst [vmem:[%s11661_s19 + $0x140] sm:$0xff] %v7840_v25 }
 0xfea   :  { %7951 = vst.msk [vmem:[%s11661_s19 + $0x148] sm:$0xff] %vm488_vm7, %v7842_v29  ;;  %v7845_v47 = vpop.f32.mrb[150].mxu1 }
 0xfeb   :  { %v7846_v3 = vadd.f32 %v7845_v47, %v13388_v34  ;;  %v7847_v48 = vpop.f32.mrb[151].mxu1 }
 0xfec   :  { %v7848_v16 = vadd.f32 %v7847_v48, %v13392_v15 }
 0xfed   :  { %7952 = vst [vmem:[%s11661_s19 + $0x150] sm:$0xff] %v7846_v3 }
 0xfee   :  { %7953 = vst.msk [vmem:[%s11661_s19 + $0x158] sm:$0xff] %vm488_vm7, %v7848_v16  ;;  %v7851_v5 = vpop.f32.mrb[152].mxu1 }
 0xfef   :  { %v7852_v9 = vadd.f32 %v7851_v5, %v13388_v34  ;;  %v7853_v62 = vpop.f32.mrb[153].mxu1 }
 0xff0   :  { %v7854_v1 = vadd.f32 %v7853_v62, %v13392_v15 }
 0xff1   :  { %7954 = vst [vmem:[%s11661_s19 + $0x160] sm:$0xff] %v7852_v9 }
 0xff2   :  { %7955 = vst.msk [vmem:[%s11661_s19 + $0x168] sm:$0xff] %vm488_vm7, %v7854_v1  ;;  %v7857_v49 = vpop.f32.mrb[154].mxu1 }
 0xff3   :  { %v7858_v11 = vadd.f32 %v7857_v49, %v13388_v34  ;;  %v7859_v12 = vpop.f32.mrb[155].mxu1 }
 0xff4   :  { %v7860_v54 = vadd.f32 %v7859_v12, %v13392_v15 }
 0xff5   :  { %7956 = vst [vmem:[%s11661_s19 + $0x170] sm:$0xff] %v7858_v11 }
 0xff6   :  { %7957 = vst.msk [vmem:[%s11661_s19 + $0x178] sm:$0xff] %vm488_vm7, %v7860_v54  ;;  %v7863_v59 = vpop.f32.mrb[156].mxu1 }
 0xff7   :  { %v7864_v60 = vadd.f32 %v7863_v59, %v13388_v34  ;;  %v7865_v30 = vpop.f32.mrb[157].mxu1 }
 0xff8   :  { %v7866_v51 = vadd.f32 %v7865_v30, %v13392_v15 }
 0xff9   :  { %7958 = vst [vmem:[%s11661_s19 + $0x180] sm:$0xff] %v7864_v60 }
 0xffa   :  { %7959 = vst.msk [vmem:[%s11661_s19 + $0x188] sm:$0xff] %vm488_vm7, %v7866_v51  ;;  %v7869_v63 = vpop.f32.mrb[158].mxu1 }
 0xffb   :  { %v7870_v7 = vadd.f32 %v7869_v63, %v13388_v34  ;;  %v7871_v28 = vpop.f32.mrb[159].mxu1 }
 0xffc   :  { %v7872_v10 = vadd.f32 %v7871_v28, %v13392_v15 }
 0xffd   :  { %7960 = vst [vmem:[%s11661_s19 + $0x190] sm:$0xff] %v7870_v7 }
 0xffe   :  { %7961 = vst.msk [vmem:[%s11661_s19 + $0x198] sm:$0xff] %vm488_vm7, %v7872_v10  ;;  %v7875_v38 = vpop.f32.mrb[160].mxu1 }
 0xfff   :  { %v7876_v37 = vadd.f32 %v7875_v38, %v13388_v34  ;;  %v7877_v18 = vpop.f32.mrb[161].mxu1 }
0x1000   :  { %v7878_v45 = vadd.f32 %v7877_v18, %v13392_v15 }
0x1001   :  { %7962 = vst [vmem:[%s11661_s19 + $0x1a0] sm:$0xff] %v7876_v37 }
0x1002   :  { %7963 = vst.msk [vmem:[%s11661_s19 + $0x1a8] sm:$0xff] %vm488_vm7, %v7878_v45  ;;  %v7881_v26 = vpop.f32.mrb[162].mxu1 }
0x1003   :  { %v7882_v19 = vadd.f32 %v7881_v26, %v13388_v34  ;;  %v7883_v22 = vpop.f32.mrb[163].mxu1 }
0x1004   :  { %v7884_v21 = vadd.f32 %v7883_v22, %v13392_v15 }
0x1005   :  { %7964 = vst [vmem:[%s11661_s19 + $0x1b0] sm:$0xff] %v7882_v19 }
0x1006   :  { %7965 = vst.msk [vmem:[%s11661_s19 + $0x1b8] sm:$0xff] %vm488_vm7, %v7884_v21  ;;  %v7887_v2 = vpop.f32.mrb[164].mxu1 }
0x1007   :  { %v7888_v23 = vadd.f32 %v7887_v2, %v13388_v34  ;;  %v7889_v27 = vpop.f32.mrb[165].mxu1 }
0x1008   :  { %v7890_v52 = vadd.f32 %v7889_v27, %v13392_v15 }
0x1009   :  { %7966 = vst [vmem:[%s11661_s19 + $0x1c0] sm:$0xff] %v7888_v23 }
0x100a   :  { %7967 = vst.msk [vmem:[%s11661_s19 + $0x1c8] sm:$0xff] %vm488_vm7, %v7890_v52  ;;  %v7893_v31 = vpop.f32.mrb[166].mxu1 }
0x100b   :  { %v7894_v50 = vadd.f32 %v7893_v31, %v13388_v34  ;;  %v7895_v14 = vpop.f32.mrb[167].mxu1 }
0x100c   :  { %v7896_v20 = vadd.f32 %v7895_v14, %v13392_v15 }
0x100d   :  { %7968 = vst [vmem:[%s11661_s19 + $0x1d0] sm:$0xff] %v7894_v50 }
0x100e   :  { %7969 = vst.msk [vmem:[%s11661_s19 + $0x1d8] sm:$0xff] %vm488_vm7, %v7896_v20  ;;  %v7899_v53 = vpop.f32.mrb[168].mxu1 }
0x100f   :  { %v7900_v32 = vadd.f32 %v7899_v53, %v13388_v34  ;;  %v7901_v6 = vpop.f32.mrb[169].mxu1 }
0x1010   :  { %v7902_v36 = vadd.f32 %v7901_v6, %v13392_v15 }
0x1011   :  { %7970 = vst [vmem:[%s11661_s19 + $0x1e0] sm:$0xff] %v7900_v32 }
0x1012   :  { %7971 = vst.msk [vmem:[%s11661_s19 + $0x1e8] sm:$0xff] %vm488_vm7, %v7902_v36  ;;  %v7905_v33 = vpop.f32.mrb[170].mxu1 }
0x1013   :  { %v7906_v17 = vadd.f32 %v7905_v33, %v13388_v34  ;;  %v7907_v39 = vpop.f32.mrb[171].mxu1 }
0x1014   :  { %v7908_v0 = vadd.f32 %v7907_v39, %v13392_v15 }
0x1015   :  { %7972 = vst [vmem:[%s11661_s19 + $0x1f0] sm:$0xff] %v7906_v17 }
0x1016   :  { %7973 = vst.msk [vmem:[%s11661_s19 + $0x1f8] sm:$0xff] %vm488_vm7, %v7908_v0 }
0x1017   :  { %7982 = vsyncpa [#allocation3], 1 }
0x1018   :  { %7983 = vsyncpa [#allocation5], 1 }
0x1019   :  { %7984 = vsyncpa [#allocation8], 1 }
0x101a   :  { %7985 = vsyncpa [#allocation11], 1 }
0x101b   :  { %7986 = vsyncpa [#allocation14], 1 }
0x101c   :  { %7987 = vsyncpa [#allocation17], 1 }
0x101d   :  { %7988 = vsyncpa [#allocation20], 1 }

</bundles_post_ra>
